<compile_context>
chip_gen: v6e
topology: v6e:2x2x1
jax: 0.10.0
libtpu: 0.0.40
codegen_flags: <defaults>
</compile_context>

<pallas_src>
import numpy as np
import jax
import jax.numpy as jnp
from jax.experimental import pallas as pl
from jax.experimental.pallas import tpu as pltpu

POOL = 5        # Maxout pool size (self.maxout_pool in the torch module)
EPS = 1e-5      # BatchNorm eps
LANE = 128      # lane-tile width used for per-branch activation blocks
MROWS = 8       # padded sample-row count for the post-`sel` fc stages


def _round_up(x, m):
    return (x + m - 1) // m * m


# ------------------------- torch-layout parameters ------------------------- #

def init_params(key, in_ch, spatial, output_dim):
    ks = list(range(1, spatial - 5))                        # conv1 kernel sizes
    flat_sizes = [(spatial - i - 3) ** 2 for i in ks]

    def nrm(k, shape, scale=0.1):
        return scale * jax.random.normal(k, shape, dtype=jnp.float32)

    branches = []
    for i, _k in enumerate(ks):
        key, *s = jax.random.split(key, 15)
        fin = (30 // POOL) * flat_sizes[i]
        branches.append(dict(
            w1=nrm(s[0], (60, in_ch, _k, _k)), b1=nrm(s[1], (60,)),
            g1=1.0 + nrm(s[2], (60,)), be1=nrm(s[3], (60,)),
            m1=nrm(s[4], (60,)), v1=1.0 + jnp.abs(nrm(s[5], (60,))),
            w2=nrm(s[6], (30, 60 // POOL, 5, 5)), b2=nrm(s[7], (30,)),
            g2=1.0 + nrm(s[8], (30,)), be2=nrm(s[9], (30,)),
            m2=nrm(s[10], (30,)), v2=1.0 + jnp.abs(nrm(s[11], (30,))),
            fc1_w=nrm(s[12], (60, fin)), fc1_b=nrm(s[13], (60,)),
        ))
    key, k1, k2, k3, k4 = jax.random.split(key, 5)
    params = dict(
        branches=branches,
        fc2_w=nrm(k1, (480, (60 // POOL) * len(ks))), fc2_b=nrm(k2, (480,)),
        fc3_w=nrm(k3, (output_dim, 480 // POOL)), fc3_b=nrm(k4, (480 // POOL,))[:0],  # placeholder (unused)
    )
    # fc3 bias (output_dim,)
    params["fc3_b"] = nrm(k4, (output_dim,))
    config = dict(ks=ks, flat_sizes=flat_sizes)
    return params, config


# ------------------- host-side weight packing (init time) ------------------ #

def _fold_bn(w, b, gamma, beta, mean, var):
    """Fold eval-mode BatchNorm into conv weight (scale) + shift."""
    s = gamma / np.sqrt(var + EPS)
    w_f = (w * s.reshape(-1, 1, 1, 1)).astype(np.float32)
    shift = (beta + (b - mean) * s).astype(np.float32)
    return w_f, shift


def _split_pool(arr_oc_first, pool):
    """(OC, ...) -> (pool, OC//pool, ...) with out[j, g] = in[pool*g + j]."""
    oc = arr_oc_first.shape[0]
    g = oc // pool
    return arr_oc_first.reshape((g, pool) + arr_oc_first.shape[1:]).swapaxes(0, 1)


def _pack_conv1_all(ws, shifts, ks, S, C0, pool):
    """All-branch conv1 (+folded BN) as ONE Toeplitz matmul.

    LHS rows r=(n,h), lanes kh*W0 + w*C0 + c hold x[n, c, h+kh, w].
    Output column = j*C1 + b*LANE + ow*G1 + g  (pool index j outermost,
    each branch gets a 128-lane block; padded lanes have zero weight/shift)."""
    n_br = len(ks)
    W0 = S * C0
    kmax = max(ks)
    G1 = ws[0].shape[0] // pool
    C1 = n_br * LANE
    t = np.zeros((kmax * W0, pool * C1), np.float32)
    s = np.zeros((1, pool * C1), np.float32)
    for b, (k, w, sh) in enumerate(zip(ks, ws, shifts)):
        OW1 = S - k + 1
        assert OW1 * G1 <= LANE
        w_r = _split_pool(w, pool)                      # (pool, G1, C0, k, k)
        sh_r = _split_pool(sh, pool)                    # (pool, G1)
        for kh in range(k):
            for kw in range(k):
                wj = w_r[:, :, :, kh, kw]               # (pool, G1, C0)
                for ow in range(OW1):
                    row0 = kh * W0 + (ow + kw) * C0
                    for j in range(pool):
                        col0 = j * C1 + b * LANE + ow * G1
                        t[row0:row0 + C0, col0:col0 + G1] = wj[j].T
        for j in range(pool):
            col0 = j * C1 + b * LANE
            s[0, col0:col0 + OW1 * G1] = np.tile(sh_r[j], OW1)
    return t, s


def _pack_conv2(w, shift, OW1, pool):
    """Per-branch conv2 (+folded BN) with the 5 kernel-row taps folded into K.

    LHS lanes t*LANE + ow1*CIN + c hold a1[r+t, b*LANE + ow1*CIN + c].
    Output column = j*B2 + ow2*G2 + g2 (B2 = OW2*G2, kept compact)."""
    OC, CIN, KH, KW = w.shape
    G2 = OC // pool
    OW2 = OW1 - KW + 1
    B2 = OW2 * G2
    assert OW1 * CIN <= LANE
    t = np.zeros((KH * LANE, pool * B2), np.float32)
    s = np.zeros((1, pool * B2), np.float32)
    w_r = _split_pool(w, pool)                          # (pool, G2, CIN, 5, 5)
    sh_r = _split_pool(shift, pool)
    for kh in range(KH):
        for kw in range(KW):
            wj = w_r[:, :, :, kh, kw]                   # (pool, G2, CIN)
            for ow2 in range(OW2):
                row0 = kh * LANE + (ow2 + kw) * CIN
                for j in range(pool):
                    col0 = j * B2 + ow2 * G2
                    t[row0:row0 + CIN, col0:col0 + G2] = wj[j].T
    for j in range(pool):
        s[0, j * B2:(j + 1) * B2] = np.tile(sh_r[j], OW2)
    return t, s


def _pack_fc1_all(ws, bs, oh2s, a2w, g2, pool, tmax):
    """All-branch fc1 as ONE matmul.

    fc1-LHS rows = samples, lanes = t*a2w + b*LANE + ow2*g2 + c2 (tap t = conv2
    output row).  Zero rows for taps >= OH2_b and for the lane padding make the
    padding inert.  Output column = j*C3 + b*G + g (pool index j outermost)."""
    n_br = len(ws)
    G = ws[0].shape[0] // pool                          # 12
    C3 = n_br * G
    t = np.zeros((tmax * a2w, pool * C3), np.float32)
    s = np.zeros((1, pool * C3), np.float32)
    for b, (wf, bf_, oh2) in enumerate(zip(ws, bs, oh2s)):
        ow2 = oh2
        w_r = _split_pool(wf.reshape(-1, g2, oh2, ow2), pool)   # (pool, G, g2, oh2, ow2)
        b_r = _split_pool(bf_, pool)                            # (pool, G)
        for r in range(oh2):
            for c_pos in range(ow2):
                row0 = r * a2w + b * LANE + c_pos * g2
                wj = w_r[:, :, :, r, c_pos]                     # (pool, G, g2)
                for j in range(pool):
                    col0 = j * C3 + b * G
                    t[row0:row0 + g2, col0:col0 + G] = wj[j].T
        for j in range(pool):
            s[0, j * C3 + b * G:j * C3 + (b + 1) * G] = b_r[j]
    return t, s


def _pack_fc2(w, bias, pool):
    """fc2 with the branch concat as its natural input layout (b*12 + g)."""
    OC, IN = w.shape
    G = OC // pool
    w_r = _split_pool(w, pool)                          # (pool, G, IN)
    b_r = _split_pool(bias, pool)
    m = np.zeros((IN, pool * G), np.float32)
    s = np.zeros((1, pool * G), np.float32)
    for j in range(pool):
        m[:, j * G:(j + 1) * G] = w_r[j].T
        s[0, j * G:(j + 1) * G] = b_r[j]
    return m, s


def _shift_mats(rp, tmax):
    """Stacked 0/1 row-shift matrices D_t (t=1..tmax): (D_t @ A)[r] = A[r+t]."""
    d = np.zeros((tmax * rp, rp), np.float32)
    for t in range(1, tmax + 1):
        for r in range(rp - t):
            d[(t - 1) * rp + r, r + t] = 1.0
    return d


def _gather_mats(batch, rp, S, tmax, mrows):
    """Stacked selection matrices: row t*mrows + m picks activation row m*S + t."""
    g = np.zeros((tmax * mrows, rp), np.float32)
    for t in range(tmax):
        for m in range(batch):
            g[t * mrows + m, m * S + t] = 1.0
    return g


def pack_params(params, config, batch, in_ch, spatial, pool=POOL):
    np_ = lambda a: np.asarray(a, dtype=np.float32)
    S, C0 = spatial, in_ch
    ks = config["ks"]
    n_br = len(ks)
    R = batch * S
    RP = _round_up(R, 8)
    G2 = 30 // pool
    ow2s = [S - k - 3 for k in ks]
    TMAX = max(ow2s)
    A2W = n_br * LANE
    KH2 = 5

    w1s, sh1s, w2s, sh2s, fws, fbs = [], [], [], [], [], []
    for br in params["branches"]:
        w1f, sh1 = _fold_bn(np_(br["w1"]), np_(br["b1"]), np_(br["g1"]),
                            np_(br["be1"]), np_(br["m1"]), np_(br["v1"]))
        w2f, sh2 = _fold_bn(np_(br["w2"]), np_(br["b2"]), np_(br["g2"]),
                            np_(br["be2"]), np_(br["m2"]), np_(br["v2"]))
        w1s.append(w1f); sh1s.append(sh1)
        w2s.append(w2f); sh2s.append(sh2)
        fws.append(np_(br["fc1_w"])); fbs.append(np_(br["fc1_b"]))

    t1, s1 = _pack_conv1_all(w1s, sh1s, ks, S, C0, pool)
    t2s, s2s = [], []
    for w2f, sh2, k in zip(w2s, sh2s, ks):
        t2, s2 = _pack_conv2(w2f, sh2, S - k + 1, pool)
        t2s.append(t2); s2s.append(s2)
    t3, s3 = _pack_fc1_all(fws, fbs, ow2s, A2W, G2, pool, TMAX)
    wf2, sf2 = _pack_fc2(np_(params["fc2_w"]), np_(params["fc2_b"]), pool)
    w3 = np.ascontiguousarray(np_(params["fc3_w"]).T)
    b3 = np_(params["fc3_b"]).reshape(1, -1)
    dmat = _shift_mats(RP, KH2 - 1)
    selmat = _gather_mats(batch, RP, S, TMAX, MROWS)

    bf = lambda a: jnp.asarray(a, dtype=jnp.bfloat16)
    f32 = lambda a: jnp.asarray(a, dtype=jnp.float32)
    return dict(
        t1=bf(t1), s1=f32(s1), dmat=f32(dmat),
        t2=[bf(t) for t in t2s], s2=[f32(s) for s in s2s],
        selmat=f32(selmat), t3=bf(t3), s3=f32(s3),
        w2=bf(wf2), sb2=f32(sf2), w3=bf(w3), b3=f32(b3))


# ----------------------------- fused forward ------------------------------- #

def build_forward(batch, in_ch, spatial, output_dim, ks, pool=POOL):
    S, C0 = spatial, in_ch
    n_br = len(ks)
    R = batch * S
    RP = _round_up(R, 8)
    W0 = S * C0
    KMAX = max(ks)
    KH2 = 5
    C1 = n_br * LANE                      # conv1 maxout block width (lane aligned)
    ow2s = [S - k - 3 for k in ks]
    b2s = [o * (30 // pool) for o in ow2s]
    TMAX = max(ow2s)
    A2W = n_br * LANE                     # a2 scratch width (per-branch 128 blocks)
    C3 = n_br * (60 // pool)              # 48
    CH2 = 480 // pool                     # 96
    assert batch <= MROWS
    assert (batch - 1) * S + TMAX <= RP

    def kernel(*refs):
        a0, t1, s1, dmat = refs[0:4]
        t2 = refs[4:4 + n_br]
        s2 = refs[4 + n_br:4 + 2 * n_br]
        (sel, t3, s3, wf2, sb2, w3, b3,
         o_ref, a2_scr, flhs_scr) = refs[4 + 2 * n_br:]
        f32, bf16 = jnp.float32, jnp.bfloat16

        # Padding lanes of a2_scr are read by the gather matmul (and killed by
        # zero fc1-weight rows); zero the scratch so stale VMEM can't inject NaN.
        a2_scr[...] = jnp.zeros_like(a2_scr)

        # ---- conv1 + bn1 + relu + maxout(5): ONE matmul for all 4 branches ----
        y1 = jnp.dot(a0[...], t1[...], preferred_element_type=f32) + s1[...]
        m1 = y1[:, 0:C1]
        for j in range(1, pool):                       # 128-lane-aligned slices
            m1 = jnp.maximum(m1, y1[:, j * C1:(j + 1) * C1])
        a1 = jnp.maximum(m1, 0.0)                      # (RP, n_br*128) f32

        # ---- row-shifted copies of a1 (conv2 kernel-row taps) via tiny 0/1
        #      shift-matrix matmuls: no sublane-crossing slices / relayouts ----
        shifted = [a1]
        for t in range(1, KH2):
            d = dmat[(t - 1) * RP:t * RP, :]           # aligned (RP, RP) window
            shifted.append(jnp.dot(d, a1, preferred_element_type=f32))

        # ---- conv2 + bn2 + relu + maxout(5): one matmul per branch, 5 taps
        #      folded into K via a lane-aligned concat of the shifted copies ----
        for b in range(n_br):
            lhs = jnp.concatenate(
                [shifted[t][:, b * LANE:(b + 1) * LANE] for t in range(KH2)],
                axis=1).astype(bf16)                   # (RP, 5*128)
            y2 = jnp.dot(lhs, t2[b][...], preferred_element_type=f32) + s2[b][...]
            blk = b2s[b]
            m2 = y2[:, 0:blk]
            for j in range(1, pool):
                m2 = jnp.maximum(m2, y2[:, j * blk:(j + 1) * blk])
            a2_scr[:, b * LANE:b * LANE + blk] = jnp.maximum(m2, 0.0)

        # ---- early `sel`: gather rows n*S + t (sample x fc1 row tap) with one
        #      selection matmul, so fc1/fc2/fc3 run on `batch` rows only ----
        g = jnp.dot(sel[...], a2_scr[...], preferred_element_type=f32)  # (TMAX*8, A2W)
        for t in range(TMAX):                          # aligned scratch stores
            flhs_scr[:, t * A2W:(t + 1) * A2W] = g[t * MROWS:(t + 1) * MROWS, :]

        # ---- fc1 + relu + maxout(5): ONE matmul for all 4 branches (row taps
        #      and branch concat folded into K / N; zero rows make pad inert) ----
        y3 = jnp.dot(flhs_scr[...].astype(bf16), t3[...],
                     preferred_element_type=f32) + s3[...]
        m3 = y3[:, 0:C3]
        for j in range(1, pool):
            m3 = jnp.maximum(m3, y3[:, j * C3:(j + 1) * C3])
        feats = jnp.maximum(m3, 0.0)                   # (8, 48)

        # ---- fc2 + relu + maxout(5) ----
        y4 = jnp.dot(feats.astype(bf16), wf2[...],
                     preferred_element_type=f32) + sb2[...]
        m4 = y4[:, 0:CH2]
        for j in range(1, pool):
            m4 = jnp.maximum(m4, y4[:, j * CH2:(j + 1) * CH2])
        h2 = jnp.maximum(m4, 0.0)                      # (8, 96)

        # ---- fc3 + softmax (stable; reciprocal on the EUP slot) ----
        logits = jnp.dot(h2.astype(bf16), w3[...],
                         preferred_element_type=f32) + b3[...]
        mx = jnp.max(logits, axis=-1, keepdims=True)
        e = jnp.exp(logits - mx)
        denom = jnp.sum(e, axis=-1, keepdims=True)
        probs = e * pl.reciprocal(denom, approx=True)
        o_ref[...] = probs[0:batch, :]

    n_inputs = 4 + 2 * n_br + 7
    vmem = pltpu.MemorySpace.VMEM
    call = pl.pallas_call(
        kernel,
        out_shape=jax.ShapeDtypeStruct((batch, output_dim), jnp.float32),
        in_specs=[pl.BlockSpec(memory_space=vmem)] * n_inputs,
        out_specs=pl.BlockSpec(memory_space=vmem),
        scratch_shapes=[pltpu.VMEM((RP, A2W), jnp.float32),
                        pltpu.VMEM((MROWS, TMAX * A2W), jnp.float32)],
    )

    @jax.jit
    def forward(x, packed):
        # NCHW -> rows=(n, h), lanes=(w, c); then the conv1 kernel-row taps are
        # pre-shifted into lanes on the host/XLA side (layout plumbing only).
        xr = jnp.transpose(x, (0, 2, 3, 1)).reshape(R, W0)
        xr = jnp.pad(xr, ((0, RP + KMAX - R), (0, 0)))
        a0 = jnp.concatenate([xr[kh:kh + RP, :] for kh in range(KMAX)],
                             axis=1).astype(jnp.bfloat16)
        args = [a0, packed["t1"], packed["s1"], packed["dmat"],
                *packed["t2"], *packed["s2"],
                packed["selmat"], packed["t3"], packed["s3"],
                packed["w2"], packed["sb2"], packed["w3"], packed["b3"]]
        return call(*args)

    return forward


# ----------------------- pure-JAX reference (checking) --------------------- #

def reference_forward(x, params, config, pool=POOL):
    def conv(a, w, b):
        out = jax.lax.conv_general_dilated(
            a, w, window_strides=(1, 1), padding="VALID",
            dimension_numbers=("NCHW", "OIHW", "NCHW"))
        return out + b.reshape(1, -1, 1, 1)

    def bn(a, g, be, m, v):
        s = g / jnp.sqrt(v + EPS)
        return a * s.reshape(1, -1, 1, 1) + (be - m * s).reshape(1, -1, 1, 1)

    def maxout_nchw(a):
        n, c, h, w = a.shape
        return jnp.max(a.reshape(n, c // pool, pool, h, w), axis=2)

    def maxout_vec(a):
        n, c = a.shape
        return jnp.max(a.reshape(n, c // pool, pool), axis=2)

    n = x.shape[0]
    feats = []
    for br in params["branches"]:
        a = maxout_nchw(jax.nn.relu(bn(conv(x, br["w1"], br["b1"]),
                                       br["g1"], br["be1"], br["m1"], br["v1"])))
        a = maxout_nchw(jax.nn.relu(bn(conv(a, br["w2"], br["b2"]),
                                       br["g2"], br["be2"], br["m2"], br["v2"])))
        f = a.reshape(n, -1) @ br["fc1_w"].T + br["fc1_b"]
        feats.append(maxout_vec(jax.nn.relu(f)))
    h = jnp.concatenate(feats, axis=1)
    h = maxout_vec(jax.nn.relu(h @ params["fc2_w"].T + params["fc2_b"]))
    logits = h @ params["fc3_w"].T + params["fc3_b"]
    return jax.nn.softmax(logits, axis=-1)


# --------------------------------- main ------------------------------------ #

if __name__ == "__main__":
    IN_CH, SPATIAL, OUT_DIM, BATCH = 4, 10, 10, 2            # input_dim = (4, 10)

    key = jax.random.PRNGKey(0)
    key, xkey = jax.random.split(key)
    x = jax.random.normal(xkey, (BATCH, IN_CH, SPATIAL, SPATIAL),
                          dtype=jnp.float32)

    params, config = init_params(key, IN_CH, SPATIAL, OUT_DIM)
    packed = pack_params(params, config, BATCH, IN_CH, SPATIAL)
    forward = build_forward(BATCH, IN_CH, SPATIAL, OUT_DIM, config["ks"])

    out = jax.block_until_ready(forward(x, packed))

    assert out.shape == (BATCH, OUT_DIM)
    assert bool(jnp.all(jnp.isfinite(out)))
    assert bool(jnp.allclose(jnp.sum(out, axis=1), 1.0, atol=1e-2))

    ref = jax.block_until_ready(reference_forward(x, params, config))
    max_diff = float(jnp.max(jnp.abs(out - ref)))
    assert bool(jnp.allclose(out, ref, atol=3e-2)), f"max abs diff {max_diff}"

    print("KERNEL_OK")
</pallas_src>

<mosaic_0001>
module attributes {stable_mosaic.version = 11 : i64} {
  func.func @kernel(%arg0: memref<24x160xbf16, #tpu.memory_space<vmem>>, %arg1: memref<160x2560xbf16, #tpu.memory_space<vmem>>, %arg2: memref<1x2560xf32, #tpu.memory_space<vmem>>, %arg3: memref<96x24xf32, #tpu.memory_space<vmem>>, %arg4: memref<640x180xbf16, #tpu.memory_space<vmem>>, %arg5: memref<640x150xbf16, #tpu.memory_space<vmem>>, %arg6: memref<640x120xbf16, #tpu.memory_space<vmem>>, %arg7: memref<640x90xbf16, #tpu.memory_space<vmem>>, %arg8: memref<1x180xf32, #tpu.memory_space<vmem>>, %arg9: memref<1x150xf32, #tpu.memory_space<vmem>>, %arg10: memref<1x120xf32, #tpu.memory_space<vmem>>, %arg11: memref<1x90xf32, #tpu.memory_space<vmem>>, %arg12: memref<48x24xf32, #tpu.memory_space<vmem>>, %arg13: memref<3072x240xbf16, #tpu.memory_space<vmem>>, %arg14: memref<1x240xf32, #tpu.memory_space<vmem>>, %arg15: memref<48x480xbf16, #tpu.memory_space<vmem>>, %arg16: memref<1x480xf32, #tpu.memory_space<vmem>>, %arg17: memref<96x10xbf16, #tpu.memory_space<vmem>>, %arg18: memref<1x10xf32, #tpu.memory_space<vmem>>, %arg19: memref<2x10xf32, #tpu.memory_space<vmem>>, %arg20: memref<24x512xf32, #tpu.memory_space<vmem>>, %arg21: memref<8x3072xf32, #tpu.memory_space<vmem>>) attributes {dimension_semantics = [], scalar_prefetch = 0 : i64, scratch_operands = 2 : i64, tpu.core_type = #tpu.core_type<tc>} {
    %cst = arith.constant 0.000000e+00 : f32
    %0 = vector.broadcast %cst : f32 to vector<24x512xf32>
    %c0 = arith.constant 0 : index
    %c0_0 = arith.constant 0 : index
    %1 = vector.load %arg20[%c0, %c0_0] : memref<24x512xf32, #tpu.memory_space<vmem>>, vector<24x512xf32>
    tpu.vector_store %arg20[%c0, %c0_0], %0 {strides = array<i32>} : memref<24x512xf32, #tpu.memory_space<vmem>>, vector<24x512xf32>,
    %c0_1 = arith.constant 0 : index
    %c0_2 = arith.constant 0 : index
    %2 = vector.load %arg0[%c0_1, %c0_2] : memref<24x160xbf16, #tpu.memory_space<vmem>>, vector<24x160xbf16>
    %c0_3 = arith.constant 0 : index
    %c0_4 = arith.constant 0 : index
    %3 = vector.load %arg1[%c0_3, %c0_4] : memref<160x2560xbf16, #tpu.memory_space<vmem>>, vector<160x2560xbf16>
    %cst_5 = arith.constant dense<0.000000e+00> : vector<24x2560xf32>
    %4 = tpu.matmul %2, %3, %cst_5 {dimension_numbers = #tpu.dot_dimension_numbers<[1], [0], [0], [1], [0, 0, 1, 1], [], []>} : vector<24x160xbf16>, vector<160x2560xbf16>, vector<24x2560xf32> -> vector<24x2560xf32>
    %c0_6 = arith.constant 0 : index
    %c0_7 = arith.constant 0 : index
    %5 = vector.load %arg2[%c0_6, %c0_7] : memref<1x2560xf32, #tpu.memory_space<vmem>>, vector<1x2560xf32>
    %6 = vector.broadcast %5 : vector<1x2560xf32> to vector<24x2560xf32>
    %7 = arith.addf %4, %6 : vector<24x2560xf32>
    %8 = vector.extract_strided_slice %7 {offsets = [0, 0], sizes = [24, 512], strides = [1, 1]} : vector<24x2560xf32> to vector<24x512xf32>
    %9 = vector.extract_strided_slice %7 {offsets = [0, 512], sizes = [24, 512], strides = [1, 1]} : vector<24x2560xf32> to vector<24x512xf32>
    %10 = arith.maximumf %8, %9 : vector<24x512xf32>
    %11 = vector.extract_strided_slice %7 {offsets = [0, 1024], sizes = [24, 512], strides = [1, 1]} : vector<24x2560xf32> to vector<24x512xf32>
    %12 = arith.maximumf %10, %11 : vector<24x512xf32>
    %13 = vector.extract_strided_slice %7 {offsets = [0, 1536], sizes = [24, 512], strides = [1, 1]} : vector<24x2560xf32> to vector<24x512xf32>
    %14 = arith.maximumf %12, %13 : vector<24x512xf32>
    %15 = vector.extract_strided_slice %7 {offsets = [0, 2048], sizes = [24, 512], strides = [1, 1]} : vector<24x2560xf32> to vector<24x512xf32>
    %16 = arith.maximumf %14, %15 : vector<24x512xf32>
    %cst_8 = arith.constant 0.000000e+00 : f32
    %17 = vector.broadcast %cst_8 : f32 to vector<24x512xf32>
    %18 = arith.maximumf %16, %17 : vector<24x512xf32>
    %c0_9 = arith.constant 0 : index
    %c0_10 = arith.constant 0 : index
    %19 = vector.load %arg3[%c0_9, %c0_10] : memref<96x24xf32, #tpu.memory_space<vmem>>, vector<24x24xf32>
    %cst_11 = arith.constant dense<0.000000e+00> : vector<24x512xf32>
    %20 = tpu.matmul %19, %18, %cst_11 {dimension_numbers = #tpu.dot_dimension_numbers<[1], [0], [0], [1], [0, 0, 1, 1], [], []>} : vector<24x24xf32>, vector<24x512xf32>, vector<24x512xf32> -> vector<24x512xf32>
    %c24 = arith.constant 24 : index
    %c0_12 = arith.constant 0 : index
    %21 = vector.load %arg3[%c24, %c0_12] : memref<96x24xf32, #tpu.memory_space<vmem>>, vector<24x24xf32>
    %cst_13 = arith.constant dense<0.000000e+00> : vector<24x512xf32>
    %22 = tpu.matmul %21, %18, %cst_13 {dimension_numbers = #tpu.dot_dimension_numbers<[1], [0], [0], [1], [0, 0, 1, 1], [], []>} : vector<24x24xf32>, vector<24x512xf32>, vector<24x512xf32> -> vector<24x512xf32>
    %c48 = arith.constant 48 : index
    %c0_14 = arith.constant 0 : index
    %23 = vector.load %arg3[%c48, %c0_14] : memref<96x24xf32, #tpu.memory_space<vmem>>, vector<24x24xf32>
    %cst_15 = arith.constant dense<0.000000e+00> : vector<24x512xf32>
    %24 = tpu.matmul %23, %18, %cst_15 {dimension_numbers = #tpu.dot_dimension_numbers<[1], [0], [0], [1], [0, 0, 1, 1], [], []>} : vector<24x24xf32>, vector<24x512xf32>, vector<24x512xf32> -> vector<24x512xf32>
    %c72 = arith.constant 72 : index
    %c0_16 = arith.constant 0 : index
    %25 = vector.load %arg3[%c72, %c0_16] : memref<96x24xf32, #tpu.memory_space<vmem>>, vector<24x24xf32>
    %cst_17 = arith.constant dense<0.000000e+00> : vector<24x512xf32>
    %26 = tpu.matmul %25, %18, %cst_17 {dimension_numbers = #tpu.dot_dimension_numbers<[1], [0], [0], [1], [0, 0, 1, 1], [], []>} : vector<24x24xf32>, vector<24x512xf32>, vector<24x512xf32> -> vector<24x512xf32>
    %27 = vector.extract_strided_slice %18 {offsets = [0, 0], sizes = [24, 128], strides = [1, 1]} : vector<24x512xf32> to vector<24x128xf32>
    %28 = vector.extract_strided_slice %20 {offsets = [0, 0], sizes = [24, 128], strides = [1, 1]} : vector<24x512xf32> to vector<24x128xf32>
    %29 = vector.extract_strided_slice %22 {offsets = [0, 0], sizes = [24, 128], strides = [1, 1]} : vector<24x512xf32> to vector<24x128xf32>
    %30 = vector.extract_strided_slice %24 {offsets = [0, 0], sizes = [24, 128], strides = [1, 1]} : vector<24x512xf32> to vector<24x128xf32>
    %31 = vector.extract_strided_slice %26 {offsets = [0, 0], sizes = [24, 128], strides = [1, 1]} : vector<24x512xf32> to vector<24x128xf32>
    %32 = tpu.concatenate %27, %28, %29, %30, %31 in 1 : vector<24x128xf32>, vector<24x128xf32>, vector<24x128xf32>, vector<24x128xf32>, vector<24x128xf32> -> vector<24x640xf32>
    %33 = arith.truncf %32 : vector<24x640xf32> to vector<24x640xbf16>
    %c0_18 = arith.constant 0 : index
    %c0_19 = arith.constant 0 : index
    %34 = vector.load %arg4[%c0_18, %c0_19] : memref<640x180xbf16, #tpu.memory_space<vmem>>, vector<640x180xbf16>
    %cst_20 = arith.constant dense<0.000000e+00> : vector<24x180xf32>
    %35 = tpu.matmul %33, %34, %cst_20 {dimension_numbers = #tpu.dot_dimension_numbers<[1], [0], [0], [1], [0, 0, 1, 1], [], []>} : vector<24x640xbf16>, vector<640x180xbf16>, vector<24x180xf32> -> vector<24x180xf32>
    %c0_21 = arith.constant 0 : index
    %c0_22 = arith.constant 0 : index
    %36 = vector.load %arg8[%c0_21, %c0_22] : memref<1x180xf32, #tpu.memory_space<vmem>>, vector<1x180xf32>
    %37 = vector.broadcast %36 : vector<1x180xf32> to vector<24x180xf32>
    %38 = arith.addf %35, %37 : vector<24x180xf32>
    %39 = vector.extract_strided_slice %38 {offsets = [0, 0], sizes = [24, 36], strides = [1, 1]} : vector<24x180xf32> to vector<24x36xf32>
    %40 = vector.extract_strided_slice %38 {offsets = [0, 36], sizes = [24, 36], strides = [1, 1]} : vector<24x180xf32> to vector<24x36xf32>
    %41 = arith.maximumf %39, %40 : vector<24x36xf32>
    %42 = vector.extract_strided_slice %38 {offsets = [0, 72], sizes = [24, 36], strides = [1, 1]} : vector<24x180xf32> to vector<24x36xf32>
    %43 = arith.maximumf %41, %42 : vector<24x36xf32>
    %44 = vector.extract_strided_slice %38 {offsets = [0, 108], sizes = [24, 36], strides = [1, 1]} : vector<24x180xf32> to vector<24x36xf32>
    %45 = arith.maximumf %43, %44 : vector<24x36xf32>
    %46 = vector.extract_strided_slice %38 {offsets = [0, 144], sizes = [24, 36], strides = [1, 1]} : vector<24x180xf32> to vector<24x36xf32>
    %47 = arith.maximumf %45, %46 : vector<24x36xf32>
    %cst_23 = arith.constant 0.000000e+00 : f32
    %48 = vector.broadcast %cst_23 : f32 to vector<24x36xf32>
    %49 = arith.maximumf %47, %48 : vector<24x36xf32>
    %c0_24 = arith.constant 0 : index
    %c0_25 = arith.constant 0 : index
    %50 = vector.load %arg20[%c0_24, %c0_25] : memref<24x512xf32, #tpu.memory_space<vmem>>, vector<24x36xf32>
    tpu.vector_store %arg20[%c0_24, %c0_25], %49 {strides = array<i32>} : memref<24x512xf32, #tpu.memory_space<vmem>>, vector<24x36xf32>,
    %51 = vector.extract_strided_slice %18 {offsets = [0, 128], sizes = [24, 128], strides = [1, 1]} : vector<24x512xf32> to vector<24x128xf32>
    %52 = vector.extract_strided_slice %20 {offsets = [0, 128], sizes = [24, 128], strides = [1, 1]} : vector<24x512xf32> to vector<24x128xf32>
    %53 = vector.extract_strided_slice %22 {offsets = [0, 128], sizes = [24, 128], strides = [1, 1]} : vector<24x512xf32> to vector<24x128xf32>
    %54 = vector.extract_strided_slice %24 {offsets = [0, 128], sizes = [24, 128], strides = [1, 1]} : vector<24x512xf32> to vector<24x128xf32>
    %55 = vector.extract_strided_slice %26 {offsets = [0, 128], sizes = [24, 128], strides = [1, 1]} : vector<24x512xf32> to vector<24x128xf32>
    %56 = tpu.concatenate %51, %52, %53, %54, %55 in 1 : vector<24x128xf32>, vector<24x128xf32>, vector<24x128xf32>, vector<24x128xf32>, vector<24x128xf32> -> vector<24x640xf32>
    %57 = arith.truncf %56 : vector<24x640xf32> to vector<24x640xbf16>
    %c0_26 = arith.constant 0 : index
    %c0_27 = arith.constant 0 : index
    %58 = vector.load %arg5[%c0_26, %c0_27] : memref<640x150xbf16, #tpu.memory_space<vmem>>, vector<640x150xbf16>
    %cst_28 = arith.constant dense<0.000000e+00> : vector<24x150xf32>
    %59 = tpu.matmul %57, %58, %cst_28 {dimension_numbers = #tpu.dot_dimension_numbers<[1], [0], [0], [1], [0, 0, 1, 1], [], []>} : vector<24x640xbf16>, vector<640x150xbf16>, vector<24x150xf32> -> vector<24x150xf32>
    %c0_29 = arith.constant 0 : index
    %c0_30 = arith.constant 0 : index
    %60 = vector.load %arg9[%c0_29, %c0_30] : memref<1x150xf32, #tpu.memory_space<vmem>>, vector<1x150xf32>
    %61 = vector.broadcast %60 : vector<1x150xf32> to vector<24x150xf32>
    %62 = arith.addf %59, %61 : vector<24x150xf32>
    %63 = vector.extract_strided_slice %62 {offsets = [0, 0], sizes = [24, 30], strides = [1, 1]} : vector<24x150xf32> to vector<24x30xf32>
    %64 = vector.extract_strided_slice %62 {offsets = [0, 30], sizes = [24, 30], strides = [1, 1]} : vector<24x150xf32> to vector<24x30xf32>
    %65 = arith.maximumf %63, %64 : vector<24x30xf32>
    %66 = vector.extract_strided_slice %62 {offsets = [0, 60], sizes = [24, 30], strides = [1, 1]} : vector<24x150xf32> to vector<24x30xf32>
    %67 = arith.maximumf %65, %66 : vector<24x30xf32>
    %68 = vector.extract_strided_slice %62 {offsets = [0, 90], sizes = [24, 30], strides = [1, 1]} : vector<24x150xf32> to vector<24x30xf32>
    %69 = arith.maximumf %67, %68 : vector<24x30xf32>
    %70 = vector.extract_strided_slice %62 {offsets = [0, 120], sizes = [24, 30], strides = [1, 1]} : vector<24x150xf32> to vector<24x30xf32>
    %71 = arith.maximumf %69, %70 : vector<24x30xf32>
    %cst_31 = arith.constant 0.000000e+00 : f32
    %72 = vector.broadcast %cst_31 : f32 to vector<24x30xf32>
    %73 = arith.maximumf %71, %72 : vector<24x30xf32>
    %c0_32 = arith.constant 0 : index
    %c128 = arith.constant 128 : index
    %74 = vector.load %arg20[%c0_32, %c128] : memref<24x512xf32, #tpu.memory_space<vmem>>, vector<24x30xf32>
    tpu.vector_store %arg20[%c0_32, %c128], %73 {strides = array<i32>} : memref<24x512xf32, #tpu.memory_space<vmem>>, vector<24x30xf32>,
    %75 = vector.extract_strided_slice %18 {offsets = [0, 256], sizes = [24, 128], strides = [1, 1]} : vector<24x512xf32> to vector<24x128xf32>
    %76 = vector.extract_strided_slice %20 {offsets = [0, 256], sizes = [24, 128], strides = [1, 1]} : vector<24x512xf32> to vector<24x128xf32>
    %77 = vector.extract_strided_slice %22 {offsets = [0, 256], sizes = [24, 128], strides = [1, 1]} : vector<24x512xf32> to vector<24x128xf32>
    %78 = vector.extract_strided_slice %24 {offsets = [0, 256], sizes = [24, 128], strides = [1, 1]} : vector<24x512xf32> to vector<24x128xf32>
    %79 = vector.extract_strided_slice %26 {offsets = [0, 256], sizes = [24, 128], strides = [1, 1]} : vector<24x512xf32> to vector<24x128xf32>
    %80 = tpu.concatenate %75, %76, %77, %78, %79 in 1 : vector<24x128xf32>, vector<24x128xf32>, vector<24x128xf32>, vector<24x128xf32>, vector<24x128xf32> -> vector<24x640xf32>
    %81 = arith.truncf %80 : vector<24x640xf32> to vector<24x640xbf16>
    %c0_33 = arith.constant 0 : index
    %c0_34 = arith.constant 0 : index
    %82 = vector.load %arg6[%c0_33, %c0_34] : memref<640x120xbf16, #tpu.memory_space<vmem>>, vector<640x120xbf16>
    %cst_35 = arith.constant dense<0.000000e+00> : vector<24x120xf32>
    %83 = tpu.matmul %81, %82, %cst_35 {dimension_numbers = #tpu.dot_dimension_numbers<[1], [0], [0], [1], [0, 0, 1, 1], [], []>} : vector<24x640xbf16>, vector<640x120xbf16>, vector<24x120xf32> -> vector<24x120xf32>
    %c0_36 = arith.constant 0 : index
    %c0_37 = arith.constant 0 : index
    %84 = vector.load %arg10[%c0_36, %c0_37] : memref<1x120xf32, #tpu.memory_space<vmem>>, vector<1x120xf32>
    %85 = vector.broadcast %84 : vector<1x120xf32> to vector<24x120xf32>
    %86 = arith.addf %83, %85 : vector<24x120xf32>
    %87 = vector.extract_strided_slice %86 {offsets = [0, 0], sizes = [24, 24], strides = [1, 1]} : vector<24x120xf32> to vector<24x24xf32>
    %88 = vector.extract_strided_slice %86 {offsets = [0, 24], sizes = [24, 24], strides = [1, 1]} : vector<24x120xf32> to vector<24x24xf32>
    %89 = arith.maximumf %87, %88 : vector<24x24xf32>
    %90 = vector.extract_strided_slice %86 {offsets = [0, 48], sizes = [24, 24], strides = [1, 1]} : vector<24x120xf32> to vector<24x24xf32>
    %91 = arith.maximumf %89, %90 : vector<24x24xf32>
    %92 = vector.extract_strided_slice %86 {offsets = [0, 72], sizes = [24, 24], strides = [1, 1]} : vector<24x120xf32> to vector<24x24xf32>
    %93 = arith.maximumf %91, %92 : vector<24x24xf32>
    %94 = vector.extract_strided_slice %86 {offsets = [0, 96], sizes = [24, 24], strides = [1, 1]} : vector<24x120xf32> to vector<24x24xf32>
    %95 = arith.maximumf %93, %94 : vector<24x24xf32>
    %cst_38 = arith.constant 0.000000e+00 : f32
    %96 = vector.broadcast %cst_38 : f32 to vector<24x24xf32>
    %97 = arith.maximumf %95, %96 : vector<24x24xf32>
    %c0_39 = arith.constant 0 : index
    %c256 = arith.constant 256 : index
    %98 = vector.load %arg20[%c0_39, %c256] : memref<24x512xf32, #tpu.memory_space<vmem>>, vector<24x24xf32>
    tpu.vector_store %arg20[%c0_39, %c256], %97 {strides = array<i32>} : memref<24x512xf32, #tpu.memory_space<vmem>>, vector<24x24xf32>,
    %99 = vector.extract_strided_slice %18 {offsets = [0, 384], sizes = [24, 128], strides = [1, 1]} : vector<24x512xf32> to vector<24x128xf32>
    %100 = vector.extract_strided_slice %20 {offsets = [0, 384], sizes = [24, 128], strides = [1, 1]} : vector<24x512xf32> to vector<24x128xf32>
    %101 = vector.extract_strided_slice %22 {offsets = [0, 384], sizes = [24, 128], strides = [1, 1]} : vector<24x512xf32> to vector<24x128xf32>
    %102 = vector.extract_strided_slice %24 {offsets = [0, 384], sizes = [24, 128], strides = [1, 1]} : vector<24x512xf32> to vector<24x128xf32>
    %103 = vector.extract_strided_slice %26 {offsets = [0, 384], sizes = [24, 128], strides = [1, 1]} : vector<24x512xf32> to vector<24x128xf32>
    %104 = tpu.concatenate %99, %100, %101, %102, %103 in 1 : vector<24x128xf32>, vector<24x128xf32>, vector<24x128xf32>, vector<24x128xf32>, vector<24x128xf32> -> vector<24x640xf32>
    %105 = arith.truncf %104 : vector<24x640xf32> to vector<24x640xbf16>
    %c0_40 = arith.constant 0 : index
    %c0_41 = arith.constant 0 : index
    %106 = vector.load %arg7[%c0_40, %c0_41] : memref<640x90xbf16, #tpu.memory_space<vmem>>, vector<640x90xbf16>
    %cst_42 = arith.constant dense<0.000000e+00> : vector<24x90xf32>
    %107 = tpu.matmul %105, %106, %cst_42 {dimension_numbers = #tpu.dot_dimension_numbers<[1], [0], [0], [1], [0, 0, 1, 1], [], []>} : vector<24x640xbf16>, vector<640x90xbf16>, vector<24x90xf32> -> vector<24x90xf32>
    %c0_43 = arith.constant 0 : index
    %c0_44 = arith.constant 0 : index
    %108 = vector.load %arg11[%c0_43, %c0_44] : memref<1x90xf32, #tpu.memory_space<vmem>>, vector<1x90xf32>
    %109 = vector.broadcast %108 : vector<1x90xf32> to vector<24x90xf32>
    %110 = arith.addf %107, %109 : vector<24x90xf32>
    %111 = vector.extract_strided_slice %110 {offsets = [0, 0], sizes = [24, 18], strides = [1, 1]} : vector<24x90xf32> to vector<24x18xf32>
    %112 = vector.extract_strided_slice %110 {offsets = [0, 18], sizes = [24, 18], strides = [1, 1]} : vector<24x90xf32> to vector<24x18xf32>
    %113 = arith.maximumf %111, %112 : vector<24x18xf32>
    %114 = vector.extract_strided_slice %110 {offsets = [0, 36], sizes = [24, 18], strides = [1, 1]} : vector<24x90xf32> to vector<24x18xf32>
    %115 = arith.maximumf %113, %114 : vector<24x18xf32>
    %116 = vector.extract_strided_slice %110 {offsets = [0, 54], sizes = [24, 18], strides = [1, 1]} : vector<24x90xf32> to vector<24x18xf32>
    %117 = arith.maximumf %115, %116 : vector<24x18xf32>
    %118 = vector.extract_strided_slice %110 {offsets = [0, 72], sizes = [24, 18], strides = [1, 1]} : vector<24x90xf32> to vector<24x18xf32>
    %119 = arith.maximumf %117, %118 : vector<24x18xf32>
    %cst_45 = arith.constant 0.000000e+00 : f32
    %120 = vector.broadcast %cst_45 : f32 to vector<24x18xf32>
    %121 = arith.maximumf %119, %120 : vector<24x18xf32>
    %c0_46 = arith.constant 0 : index
    %c384 = arith.constant 384 : index
    %122 = vector.load %arg20[%c0_46, %c384] : memref<24x512xf32, #tpu.memory_space<vmem>>, vector<24x18xf32>
    tpu.vector_store %arg20[%c0_46, %c384], %121 {strides = array<i32>} : memref<24x512xf32, #tpu.memory_space<vmem>>, vector<24x18xf32>,
    %c0_47 = arith.constant 0 : index
    %c0_48 = arith.constant 0 : index
    %123 = vector.load %arg12[%c0_47, %c0_48] : memref<48x24xf32, #tpu.memory_space<vmem>>, vector<48x24xf32>
    %c0_49 = arith.constant 0 : index
    %c0_50 = arith.constant 0 : index
    %124 = vector.load %arg20[%c0_49, %c0_50] : memref<24x512xf32, #tpu.memory_space<vmem>>, vector<24x512xf32>
    %cst_51 = arith.constant dense<0.000000e+00> : vector<48x512xf32>
    %125 = tpu.matmul %123, %124, %cst_51 {dimension_numbers = #tpu.dot_dimension_numbers<[1], [0], [0], [1], [0, 0, 1, 1], [], []>} : vector<48x24xf32>, vector<24x512xf32>, vector<48x512xf32> -> vector<48x512xf32>
    %126 = vector.extract_strided_slice %125 {offsets = [0, 0], sizes = [8, 512], strides = [1, 1]} : vector<48x512xf32> to vector<8x512xf32>
    %c0_52 = arith.constant 0 : index
    %c0_53 = arith.constant 0 : index
    %127 = vector.load %arg21[%c0_52, %c0_53] : memref<8x3072xf32, #tpu.memory_space<vmem>>, vector<8x512xf32>
    tpu.vector_store %arg21[%c0_52, %c0_53], %126 {strides = array<i32>} : memref<8x3072xf32, #tpu.memory_space<vmem>>, vector<8x512xf32>,
    %128 = vector.extract_strided_slice %125 {offsets = [8, 0], sizes = [8, 512], strides = [1, 1]} : vector<48x512xf32> to vector<8x512xf32>
    %c0_54 = arith.constant 0 : index
    %c512 = arith.constant 512 : index
    %129 = vector.load %arg21[%c0_54, %c512] : memref<8x3072xf32, #tpu.memory_space<vmem>>, vector<8x512xf32>
    tpu.vector_store %arg21[%c0_54, %c512], %128 {strides = array<i32>} : memref<8x3072xf32, #tpu.memory_space<vmem>>, vector<8x512xf32>,
    %130 = vector.extract_strided_slice %125 {offsets = [16, 0], sizes = [8, 512], strides = [1, 1]} : vector<48x512xf32> to vector<8x512xf32>
    %c0_55 = arith.constant 0 : index
    %c1024 = arith.constant 1024 : index
    %131 = vector.load %arg21[%c0_55, %c1024] : memref<8x3072xf32, #tpu.memory_space<vmem>>, vector<8x512xf32>
    tpu.vector_store %arg21[%c0_55, %c1024], %130 {strides = array<i32>} : memref<8x3072xf32, #tpu.memory_space<vmem>>, vector<8x512xf32>,
    %132 = vector.extract_strided_slice %125 {offsets = [24, 0], sizes = [8, 512], strides = [1, 1]} : vector<48x512xf32> to vector<8x512xf32>
    %c0_56 = arith.constant 0 : index
    %c1536 = arith.constant 1536 : index
    %133 = vector.load %arg21[%c0_56, %c1536] : memref<8x3072xf32, #tpu.memory_space<vmem>>, vector<8x512xf32>
    tpu.vector_store %arg21[%c0_56, %c1536], %132 {strides = array<i32>} : memref<8x3072xf32, #tpu.memory_space<vmem>>, vector<8x512xf32>,
    %134 = vector.extract_strided_slice %125 {offsets = [32, 0], sizes = [8, 512], strides = [1, 1]} : vector<48x512xf32> to vector<8x512xf32>
    %c0_57 = arith.constant 0 : index
    %c2048 = arith.constant 2048 : index
    %135 = vector.load %arg21[%c0_57, %c2048] : memref<8x3072xf32, #tpu.memory_space<vmem>>, vector<8x512xf32>
    tpu.vector_store %arg21[%c0_57, %c2048], %134 {strides = array<i32>} : memref<8x3072xf32, #tpu.memory_space<vmem>>, vector<8x512xf32>,
    %136 = vector.extract_strided_slice %125 {offsets = [40, 0], sizes = [8, 512], strides = [1, 1]} : vector<48x512xf32> to vector<8x512xf32>
    %c0_58 = arith.constant 0 : index
    %c2560 = arith.constant 2560 : index
    %137 = vector.load %arg21[%c0_58, %c2560] : memref<8x3072xf32, #tpu.memory_space<vmem>>, vector<8x512xf32>
    tpu.vector_store %arg21[%c0_58, %c2560], %136 {strides = array<i32>} : memref<8x3072xf32, #tpu.memory_space<vmem>>, vector<8x512xf32>,
    %c0_59 = arith.constant 0 : index
    %c0_60 = arith.constant 0 : index
    %138 = vector.load %arg21[%c0_59, %c0_60] : memref<8x3072xf32, #tpu.memory_space<vmem>>, vector<8x3072xf32>
    %139 = arith.truncf %138 : vector<8x3072xf32> to vector<8x3072xbf16>
    %c0_61 = arith.constant 0 : index
    %c0_62 = arith.constant 0 : index
    %140 = vector.load %arg13[%c0_61, %c0_62] : memref<3072x240xbf16, #tpu.memory_space<vmem>>, vector<3072x240xbf16>
    %cst_63 = arith.constant dense<0.000000e+00> : vector<8x240xf32>
    %141 = tpu.matmul %139, %140, %cst_63 {dimension_numbers = #tpu.dot_dimension_numbers<[1], [0], [0], [1], [0, 0, 1, 1], [], []>} : vector<8x3072xbf16>, vector<3072x240xbf16>, vector<8x240xf32> -> vector<8x240xf32>
    %c0_64 = arith.constant 0 : index
    %c0_65 = arith.constant 0 : index
    %142 = vector.load %arg14[%c0_64, %c0_65] : memref<1x240xf32, #tpu.memory_space<vmem>>, vector<1x240xf32>
    %143 = vector.broadcast %142 : vector<1x240xf32> to vector<8x240xf32>
    %144 = arith.addf %141, %143 : vector<8x240xf32>
    %145 = vector.extract_strided_slice %144 {offsets = [0, 0], sizes = [8, 48], strides = [1, 1]} : vector<8x240xf32> to vector<8x48xf32>
    %146 = vector.extract_strided_slice %144 {offsets = [0, 48], sizes = [8, 48], strides = [1, 1]} : vector<8x240xf32> to vector<8x48xf32>
    %147 = arith.maximumf %145, %146 : vector<8x48xf32>
    %148 = vector.extract_strided_slice %144 {offsets = [0, 96], sizes = [8, 48], strides = [1, 1]} : vector<8x240xf32> to vector<8x48xf32>
    %149 = arith.maximumf %147, %148 : vector<8x48xf32>
    %150 = vector.extract_strided_slice %144 {offsets = [0, 144], sizes = [8, 48], strides = [1, 1]} : vector<8x240xf32> to vector<8x48xf32>
    %151 = arith.maximumf %149, %150 : vector<8x48xf32>
    %152 = vector.extract_strided_slice %144 {offsets = [0, 192], sizes = [8, 48], strides = [1, 1]} : vector<8x240xf32> to vector<8x48xf32>
    %153 = arith.maximumf %151, %152 : vector<8x48xf32>
    %cst_66 = arith.constant 0.000000e+00 : f32
    %154 = vector.broadcast %cst_66 : f32 to vector<8x48xf32>
    %155 = arith.maximumf %153, %154 : vector<8x48xf32>
    %156 = arith.truncf %155 : vector<8x48xf32> to vector<8x48xbf16>
    %c0_67 = arith.constant 0 : index
    %c0_68 = arith.constant 0 : index
    %157 = vector.load %arg15[%c0_67, %c0_68] : memref<48x480xbf16, #tpu.memory_space<vmem>>, vector<48x480xbf16>
    %cst_69 = arith.constant dense<0.000000e+00> : vector<8x480xf32>
    %158 = tpu.matmul %156, %157, %cst_69 {dimension_numbers = #tpu.dot_dimension_numbers<[1], [0], [0], [1], [0, 0, 1, 1], [], []>} : vector<8x48xbf16>, vector<48x480xbf16>, vector<8x480xf32> -> vector<8x480xf32>
    %c0_70 = arith.constant 0 : index
    %c0_71 = arith.constant 0 : index
    %159 = vector.load %arg16[%c0_70, %c0_71] : memref<1x480xf32, #tpu.memory_space<vmem>>, vector<1x480xf32>
    %160 = vector.broadcast %159 : vector<1x480xf32> to vector<8x480xf32>
    %161 = arith.addf %158, %160 : vector<8x480xf32>
    %162 = vector.extract_strided_slice %161 {offsets = [0, 0], sizes = [8, 96], strides = [1, 1]} : vector<8x480xf32> to vector<8x96xf32>
    %163 = vector.extract_strided_slice %161 {offsets = [0, 96], sizes = [8, 96], strides = [1, 1]} : vector<8x480xf32> to vector<8x96xf32>
    %164 = arith.maximumf %162, %163 : vector<8x96xf32>
    %165 = vector.extract_strided_slice %161 {offsets = [0, 192], sizes = [8, 96], strides = [1, 1]} : vector<8x480xf32> to vector<8x96xf32>
    %166 = arith.maximumf %164, %165 : vector<8x96xf32>
    %167 = vector.extract_strided_slice %161 {offsets = [0, 288], sizes = [8, 96], strides = [1, 1]} : vector<8x480xf32> to vector<8x96xf32>
    %168 = arith.maximumf %166, %167 : vector<8x96xf32>
    %169 = vector.extract_strided_slice %161 {offsets = [0, 384], sizes = [8, 96], strides = [1, 1]} : vector<8x480xf32> to vector<8x96xf32>
    %170 = arith.maximumf %168, %169 : vector<8x96xf32>
    %cst_72 = arith.constant 0.000000e+00 : f32
    %171 = vector.broadcast %cst_72 : f32 to vector<8x96xf32>
    %172 = arith.maximumf %170, %171 : vector<8x96xf32>
    %173 = arith.truncf %172 : vector<8x96xf32> to vector<8x96xbf16>
    %c0_73 = arith.constant 0 : index
    %c0_74 = arith.constant 0 : index
    %174 = vector.load %arg17[%c0_73, %c0_74] : memref<96x10xbf16, #tpu.memory_space<vmem>>, vector<96x10xbf16>
    %cst_75 = arith.constant dense<0.000000e+00> : vector<8x10xf32>
    %175 = tpu.matmul %173, %174, %cst_75 {dimension_numbers = #tpu.dot_dimension_numbers<[1], [0], [0], [1], [0, 0, 1, 1], [], []>} : vector<8x96xbf16>, vector<96x10xbf16>, vector<8x10xf32> -> vector<8x10xf32>
    %c0_76 = arith.constant 0 : index
    %c0_77 = arith.constant 0 : index
    %176 = vector.load %arg18[%c0_76, %c0_77] : memref<1x10xf32, #tpu.memory_space<vmem>>, vector<1x10xf32>
    %177 = vector.broadcast %176 : vector<1x10xf32> to vector<8x10xf32>
    %178 = arith.addf %175, %177 : vector<8x10xf32>
    %cst_78 = arith.constant dense<0xFF800000> : vector<8xf32>
    %179 = vector.multi_reduction <maximumf>, %178, %cst_78 [1] : vector<8x10xf32> to vector<8xf32>
    %180 = vector.shape_cast %179 : vector<8xf32> to vector<8x1xf32>
    %181 = vector.broadcast %180 : vector<8x1xf32> to vector<8x10xf32>
    %182 = arith.subf %178, %181 : vector<8x10xf32>
    %183 = math.exp %182 : vector<8x10xf32>
    %cst_79 = arith.constant dense<0.000000e+00> : vector<8xf32>
    %184 = vector.multi_reduction <add>, %183, %cst_79 [1] : vector<8x10xf32> to vector<8xf32>
    %185 = vector.shape_cast %184 : vector<8xf32> to vector<8x1xf32>
    %186 = tpu.reciprocal %185 {approx = true} : vector<8x1xf32> -> vector<8x1xf32>
    %187 = vector.broadcast %186 : vector<8x1xf32> to vector<8x10xf32>
    %188 = arith.mulf %183, %187 : vector<8x10xf32>
    %189 = vector.extract_strided_slice %188 {offsets = [0, 0], sizes = [2, 10], strides = [1, 1]} : vector<8x10xf32> to vector<2x10xf32>
    %c0_80 = arith.constant 0 : index
    %c0_81 = arith.constant 0 : index
    %190 = vector.load %arg19[%c0_80, %c0_81] : memref<2x10xf32, #tpu.memory_space<vmem>>, vector<2x10xf32>
    tpu.vector_store %arg19[%c0_80, %c0_81], %189 {strides = array<i32>} : memref<2x10xf32, #tpu.memory_space<vmem>>, vector<2x10xf32>,
    return
  }
}

</mosaic_0001>

<bundles_post_ra>
// kernel: forward.1
= control target key start
LH: loop header
LB: loop body
LE: loop exit
PB: predicated region body
PF: predicated region fallthrough
CT: control target
= control target key end

     0   :  { %s14713_s0 = inlined_call_operand.vmem [shape: bf16[24,160], index: 0, kind: input, shape index: {}]   ;;  %s14714_s1 = inlined_call_operand.vmem [shape: bf16[160,2560], index: 1, kind: input, shape index: {}]   ;;  %s14715_s2 = inlined_call_operand.vmem [shape: f32[1,2560], index: 2, kind: input, shape index: {}]   ;;  %s14716_s3 = inlined_call_operand.vmem [shape: f32[96,24], index: 3, kind: input, shape index: {}]   ;;  %s14717_s4 = inlined_call_operand.vmem [shape: bf16[640,180], index: 4, kind: input, shape index: {}]   ;;  %s14718_s5 = inlined_call_operand.vmem [shape: bf16[640,150], index: 5, kind: input, shape index: {}]   ;;  %s14719_s6 = inlined_call_operand.vmem [shape: bf16[640,120], index: 6, kind: input, shape index: {}]   ;;  %s14720_s7 = inlined_call_operand.vmem [shape: bf16[640,90], index: 7, kind: input, shape index: {}]   ;;  %s14721_s8 = inlined_call_operand.vmem [shape: f32[1,180], index: 8, kind: input, shape index: {}]   ;;  %s14722_s9 = inlined_call_operand.vmem [shape: f32[1,150], index: 9, kind: input, shape index: {}]   ;;  %s14723_s10 = inlined_call_operand.vmem [shape: f32[1,120], index: 10, kind: input, shape index: {}]   ;;  %s14724_s11 = inlined_call_operand.vmem [shape: f32[1,90], index: 11, kind: input, shape index: {}]   ;;  %s14725_s12 = inlined_call_operand.vmem [shape: f32[48,24], index: 12, kind: input, shape index: {}]   ;;  %s14726_s13 = inlined_call_operand.vmem [shape: bf16[3072,240], index: 13, kind: input, shape index: {}]   ;;  %s14727_s14 = inlined_call_operand.vmem [shape: f32[1,240], index: 14, kind: input, shape index: {}]   ;;  %s14728_s15 = inlined_call_operand.vmem [shape: bf16[48,480], index: 15, kind: input, shape index: {}]   ;;  %s14729_s16 = inlined_call_operand.vmem [shape: f32[1,480], index: 16, kind: input, shape index: {}]   ;;  %s14730_s17 = inlined_call_operand.vmem [shape: bf16[96,10], index: 17, kind: input, shape index: {}]   ;;  %s14731_s18 = inlined_call_operand.vmem [shape: f32[1,10], index: 18, kind: input, shape index: {}]   ;;  %s14732_s19 = inlined_call_operand.hbm [shape: f32[2,10], index: 19, kind: output, shape index: {}]  }
   0x1   :  { %14737 = sst [smem:[#allocation7_spill]] %s14713_s0 }
   0x2   :  { %14738 = sst [smem:[#allocation8_spill]] %s14714_s1 }
   0x3   :  { %14739 = sst [smem:[#allocation9_spill]] %s14715_s2 }
   0x4   :  { %14740 = sst [smem:[#allocation10_spill]] %s14716_s3 }
   0x5   :  { %s14741_s20 = sld [smem:[#allocation8_spill]]  ;;  %vm1400_vm0 = vcmask 261120  }
   0x6   :  { %s14742_s26 = sld [smem:[#allocation7_spill]] }
   0x7   :  { %s14743_s1 = sld [smem:[#allocation9_spill]] }
   0xb   :  { %v9835_v0 = vld [vmem:[%s14741_s20 + $0x464] ss:$80 sps:$4 sm:$0xff]   ;;  %v9837_v1 = vld [vmem:[%s14741_s20 + $0x46c] ss:$80 sps:$4 sm:$0xff]   ;;  %v9839_v2 = vld [vmem:[%s14741_s20 + $0x460] ss:$80 sps:$4 sm:$0xff]  }
   0xc   :  { %1407 = vmatprep.subr.bf16.mxu0 %v9835_v0  ;;  %v9840_v3 = vld [vmem:[%s14741_s20 + $0x468] ss:$80 sps:$4 sm:$0xff]   ;;  %1458 = vmatprep.subr.bf16.mxu1 %v9837_v1  ;;  %v9841_v4 = vld [vmem:[%s14741_s20 + $0x3c4] ss:$80 sps:$4 sm:$0xff]   ;;  %v9843_v5 = vld [vmem:[%s14741_s20 + $0x3cc] ss:$80 sps:$4 sm:$0xff]  }
   0xd   :  { %1408 = vmatpush1.bf16.msra.mxu0 %v9839_v2  ;;  %1459 = vmatpush1.bf16.msra.mxu1 %v9840_v3  ;;  %v9845_v6 = vld [vmem:[%s14741_s20 + $0x3c0] ss:$80 sps:$4 sm:$0xff]   ;;  %v9846_v7 = vld [vmem:[%s14741_s20 + $0x3c8] ss:$80 sps:$4 sm:$0xff]   ;;  %v9847_v8 = vld [vmem:[%s14741_s20 + $0x324] ss:$80 sps:$4 sm:$0xff]  }
   0xe   :  { %1409 = vmatprep.subr.bf16.mxu0 %v9841_v4  ;;  %1460 = vmatprep.subr.bf16.mxu1 %v9843_v5  ;;  %v9849_v9 = vld [vmem:[%s14741_s20 + $0x32c] ss:$80 sps:$4 sm:$0xff]   ;;  %v9851_v10 = vld [vmem:[%s14741_s20 + $0x320] ss:$80 sps:$4 sm:$0xff]   ;;  %v9852_v11 = vld [vmem:[%s14741_s20 + $0x328] ss:$80 sps:$4 sm:$0xff]  }
   0xf   :  { %v9853_v12 = vld [vmem:[%s14741_s20 + $0x284] ss:$80 sps:$4 sm:$0xff]   ;;  %v9855_v13 = vld [vmem:[%s14741_s20 + $0x28c] ss:$80 sps:$4 sm:$0xff]   ;;  %v9857_v14 = vld [vmem:[%s14741_s20 + $0x280] ss:$80 sps:$4 sm:$0xff]  }
  0x10   :  { %v9858_v15 = vld [vmem:[%s14741_s20 + $0x288] ss:$80 sps:$4 sm:$0xff]   ;;  %v9859_v16 = vld [vmem:[%s14741_s20 + $0x1e4] ss:$80 sps:$4 sm:$0xff]   ;;  %v9861_v17 = vld [vmem:[%s14741_s20 + $0x1ec] ss:$80 sps:$4 sm:$0xff]  }
  0x11   :  { %1410 = vmatpush1.bf16.msra.mxu0 %v9845_v6  ;;  %1461 = vmatpush1.bf16.msra.mxu1 %v9846_v7  ;;  %v9863_v18 = vld [vmem:[%s14741_s20 + $0x1e0] ss:$80 sps:$4 sm:$0xff]   ;;  %v9864_v19 = vld [vmem:[%s14741_s20 + $0x1e8] ss:$80 sps:$4 sm:$0xff]   ;;  %v9865_v20 = vld [vmem:[%s14741_s20 + $0x144] ss:$80 sps:$4 sm:$0xff]  }
  0x12   :  { %1411 = vmatprep.subr.bf16.mxu0 %v9847_v8  ;;  %1462 = vmatprep.subr.bf16.mxu1 %v9849_v9  ;;  %v9867_v21 = vld [vmem:[%s14741_s20 + $0x14c] ss:$80 sps:$4 sm:$0xff]   ;;  %v9869_v22 = vld [vmem:[%s14741_s20 + $0x140] ss:$80 sps:$4 sm:$0xff]   ;;  %v9870_v23 = vld [vmem:[%s14741_s20 + $0x148] ss:$80 sps:$4 sm:$0xff]  }
  0x13   :  { %v9871_v24 = vld [vmem:[%s14741_s20 + $0xa4] ss:$80 sps:$4 sm:$0xff]   ;;  %v9873_v25 = vld [vmem:[%s14741_s20 + $0xac] ss:$80 sps:$4 sm:$0xff]   ;;  %v9875_v26 = vld [vmem:[%s14741_s20 + $0xa0] ss:$80 sps:$4 sm:$0xff]  }
  0x14   :  { %v9876_v27 = vld [vmem:[%s14741_s20 + $0xa8] ss:$80 sps:$4 sm:$0xff]   ;;  %v9877_v28 = vld [vmem:[%s14741_s20 + $0x4] ss:$80 sps:$4 sm:$0xff]   ;;  %v9879_v29 = vld [vmem:[%s14741_s20 + $0xc] ss:$80 sps:$4 sm:$0xff]  }
  0x15   :  { %1412 = vmatpush1.bf16.msra.mxu0 %v9851_v10  ;;  %1463 = vmatpush1.bf16.msra.mxu1 %v9852_v11  ;;  %v9881_v30 = vld [vmem:[%s14741_s20] ss:$80 sps:$4 sm:$0xff]   ;;  %v9882_v31 = vld [vmem:[%s14741_s20 + $0x8] ss:$80 sps:$4 sm:$0xff]   ;;  %v11308_v32 = vld [vmem:[%s14742_s26 + $0x4] ss:$8 sps:$4 sm:$0xff]  }
  0x16   :  { %1413 = vmatprep.subr.bf16.mxu0 %v9853_v12  ;;  %1464 = vmatprep.subr.bf16.mxu1 %v9855_v13  ;;  %v9883_v33 = vld [vmem:[%s14741_s20 + $0x5a4] ss:$80 sps:$4 sm:$0xff]   ;;  %v9885_v34 = vld [vmem:[%s14741_s20 + $0x5ac] ss:$80 sps:$4 sm:$0xff]   ;;  %v9887_v35 = vld [vmem:[%s14741_s20 + $0x5a0] ss:$80 sps:$4 sm:$0xff]  }
  0x17   :  { %8896 = vmatprep.mubr.msk.bf16.mxu0 %vm1400_vm0, %v11308_v32  ;;  %8898 = vmatprep.mubr.msk.bf16.mxu1 %vm1400_vm0, %v11308_v32  ;;  %v9888_v36 = vld [vmem:[%s14741_s20 + $0x5a8] ss:$80 sps:$4 sm:$0xff]   ;;  %v9889_v37 = vld [vmem:[%s14741_s20 + $0x504] ss:$80 sps:$4 sm:$0xff]   ;;  %v9891_v38 = vld [vmem:[%s14741_s20 + $0x50c] ss:$80 sps:$4 sm:$0xff]  }
  0x18   :  { %v9893_v39 = vld [vmem:[%s14741_s20 + $0x500] ss:$80 sps:$4 sm:$0xff]   ;;  %v9894_v40 = vld [vmem:[%s14741_s20 + $0x508] ss:$80 sps:$4 sm:$0xff]   ;;  %v9900_v41 = vld [vmem:[%s14741_s20 + $0x474] ss:$80 sps:$4 sm:$0xff]  }
  0x19   :  { %1414 = vmatpush1.bf16.msra.mxu0 %v9857_v14  ;;  %1465 = vmatpush1.bf16.msra.mxu1 %v9858_v15  ;;  %v9903_v42 = vld [vmem:[%s14741_s20 + $0x47c] ss:$80 sps:$4 sm:$0xff]   ;;  %v11347_v43 = vld [vmem:[%s14742_s26] ss:$8 sps:$4 sm:$0xff]   ;;  %v9906_v46 = vld [vmem:[%s14741_s20 + $0x3d4] ss:$80 sps:$4 sm:$0xff]  }
  0x1a   :  { %1415 = vmatprep.subr.bf16.mxu0 %v9859_v16  ;;  %1466 = vmatprep.subr.bf16.mxu1 %v9861_v17  ;;  %v9898_v44 = vld [vmem:[%s14741_s20 + $0x470] ss:$80 sps:$4 sm:$0xff]   ;;  %v9901_v45 = vld [vmem:[%s14741_s20 + $0x478] ss:$80 sps:$4 sm:$0xff]   ;;  %v9909_v47 = vld [vmem:[%s14741_s20 + $0x3dc] ss:$80 sps:$4 sm:$0xff]  }
  0x1b   :  { %v9904_v48 = vld [vmem:[%s14741_s20 + $0x3d0] ss:$80 sps:$4 sm:$0xff]   ;;  %v9907_v49 = vld [vmem:[%s14741_s20 + $0x3d8] ss:$80 sps:$4 sm:$0xff]   ;;  %v9912_v50 = vld [vmem:[%s14741_s20 + $0x334] ss:$80 sps:$4 sm:$0xff]  }
  0x1c   :  { %v9915_v51 = vld [vmem:[%s14741_s20 + $0x33c] ss:$80 sps:$4 sm:$0xff]   ;;  %v78_v52 = vld [vmem:[%s14742_s26 + $0x10] sm:$0xff]  ;;  %v9913_v56 = vld [vmem:[%s14741_s20 + $0x338] ss:$80 sps:$4 sm:$0xff]  }
  0x1d   :  { %1416 = vmatpush1.bf16.msra.mxu0 %v9863_v18  ;;  %1467 = vmatpush1.bf16.msra.mxu1 %v9864_v19  ;;  %v9910_v53 = vld [vmem:[%s14741_s20 + $0x330] ss:$80 sps:$4 sm:$0xff]   ;;  %v11381_v54 = vcombine.high %v78_v52, %v78_v52  ;;  %v11383_v55 = vcombine.low %v78_v52, %v78_v52  ;;  %v9918_v57 = vld [vmem:[%s14741_s20 + $0x294] ss:$80 sps:$4 sm:$0xff]   ;;  %v9921_v58 = vld [vmem:[%s14741_s20 + $0x29c] ss:$80 sps:$4 sm:$0xff]  }
  0x1e   :  { %1417 = vmatprep.subr.bf16.mxu0 %v9865_v20  ;;  %1468 = vmatprep.subr.bf16.mxu1 %v9867_v21  ;;  %v9916_v59 = vld [vmem:[%s14741_s20 + $0x290] ss:$80 sps:$4 sm:$0xff]   ;;  %v9919_v60 = vld [vmem:[%s14741_s20 + $0x298] ss:$80 sps:$4 sm:$0xff]   ;;  %v9924_v61 = vld [vmem:[%s14741_s20 + $0x1f4] ss:$80 sps:$4 sm:$0xff]  }
  0x1f   :  { %v9927_v62 = vld [vmem:[%s14741_s20 + $0x1fc] ss:$80 sps:$4 sm:$0xff]   ;;  %v9922_v63 = vld [vmem:[%s14741_s20 + $0x1f0] ss:$80 sps:$4 sm:$0xff]   ;;  %v9925_v0 = vld [vmem:[%s14741_s20 + $0x1f8] ss:$80 sps:$4 sm:$0xff]  }
  0x20   :  { %v9930_v1 = vld [vmem:[%s14741_s20 + $0x154] ss:$80 sps:$4 sm:$0xff]   ;;  %v9933_v2 = vld [vmem:[%s14741_s20 + $0x15c] ss:$80 sps:$4 sm:$0xff]   ;;  %v9928_v3 = vld [vmem:[%s14741_s20 + $0x150] ss:$80 sps:$4 sm:$0xff]  }
  0x21   :  { %1418 = vmatpush1.bf16.msra.mxu0 %v9869_v22  ;;  %1469 = vmatpush1.bf16.msra.mxu1 %v9870_v23  ;;  %v9931_v4 = vld [vmem:[%s14741_s20 + $0x158] ss:$80 sps:$4 sm:$0xff]   ;;  %v9936_v5 = vld [vmem:[%s14741_s20 + $0xb4] ss:$80 sps:$4 sm:$0xff]   ;;  %v9939_v6 = vld [vmem:[%s14741_s20 + $0xbc] ss:$80 sps:$4 sm:$0xff]  }
  0x22   :  { %1419 = vmatprep.subr.bf16.mxu0 %v9871_v24  ;;  %1470 = vmatprep.subr.bf16.mxu1 %v9873_v25  ;;  %v9934_v7 = vld [vmem:[%s14741_s20 + $0xb0] ss:$80 sps:$4 sm:$0xff]   ;;  %v9937_v8 = vld [vmem:[%s14741_s20 + $0xb8] ss:$80 sps:$4 sm:$0xff]   ;;  %v9944_v9 = vld [vmem:[%s14741_s20 + $0x14] ss:$80 sps:$4 sm:$0xff]  }
  0x23   :  { %v9947_v10 = vld [vmem:[%s14741_s20 + $0x1c] ss:$80 sps:$4 sm:$0xff]   ;;  %v9942_v11 = vld [vmem:[%s14741_s20 + $0x10] ss:$80 sps:$4 sm:$0xff]   ;;  %v9945_v12 = vld [vmem:[%s14741_s20 + $0x18] ss:$80 sps:$4 sm:$0xff]  }
  0x24   :  { %v9950_v13 = vld [vmem:[%s14741_s20 + $0x5b4] ss:$80 sps:$4 sm:$0xff]   ;;  %v9953_v14 = vld [vmem:[%s14741_s20 + $0x5bc] ss:$80 sps:$4 sm:$0xff]   ;;  %v9948_v15 = vld [vmem:[%s14741_s20 + $0x5b0] ss:$80 sps:$4 sm:$0xff]  }
  0x25   :  { %1420 = vmatpush1.bf16.msra.mxu0 %v9875_v26  ;;  %1471 = vmatpush1.bf16.msra.mxu1 %v9876_v27  ;;  %v9951_v16 = vld [vmem:[%s14741_s20 + $0x5b8] ss:$80 sps:$4 sm:$0xff]   ;;  %v9956_v17 = vld [vmem:[%s14741_s20 + $0x514] ss:$80 sps:$4 sm:$0xff]   ;;  %v9959_v18 = vld [vmem:[%s14741_s20 + $0x51c] ss:$80 sps:$4 sm:$0xff]  }
  0x26   :  { %1421 = vmatprep.subr.bf16.mxu0 %v9877_v28  ;;  %1472 = vmatprep.subr.bf16.mxu1 %v9879_v29  ;;  %v9954_v19 = vld [vmem:[%s14741_s20 + $0x510] ss:$80 sps:$4 sm:$0xff]   ;;  %v9957_v20 = vld [vmem:[%s14741_s20 + $0x518] ss:$80 sps:$4 sm:$0xff]   ;;  %v9962_v21 = vld [vmem:[%s14741_s20 + $0x484] ss:$80 sps:$4 sm:$0xff]  }
  0x27   :  { %v9965_v22 = vld [vmem:[%s14741_s20 + $0x48c] ss:$80 sps:$4 sm:$0xff]   ;;  %v9960_v23 = vld [vmem:[%s14741_s20 + $0x480] ss:$80 sps:$4 sm:$0xff]   ;;  %v9963_v24 = vld [vmem:[%s14741_s20 + $0x488] ss:$80 sps:$4 sm:$0xff]  }
  0x28   :  { %v9968_v25 = vld [vmem:[%s14741_s20 + $0x3e4] ss:$80 sps:$4 sm:$0xff]   ;;  %v9971_v26 = vld [vmem:[%s14741_s20 + $0x3ec] ss:$80 sps:$4 sm:$0xff]   ;;  %v9966_v27 = vld [vmem:[%s14741_s20 + $0x3e0] ss:$80 sps:$4 sm:$0xff]  }
  0x29   :  { %1422 = vmatpush1.bf16.msra.mxu0 %v9881_v30  ;;  %1473 = vmatpush1.bf16.msra.mxu1 %v9882_v31  ;;  %v9969_v28 = vld [vmem:[%s14741_s20 + $0x3e8] ss:$80 sps:$4 sm:$0xff]   ;;  %v9974_v29 = vld [vmem:[%s14741_s20 + $0x344] ss:$80 sps:$4 sm:$0xff]   ;;  %v9977_v30 = vld [vmem:[%s14741_s20 + $0x34c] ss:$80 sps:$4 sm:$0xff]  }
  0x2a   :  { %1435 = vmatprep.subr.bf16.mxu0 %v9883_v33  ;;  %1486 = vmatprep.subr.bf16.mxu1 %v9885_v34  ;;  %v9972_v31 = vld [vmem:[%s14741_s20 + $0x340] ss:$80 sps:$4 sm:$0xff]   ;;  %v9975_v33 = vld [vmem:[%s14741_s20 + $0x348] ss:$80 sps:$4 sm:$0xff]   ;;  %v9980_v34 = vld [vmem:[%s14741_s20 + $0x2a4] ss:$80 sps:$4 sm:$0xff]  }
  0x2b   :  { %v10007_v52 = vld [vmem:[%s14741_s20 + $0x2c] ss:$80 sps:$4 sm:$0xff]  }
  0x2d   :  { %1436 = vmatpush2.bf16.msra.mxu0 %v9887_v35  ;;  %1487 = vmatpush2.bf16.msra.mxu1 %v9888_v36  ;;  %v9983_v35 = vld [vmem:[%s14741_s20 + $0x2ac] ss:$80 sps:$4 sm:$0xff]   ;;  %v9978_v36 = vld [vmem:[%s14741_s20 + $0x2a0] ss:$80 sps:$4 sm:$0xff]  }
  0x2e   :  { %1437 = vmatprep.subr.bf16.mxu0 %v9889_v37  ;;  %1488 = vmatprep.subr.bf16.mxu1 %v9891_v38  ;;  %v9981_v37 = vld [vmem:[%s14741_s20 + $0x2a8] ss:$80 sps:$4 sm:$0xff]   ;;  %v9986_v38 = vld [vmem:[%s14741_s20 + $0x204] ss:$80 sps:$4 sm:$0xff]  }
  0x31   :  { %1438 = vmatpush2.bf16.msra.mxu0 %v9893_v39  ;;  %1489 = vmatpush2.bf16.msra.mxu1 %v9894_v40  ;;  %v9989_v39 = vld [vmem:[%s14741_s20 + $0x20c] ss:$80 sps:$4 sm:$0xff]   ;;  %v9984_v40 = vld [vmem:[%s14741_s20 + $0x200] ss:$80 sps:$4 sm:$0xff]  }
  0x32   :  { %1509 = vmatprep.subr.bf16.mxu0 %v9900_v41  ;;  %1560 = vmatprep.subr.bf16.mxu1 %v9903_v42  ;;  %v9987_v41 = vld [vmem:[%s14741_s20 + $0x208] ss:$80 sps:$4 sm:$0xff]   ;;  %v9992_v42 = vld [vmem:[%s14741_s20 + $0x164] ss:$80 sps:$4 sm:$0xff]  }
  0x34   :  { %1440 = vmatmul.mubr.bf16.vlgmr.msra.gmra.mxu0 %v11347_v43  ;;  %1491 = vmatmul.mubr.bf16.vlgmr.msra.gmra.mxu1 %v11347_v43 }
  0x35   :  { %1510 = vmatpush1.bf16.msra.mxu0 %v9898_v44  ;;  %1561 = vmatpush1.bf16.msra.mxu1 %v9901_v45  ;;  %v9995_v44 = vld [vmem:[%s14741_s20 + $0x16c] ss:$80 sps:$4 sm:$0xff]   ;;  %v9990_v45 = vld [vmem:[%s14741_s20 + $0x160] ss:$80 sps:$4 sm:$0xff]  }
  0x36   :  { %1511 = vmatprep.subr.bf16.mxu0 %v9906_v46  ;;  %1562 = vmatprep.subr.bf16.mxu1 %v9909_v47  ;;  %v9993_v46 = vld [vmem:[%s14741_s20 + $0x168] ss:$80 sps:$4 sm:$0xff]   ;;  %v9998_v47 = vld [vmem:[%s14741_s20 + $0xc4] ss:$80 sps:$4 sm:$0xff]  }
  0x37   :  { %8897 = vmatprep.mubr.msk.bf16.mxu0 %vm1400_vm0, %v11381_v54  ;;  %8899 = vmatprep.mubr.msk.bf16.mxu1 %vm1400_vm0, %v11381_v54 }
  0x39   :  { %1512 = vmatpush1.bf16.msra.mxu0 %v9904_v48  ;;  %1563 = vmatpush1.bf16.msra.mxu1 %v9907_v49  ;;  %v10001_v48 = vld [vmem:[%s14741_s20 + $0xcc] ss:$80 sps:$4 sm:$0xff]   ;;  %v9996_v49 = vld [vmem:[%s14741_s20 + $0xc0] ss:$80 sps:$4 sm:$0xff]  }
  0x3a   :  { %1513 = vmatprep.subr.bf16.mxu0 %v9912_v50  ;;  %1564 = vmatprep.subr.bf16.mxu1 %v9915_v51  ;;  %v9999_v50 = vld [vmem:[%s14741_s20 + $0xc8] ss:$80 sps:$4 sm:$0xff]   ;;  %v10004_v51 = vld [vmem:[%s14741_s20 + $0x24] ss:$80 sps:$4 sm:$0xff]  }
  0x3c   :  { %1450 = vmatmul.mubr.bf16.gmra.mxu0 %v11383_v55  ;;  %1501 = vmatmul.mubr.bf16.gmra.mxu1 %v11383_v55 }
  0x3d   :  { %1514 = vmatpush1.bf16.msra.mxu0 %v9910_v53  ;;  %1565 = vmatpush1.bf16.msra.mxu1 %v9913_v56  ;;  %v10002_v53 = vld [vmem:[%s14741_s20 + $0x20] ss:$80 sps:$4 sm:$0xff]   ;;  %v10005_v56 = vld [vmem:[%s14741_s20 + $0x28] ss:$80 sps:$4 sm:$0xff]  }
  0x3e   :  { %1515 = vmatprep.subr.bf16.mxu0 %v9918_v57  ;;  %1566 = vmatprep.subr.bf16.mxu1 %v9921_v58  ;;  %v10010_v57 = vld [vmem:[%s14741_s20 + $0x5c4] ss:$80 sps:$4 sm:$0xff]   ;;  %v10013_v58 = vld [vmem:[%s14741_s20 + $0x5cc] ss:$80 sps:$4 sm:$0xff]  }
  0x3f   :  { %8900 = vmatprep.mubr.msk.bf16.mxu0 %vm1400_vm0, %v11308_v32  ;;  %8902 = vmatprep.mubr.msk.bf16.mxu1 %vm1400_vm0, %v11308_v32 }
  0x41   :  { %1516 = vmatpush1.bf16.msra.mxu0 %v9916_v59  ;;  %1567 = vmatpush1.bf16.msra.mxu1 %v9919_v60  ;;  %v10008_v59 = vld [vmem:[%s14741_s20 + $0x5c0] ss:$80 sps:$4 sm:$0xff]   ;;  %v10011_v60 = vld [vmem:[%s14741_s20 + $0x5c8] ss:$80 sps:$4 sm:$0xff]  }
  0x42   :  { %1517 = vmatprep.subr.bf16.mxu0 %v9924_v61  ;;  %1568 = vmatprep.subr.bf16.mxu1 %v9927_v62  ;;  %v10016_v61 = vld [vmem:[%s14741_s20 + $0x524] ss:$80 sps:$4 sm:$0xff]   ;;  %v10019_v62 = vld [vmem:[%s14741_s20 + $0x52c] ss:$80 sps:$4 sm:$0xff]  }
  0x45   :  { %1518 = vmatpush1.bf16.msra.mxu0 %v9922_v63  ;;  %1569 = vmatpush1.bf16.msra.mxu1 %v9925_v0  ;;  %v10014_v63 = vld [vmem:[%s14741_s20 + $0x520] ss:$80 sps:$4 sm:$0xff]   ;;  %v10017_v0 = vld [vmem:[%s14741_s20 + $0x528] ss:$80 sps:$4 sm:$0xff]  }
  0x46   :  { %1519 = vmatprep.subr.bf16.mxu0 %v9930_v1  ;;  %1570 = vmatprep.subr.bf16.mxu1 %v9933_v2  ;;  %v10022_v1 = vld [vmem:[%s14741_s20 + $0x494] ss:$80 sps:$4 sm:$0xff]   ;;  %v10025_v2 = vld [vmem:[%s14741_s20 + $0x49c] ss:$80 sps:$4 sm:$0xff]  }
  0x49   :  { %1520 = vmatpush1.bf16.msra.mxu0 %v9928_v3  ;;  %1571 = vmatpush1.bf16.msra.mxu1 %v9931_v4  ;;  %v10020_v3 = vld [vmem:[%s14741_s20 + $0x490] ss:$80 sps:$4 sm:$0xff]   ;;  %v10023_v4 = vld [vmem:[%s14741_s20 + $0x498] ss:$80 sps:$4 sm:$0xff]  }
  0x4a   :  { %1521 = vmatprep.subr.bf16.mxu0 %v9936_v5  ;;  %1572 = vmatprep.subr.bf16.mxu1 %v9939_v6  ;;  %v10028_v5 = vld [vmem:[%s14741_s20 + $0x3f4] ss:$80 sps:$4 sm:$0xff]   ;;  %v10031_v6 = vld [vmem:[%s14741_s20 + $0x3fc] ss:$80 sps:$4 sm:$0xff]  }
  0x4d   :  { %1522 = vmatpush1.bf16.msra.mxu0 %v9934_v7  ;;  %1573 = vmatpush1.bf16.msra.mxu1 %v9937_v8  ;;  %v10026_v7 = vld [vmem:[%s14741_s20 + $0x3f0] ss:$80 sps:$4 sm:$0xff]   ;;  %v10029_v8 = vld [vmem:[%s14741_s20 + $0x3f8] ss:$80 sps:$4 sm:$0xff]  }
  0x4e   :  { %1523 = vmatprep.subr.bf16.mxu0 %v9944_v9  ;;  %1574 = vmatprep.subr.bf16.mxu1 %v9947_v10  ;;  %v10034_v9 = vld [vmem:[%s14741_s20 + $0x354] ss:$80 sps:$4 sm:$0xff]   ;;  %v10037_v10 = vld [vmem:[%s14741_s20 + $0x35c] ss:$80 sps:$4 sm:$0xff]  }
  0x51   :  { %1524 = vmatpush1.bf16.msra.mxu0 %v9942_v11  ;;  %1575 = vmatpush1.bf16.msra.mxu1 %v9945_v12  ;;  %v10032_v11 = vld [vmem:[%s14741_s20 + $0x350] ss:$80 sps:$4 sm:$0xff]   ;;  %v10035_v12 = vld [vmem:[%s14741_s20 + $0x358] ss:$80 sps:$4 sm:$0xff]  }
  0x52   :  { %1537 = vmatprep.subr.bf16.mxu0 %v9950_v13  ;;  %1588 = vmatprep.subr.bf16.mxu1 %v9953_v14  ;;  %v10040_v13 = vld [vmem:[%s14741_s20 + $0x2b4] ss:$80 sps:$4 sm:$0xff]   ;;  %v10043_v14 = vld [vmem:[%s14741_s20 + $0x2bc] ss:$80 sps:$4 sm:$0xff]  }
  0x55   :  { %1538 = vmatpush2.bf16.msra.mxu0 %v9948_v15  ;;  %1589 = vmatpush2.bf16.msra.mxu1 %v9951_v16  ;;  %v10038_v15 = vld [vmem:[%s14741_s20 + $0x2b0] ss:$80 sps:$4 sm:$0xff]   ;;  %v10041_v16 = vld [vmem:[%s14741_s20 + $0x2b8] ss:$80 sps:$4 sm:$0xff]  }
  0x56   :  { %1539 = vmatprep.subr.bf16.mxu0 %v9956_v17  ;;  %1590 = vmatprep.subr.bf16.mxu1 %v9959_v18  ;;  %v10046_v17 = vld [vmem:[%s14741_s20 + $0x214] ss:$80 sps:$4 sm:$0xff]   ;;  %v10049_v18 = vld [vmem:[%s14741_s20 + $0x21c] ss:$80 sps:$4 sm:$0xff]  }
  0x59   :  { %1540 = vmatpush2.bf16.msra.mxu0 %v9954_v19  ;;  %1591 = vmatpush2.bf16.msra.mxu1 %v9957_v20  ;;  %v10044_v19 = vld [vmem:[%s14741_s20 + $0x210] ss:$80 sps:$4 sm:$0xff]   ;;  %v10047_v20 = vld [vmem:[%s14741_s20 + $0x218] ss:$80 sps:$4 sm:$0xff]  }
  0x5a   :  { %1611 = vmatprep.subr.bf16.mxu0 %v9962_v21  ;;  %1662 = vmatprep.subr.bf16.mxu1 %v9965_v22  ;;  %v10052_v21 = vld [vmem:[%s14741_s20 + $0x174] ss:$80 sps:$4 sm:$0xff]   ;;  %v10055_v22 = vld [vmem:[%s14741_s20 + $0x17c] ss:$80 sps:$4 sm:$0xff]  }
  0x5c   :  { %1542 = vmatmul.mubr.bf16.vlgmr.msra.gmra.mxu0 %v11347_v43  ;;  %1593 = vmatmul.mubr.bf16.vlgmr.msra.gmra.mxu1 %v11347_v43 }
  0x5d   :  { %1612 = vmatpush1.bf16.msra.mxu0 %v9960_v23  ;;  %1663 = vmatpush1.bf16.msra.mxu1 %v9963_v24  ;;  %v10050_v23 = vld [vmem:[%s14741_s20 + $0x170] ss:$80 sps:$4 sm:$0xff]   ;;  %v10058_v24 = vld [vmem:[%s14741_s20 + $0xd4] ss:$80 sps:$4 sm:$0xff]  }
  0x5e   :  { %1613 = vmatprep.subr.bf16.mxu0 %v9968_v25  ;;  %1664 = vmatprep.subr.bf16.mxu1 %v9971_v26  ;;  %v10061_v25 = vld [vmem:[%s14741_s20 + $0xdc] ss:$80 sps:$4 sm:$0xff]   ;;  %v10056_v26 = vld [vmem:[%s14741_s20 + $0xd0] ss:$80 sps:$4 sm:$0xff]  }
  0x5f   :  { %8901 = vmatprep.mubr.msk.bf16.mxu0 %vm1400_vm0, %v11381_v54  ;;  %8903 = vmatprep.mubr.msk.bf16.mxu1 %vm1400_vm0, %v11381_v54 }
  0x61   :  { %1614 = vmatpush1.bf16.msra.mxu0 %v9966_v27  ;;  %1665 = vmatpush1.bf16.msra.mxu1 %v9969_v28  ;;  %v10059_v27 = vld [vmem:[%s14741_s20 + $0xd8] ss:$80 sps:$4 sm:$0xff]   ;;  %v10064_v28 = vld [vmem:[%s14741_s20 + $0x34] ss:$80 sps:$4 sm:$0xff]  }
  0x62   :  { %1615 = vmatprep.subr.bf16.mxu0 %v9974_v29  ;;  %1666 = vmatprep.subr.bf16.mxu1 %v9977_v30  ;;  %v10067_v29 = vld [vmem:[%s14741_s20 + $0x3c] ss:$80 sps:$4 sm:$0xff]   ;;  %v10062_v30 = vld [vmem:[%s14741_s20 + $0x30] ss:$80 sps:$4 sm:$0xff]  }
  0x64   :  { %1552 = vmatmul.mubr.bf16.gmra.mxu0 %v11383_v55  ;;  %1603 = vmatmul.mubr.bf16.gmra.mxu1 %v11383_v55 }
  0x65   :  { %1616 = vmatpush1.bf16.msra.mxu0 %v9972_v31  ;;  %1667 = vmatpush1.bf16.msra.mxu1 %v9975_v33  ;;  %v10065_v31 = vld [vmem:[%s14741_s20 + $0x38] ss:$80 sps:$4 sm:$0xff]   ;;  %v10070_v33 = vld [vmem:[%s14741_s20 + $0x5d4] ss:$80 sps:$4 sm:$0xff]  }
  0x66   :  { %1617 = vmatprep.subr.bf16.mxu0 %v9980_v34  ;;  %1668 = vmatprep.subr.bf16.mxu1 %v9983_v35  ;;  %v10073_v34 = vld [vmem:[%s14741_s20 + $0x5dc] ss:$80 sps:$4 sm:$0xff]   ;;  %v10068_v35 = vld [vmem:[%s14741_s20 + $0x5d0] ss:$80 sps:$4 sm:$0xff]  }
  0x67   :  { %8904 = vmatprep.mubr.msk.bf16.mxu0 %vm1400_vm0, %v11308_v32  ;;  %8906 = vmatprep.mubr.msk.bf16.mxu1 %vm1400_vm0, %v11308_v32 }
  0x69   :  { %1618 = vmatpush1.bf16.msra.mxu0 %v9978_v36  ;;  %1669 = vmatpush1.bf16.msra.mxu1 %v9981_v37  ;;  %v10071_v36 = vld [vmem:[%s14741_s20 + $0x5d8] ss:$80 sps:$4 sm:$0xff]   ;;  %v10076_v37 = vld [vmem:[%s14741_s20 + $0x534] ss:$80 sps:$4 sm:$0xff]  }
  0x6a   :  { %1619 = vmatprep.subr.bf16.mxu0 %v9986_v38  ;;  %1670 = vmatprep.subr.bf16.mxu1 %v9989_v39  ;;  %v10079_v38 = vld [vmem:[%s14741_s20 + $0x53c] ss:$80 sps:$4 sm:$0xff]   ;;  %v10074_v39 = vld [vmem:[%s14741_s20 + $0x530] ss:$80 sps:$4 sm:$0xff]  }
  0x6d   :  { %1620 = vmatpush1.bf16.msra.mxu0 %v9984_v40  ;;  %1671 = vmatpush1.bf16.msra.mxu1 %v9987_v41  ;;  %v10077_v40 = vld [vmem:[%s14741_s20 + $0x538] ss:$80 sps:$4 sm:$0xff]   ;;  %v10082_v41 = vld [vmem:[%s14741_s20 + $0x4a4] ss:$80 sps:$4 sm:$0xff]  }
  0x6e   :  { %1621 = vmatprep.subr.bf16.mxu0 %v9992_v42  ;;  %1672 = vmatprep.subr.bf16.mxu1 %v9995_v44  ;;  %v10085_v42 = vld [vmem:[%s14741_s20 + $0x4ac] ss:$80 sps:$4 sm:$0xff]   ;;  %v10080_v44 = vld [vmem:[%s14741_s20 + $0x4a0] ss:$80 sps:$4 sm:$0xff]  }
  0x71   :  { %1622 = vmatpush1.bf16.msra.mxu0 %v9990_v45  ;;  %1673 = vmatpush1.bf16.msra.mxu1 %v9993_v46  ;;  %v10083_v45 = vld [vmem:[%s14741_s20 + $0x4a8] ss:$80 sps:$4 sm:$0xff]   ;;  %v10088_v46 = vld [vmem:[%s14741_s20 + $0x404] ss:$80 sps:$4 sm:$0xff]  }
  0x72   :  { %1623 = vmatprep.subr.bf16.mxu0 %v9998_v47  ;;  %1674 = vmatprep.subr.bf16.mxu1 %v10001_v48  ;;  %v10091_v47 = vld [vmem:[%s14741_s20 + $0x40c] ss:$80 sps:$4 sm:$0xff]   ;;  %v10086_v48 = vld [vmem:[%s14741_s20 + $0x400] ss:$80 sps:$4 sm:$0xff]  }
  0x75   :  { %1624 = vmatpush1.bf16.msra.mxu0 %v9996_v49  ;;  %1675 = vmatpush1.bf16.msra.mxu1 %v9999_v50  ;;  %v10089_v49 = vld [vmem:[%s14741_s20 + $0x408] ss:$80 sps:$4 sm:$0xff]   ;;  %v10094_v50 = vld [vmem:[%s14741_s20 + $0x364] ss:$80 sps:$4 sm:$0xff]  }
  0x76   :  { %1625 = vmatprep.subr.bf16.mxu0 %v10004_v51  ;;  %1676 = vmatprep.subr.bf16.mxu1 %v10007_v52  ;;  %v10097_v51 = vld [vmem:[%s14741_s20 + $0x36c] ss:$80 sps:$4 sm:$0xff]   ;;  %v10095_v52 = vld [vmem:[%s14741_s20 + $0x368] ss:$80 sps:$4 sm:$0xff]  }
  0x79   :  { %1626 = vmatpush1.bf16.msra.mxu0 %v10002_v53  ;;  %1677 = vmatpush1.bf16.msra.mxu1 %v10005_v56  ;;  %v10100_v53 = vld [vmem:[%s14741_s20 + $0x2c4] ss:$80 sps:$4 sm:$0xff]   ;;  %v10103_v56 = vld [vmem:[%s14741_s20 + $0x2cc] ss:$80 sps:$4 sm:$0xff]  }
  0x7a   :  { %1639 = vmatprep.subr.bf16.mxu0 %v10010_v57  ;;  %1690 = vmatprep.subr.bf16.mxu1 %v10013_v58  ;;  %v10098_v57 = vld [vmem:[%s14741_s20 + $0x2c0] ss:$80 sps:$4 sm:$0xff]   ;;  %v10101_v58 = vld [vmem:[%s14741_s20 + $0x2c8] ss:$80 sps:$4 sm:$0xff]  }
  0x7d   :  { %1640 = vmatpush2.bf16.msra.mxu0 %v10008_v59  ;;  %1691 = vmatpush2.bf16.msra.mxu1 %v10011_v60  ;;  %v10106_v59 = vld [vmem:[%s14741_s20 + $0x224] ss:$80 sps:$4 sm:$0xff]   ;;  %v10109_v60 = vld [vmem:[%s14741_s20 + $0x22c] ss:$80 sps:$4 sm:$0xff]  }
  0x7e   :  { %1641 = vmatprep.subr.bf16.mxu0 %v10016_v61  ;;  %1692 = vmatprep.subr.bf16.mxu1 %v10019_v62  ;;  %v10104_v61 = vld [vmem:[%s14741_s20 + $0x220] ss:$80 sps:$4 sm:$0xff]   ;;  %v10107_v62 = vld [vmem:[%s14741_s20 + $0x228] ss:$80 sps:$4 sm:$0xff]  }
  0x81   :  { %1642 = vmatpush2.bf16.msra.mxu0 %v10014_v63  ;;  %1693 = vmatpush2.bf16.msra.mxu1 %v10017_v0  ;;  %v11064_v63 = vld [vmem:[%s14742_s26 + $0x4] ss:$8 sps:$4 sm:$0xff]  }
  0x82   :  { %1713 = vmatprep.subr.bf16.mxu0 %v10022_v1  ;;  %1764 = vmatprep.subr.bf16.mxu1 %v10025_v2  ;;  %v10112_v0 = vld [vmem:[%s14741_s20 + $0x184] ss:$80 sps:$4 sm:$0xff]   ;;  %v10115_v1 = vld [vmem:[%s14741_s20 + $0x18c] ss:$80 sps:$4 sm:$0xff]   ;;  %v10110_v2 = vld [vmem:[%s14741_s20 + $0x180] ss:$80 sps:$4 sm:$0xff]  }
  0x84   :  { %1644 = vmatmul.mubr.bf16.vlgmr.msra.gmra.mxu0 %v11347_v43  ;;  %1695 = vmatmul.mubr.bf16.vlgmr.msra.gmra.mxu1 %v11347_v43 }
  0x85   :  { %1714 = vmatpush1.bf16.msra.mxu0 %v10020_v3  ;;  %1765 = vmatpush1.bf16.msra.mxu1 %v10023_v4  ;;  %v10113_v3 = vld [vmem:[%s14741_s20 + $0x188] ss:$80 sps:$4 sm:$0xff]   ;;  %v10118_v4 = vld [vmem:[%s14741_s20 + $0xe4] ss:$80 sps:$4 sm:$0xff]  }
  0x86   :  { %1715 = vmatprep.subr.bf16.mxu0 %v10028_v5  ;;  %1766 = vmatprep.subr.bf16.mxu1 %v10031_v6  ;;  %v10121_v5 = vld [vmem:[%s14741_s20 + $0xec] ss:$80 sps:$4 sm:$0xff]   ;;  %v10116_v6 = vld [vmem:[%s14741_s20 + $0xe0] ss:$80 sps:$4 sm:$0xff]  }
  0x87   :  { %8905 = vmatprep.mubr.msk.bf16.mxu0 %vm1400_vm0, %v11381_v54  ;;  %8907 = vmatprep.mubr.msk.bf16.mxu1 %vm1400_vm0, %v11381_v54 }
  0x89   :  { %1716 = vmatpush1.bf16.msra.mxu0 %v10026_v7  ;;  %1767 = vmatpush1.bf16.msra.mxu1 %v10029_v8  ;;  %v10119_v7 = vld [vmem:[%s14741_s20 + $0xe8] ss:$80 sps:$4 sm:$0xff]   ;;  %v10124_v8 = vld [vmem:[%s14741_s20 + $0x44] ss:$80 sps:$4 sm:$0xff]  }
  0x8a   :  { %1717 = vmatprep.subr.bf16.mxu0 %v10034_v9  ;;  %1768 = vmatprep.subr.bf16.mxu1 %v10037_v10  ;;  %v10127_v9 = vld [vmem:[%s14741_s20 + $0x4c] ss:$80 sps:$4 sm:$0xff]   ;;  %v10122_v10 = vld [vmem:[%s14741_s20 + $0x40] ss:$80 sps:$4 sm:$0xff]  }
  0x8c   :  { %1654 = vmatmul.mubr.bf16.gmra.mxu0 %v11383_v55  ;;  %1705 = vmatmul.mubr.bf16.gmra.mxu1 %v11383_v55 }
  0x8d   :  { %1718 = vmatpush1.bf16.msra.mxu0 %v10032_v11  ;;  %1769 = vmatpush1.bf16.msra.mxu1 %v10035_v12  ;;  %v10125_v11 = vld [vmem:[%s14741_s20 + $0x48] ss:$80 sps:$4 sm:$0xff]   ;;  %v10130_v12 = vld [vmem:[%s14741_s20 + $0x5e4] ss:$80 sps:$4 sm:$0xff]  }
  0x8e   :  { %1719 = vmatprep.subr.bf16.mxu0 %v10040_v13  ;;  %1770 = vmatprep.subr.bf16.mxu1 %v10043_v14  ;;  %v10133_v13 = vld [vmem:[%s14741_s20 + $0x5ec] ss:$80 sps:$4 sm:$0xff]   ;;  %v10128_v14 = vld [vmem:[%s14741_s20 + $0x5e0] ss:$80 sps:$4 sm:$0xff]  }
  0x8f   :  { %8908 = vmatprep.mubr.msk.bf16.mxu0 %vm1400_vm0, %v11308_v32  ;;  %8910 = vmatprep.mubr.msk.bf16.mxu1 %vm1400_vm0, %v11308_v32  ;;  %v10053_v32 = vld [vmem:[%s14741_s20 + $0x178] ss:$80 sps:$4 sm:$0xff]  }
  0x91   :  { %1720 = vmatpush1.bf16.msra.mxu0 %v10038_v15  ;;  %1771 = vmatpush1.bf16.msra.mxu1 %v10041_v16  ;;  %v10131_v15 = vld [vmem:[%s14741_s20 + $0x5e8] ss:$80 sps:$4 sm:$0xff]   ;;  %v10136_v16 = vld [vmem:[%s14741_s20 + $0x544] ss:$80 sps:$4 sm:$0xff]  }
  0x92   :  { %1721 = vmatprep.subr.bf16.mxu0 %v10046_v17  ;;  %1772 = vmatprep.subr.bf16.mxu1 %v10049_v18  ;;  %v10139_v17 = vld [vmem:[%s14741_s20 + $0x54c] ss:$80 sps:$4 sm:$0xff]   ;;  %v10134_v18 = vld [vmem:[%s14741_s20 + $0x540] ss:$80 sps:$4 sm:$0xff]  }
  0x95   :  { %1722 = vmatpush1.bf16.msra.mxu0 %v10044_v19  ;;  %1773 = vmatpush1.bf16.msra.mxu1 %v10047_v20  ;;  %v10137_v19 = vld [vmem:[%s14741_s20 + $0x548] ss:$80 sps:$4 sm:$0xff]  }
  0x96   :  { %1723 = vmatprep.subr.bf16.mxu0 %v10052_v21  ;;  %1774 = vmatprep.subr.bf16.mxu1 %v10055_v22  ;;  %v11065_v20 = vld [vmem:[%s14742_s26] ss:$8 sps:$4 sm:$0xff]  }
  0x99   :  { %1724 = vmatpush1.bf16.msra.mxu0 %v10050_v23  ;;  %1775 = vmatpush1.bf16.msra.mxu1 %v10053_v32 }
  0x9a   :  { %1725 = vmatprep.subr.bf16.mxu0 %v10058_v24  ;;  %1776 = vmatprep.subr.bf16.mxu1 %v10061_v25 }
  0x9d   :  { %1726 = vmatpush1.bf16.msra.mxu0 %v10056_v26  ;;  %1777 = vmatpush1.bf16.msra.mxu1 %v10059_v27 }
  0x9e   :  { %1727 = vmatprep.subr.bf16.mxu0 %v10064_v28  ;;  %1778 = vmatprep.subr.bf16.mxu1 %v10067_v29 }
  0xa1   :  { %1728 = vmatpush1.bf16.msra.mxu0 %v10062_v30  ;;  %1779 = vmatpush1.bf16.msra.mxu1 %v10065_v31 }
  0xa2   :  { %1741 = vmatprep.subr.bf16.mxu0 %v10070_v33  ;;  %1792 = vmatprep.subr.bf16.mxu1 %v10073_v34 }
  0xa5   :  { %1742 = vmatpush2.bf16.msra.mxu0 %v10068_v35  ;;  %1793 = vmatpush2.bf16.msra.mxu1 %v10071_v36  ;;  %v285_v35 = vlaneseq }
  0xa6   :  { %1743 = vmatprep.subr.bf16.mxu0 %v10076_v37  ;;  %1794 = vmatprep.subr.bf16.mxu1 %v10079_v38  ;;  %v11903_v37 = vld [vmem:[%s14743_s1] sm:$0xff] }
  0xa7   :  { %v11898_v36 = vshrl.u32 %v285_v35, 7 }
  0xa9   :  { %1744 = vmatpush2.bf16.msra.mxu0 %v10074_v39  ;;  %1795 = vmatpush2.bf16.msra.mxu1 %v10077_v40  ;;  %v11906_v38 = vsub.s32 0, %v11898_v36  ;;  %v11909_v39 = vsub.s32 2, %v11898_v36  ;;  %v303_v40 = vsub.s32 4, %v11898_v36 }
  0xaa   :  { %1815 = vmatprep.subr.bf16.mxu0 %v10082_v41  ;;  %1866 = vmatprep.subr.bf16.mxu1 %v10085_v42  ;;  %v311_v41 = vsub.s32 6, %v11898_v36 }
  0xab   :  { %v288_v42 = vrot.slane %v11903_v37, %v11906_v38 }
  0xac   :  { %1746 = vmatmul.mubr.bf16.vlgmr.msra.gmra.mxu0 %v11347_v43  ;;  %1797 = vmatmul.mubr.bf16.vlgmr.msra.gmra.mxu1 %v11347_v43  ;;  %v10092_v43 = vld [vmem:[%s14741_s20 + $0x360] ss:$80 sps:$4 sm:$0xff]  }
  0xad   :  { %1816 = vmatpush1.bf16.msra.mxu0 %v10080_v44  ;;  %1867 = vmatpush1.bf16.msra.mxu1 %v10083_v45  ;;  %v296_v44 = vrot.slane %v11903_v37, %v11909_v39  ;;  %v304_v45 = vrot.slane %v11903_v37, %v303_v40 }
  0xae   :  { %1817 = vmatprep.subr.bf16.mxu0 %v10088_v46  ;;  %1868 = vmatprep.subr.bf16.mxu1 %v10091_v47  ;;  %v312_v46 = vrot.slane %v11903_v37, %v311_v41 }
  0xaf   :  { %8909 = vmatprep.mubr.msk.bf16.mxu0 %vm1400_vm0, %v11381_v54  ;;  %8911 = vmatprep.mubr.msk.bf16.mxu1 %vm1400_vm0, %v11381_v54 }
  0xb1   :  { %1818 = vmatpush1.bf16.msra.mxu0 %v10086_v48  ;;  %1869 = vmatpush1.bf16.msra.mxu1 %v10089_v49 }
  0xb2   :  { %1819 = vmatprep.subr.bf16.mxu0 %v10094_v50  ;;  %1870 = vmatprep.subr.bf16.mxu1 %v10097_v51 }
  0xb4   :  { %1756 = vmatmul.mubr.bf16.gmra.mxu0 %v11383_v55  ;;  %1807 = vmatmul.mubr.bf16.gmra.mxu1 %v11383_v55 }
  0xb5   :  { %1820 = vmatpush1.bf16.msra.mxu0 %v10092_v43  ;;  %1871 = vmatpush1.bf16.msra.mxu1 %v10095_v52 }
  0xb6   :  { %1821 = vmatprep.subr.bf16.mxu0 %v10100_v53  ;;  %1872 = vmatprep.subr.bf16.mxu1 %v10103_v56 }
  0xb7   :  { %8912 = vmatprep.mubr.msk.bf16.mxu0 %vm1400_vm0, %v11064_v63  ;;  %8914 = vmatprep.mubr.msk.bf16.mxu1 %vm1400_vm0, %v11064_v63 }
  0xb9   :  { %1822 = vmatpush1.bf16.msra.mxu0 %v10098_v57  ;;  %1873 = vmatpush1.bf16.msra.mxu1 %v10101_v58  ;;  %v11938_v58 = vsub.s32 3, %v11898_v36 }
  0xba   :  { %1823 = vmatprep.subr.bf16.mxu0 %v10106_v59  ;;  %1874 = vmatprep.subr.bf16.mxu1 %v10109_v60  ;;  %v315_v59 = vsub.s32 7, %v11898_v36 }
  0xbd   :  { %1824 = vmatpush1.bf16.msra.mxu0 %v10104_v61  ;;  %1875 = vmatpush1.bf16.msra.mxu1 %v10107_v62 }
  0xbe   :  { %1825 = vmatprep.subr.bf16.mxu0 %v10112_v0  ;;  %1876 = vmatprep.subr.bf16.mxu1 %v10115_v1 }
  0xc1   :  { %1826 = vmatpush1.bf16.msra.mxu0 %v10110_v2  ;;  %1877 = vmatpush1.bf16.msra.mxu1 %v10113_v3 }
  0xc2   :  { %1827 = vmatprep.subr.bf16.mxu0 %v10118_v4  ;;  %1878 = vmatprep.subr.bf16.mxu1 %v10121_v5 }
  0xc5   :  { %1828 = vmatpush1.bf16.msra.mxu0 %v10116_v6  ;;  %1879 = vmatpush1.bf16.msra.mxu1 %v10119_v7  ;;  %v11959_v6 = vrot.slane %v11903_v37, %v11938_v58  ;;  %v11964_v7 = vrot.slane %v11903_v37, %v315_v59 }
  0xc6   :  { %1829 = vmatprep.subr.bf16.mxu0 %v10124_v8  ;;  %1880 = vmatprep.subr.bf16.mxu1 %v10127_v9 }
  0xc9   :  { %1830 = vmatpush1.bf16.msra.mxu0 %v10122_v10  ;;  %1881 = vmatpush1.bf16.msra.mxu1 %v10125_v11 }
  0xca   :  { %1843 = vmatprep.subr.bf16.mxu0 %v10130_v12  ;;  %1894 = vmatprep.subr.bf16.mxu1 %v10133_v13 }
  0xcd   :  { %1844 = vmatpush2.bf16.msra.mxu0 %v10128_v14  ;;  %1895 = vmatpush2.bf16.msra.mxu1 %v10131_v15 }
  0xce   :  { %1845 = vmatprep.subr.bf16.mxu0 %v10136_v16  ;;  %1896 = vmatprep.subr.bf16.mxu1 %v10139_v17 }
  0xd1   :  { %1846 = vmatpush2.bf16.msra.mxu0 %v10134_v18  ;;  %1897 = vmatpush2.bf16.msra.mxu1 %v10137_v19 }
  0xd4   :  { %1848 = vmatmul.mubr.bf16.vlgmr.msra.gmra.mxu0 %v11065_v20  ;;  %1899 = vmatmul.mubr.bf16.vlgmr.msra.gmra.mxu1 %v11065_v20 }
  0xd5   :  { %8913 = vmatprep.mubr.msk.bf16.mxu0 %vm1400_vm0, %v11381_v54  ;;  %8915 = vmatprep.mubr.msk.bf16.mxu1 %vm1400_vm0, %v11381_v54 }
  0xdc   :  { %1858 = vmatmul.mubr.bf16.gmra.mxu0 %v11383_v55  ;;  %1909 = vmatmul.mubr.bf16.gmra.mxu1 %v11383_v55 }
  0xf4   :  { %v1441_v21 = vpop.f32.mrf.mxu0  ;;  %v1492_v22 = vpop.f32.mrf.mxu1 }
  0xf5   :  { %v11923_v49 = vadd.f32 %v1441_v21, %v288_v42  ;;  %v11925_v50 = vadd.f32 %v1492_v22, %v296_v44 }
  0xf6   :  { %v11888_v23 = vpop.f32.mrf.mxu0  ;;  %v11890_v32 = vpop.f32.mrf.mxu1 }
  0xf8   :  { %v1445_v24 = vpop.f32.mrf.mxu0  ;;  %v1496_v25 = vpop.f32.mrf.mxu1 }
  0xf9   :  { %v11941_v62 = vadd.f32 %v1445_v24, %v288_v42  ;;  %v11943_v63 = vadd.f32 %v1496_v25, %v296_v44 }
  0xfa   :  { %v11892_v26 = vpop.f32.mrf.mxu0  ;;  %v11894_v27 = vpop.f32.mrf.mxu1 }
  0xfc   :  { %v1451_v28 = vpop.f32.mrf.mxu0  ;;  %v1502_v29 = vpop.f32.mrf.mxu1 }
  0xfd   :  { %v11966_v10 = vadd.f32 %v1451_v28, %v288_v42  ;;  %v11968_v11 = vadd.f32 %v1502_v29, %v296_v44  ;;  %v11090_v28 = vmov 0.0   ;;  %v12003_v29 = vld [vmem:[%s14743_s1 + $0x8] sm:$0xff]  ;;  %v1495_v44 = vadd.f32 %v11890_v32, %v11959_v6 }
  0xfe   :  { %v11896_v30 = vpop.f32.mrf.mxu0  ;;  %v1504_v54 = vpop.f32.mrf.mxu1  ;;  %2054 = vmatprep.mubr.f32.mxu0 %v11090_v28  ;;  %64 = vst [vmem:[#allocation2] sm:$0xff] %v11090_v28  ;;  %65 = vst [vmem:[#allocation2 + $0x8] sm:$0xff] %v11090_v28  ;;  %2066 = vmatprep.mubr.f32.mxu1 %v11090_v28 }
  0xff   :  { %v11975_v16 = vadd.f32 %v1504_v54, %v11959_v6  ;;  %66 = vst [vmem:[#allocation2 + $0x10] sm:$0xff] %v11090_v28  ;;  %67 = vst [vmem:[#allocation2 + $0x18] sm:$0xff] %v11090_v28  ;;  %v320_v54 = vrot.slane %v12003_v29, %v11906_v38 }
 0x100   :  { %v1455_v31 = vpop.f32.mrf.mxu0  ;;  %v1506_v33 = vpop.f32.mrf.mxu1  ;;  %68 = vst [vmem:[#allocation2 + $0x20] sm:$0xff] %v11090_v28  ;;  %69 = vst [vmem:[#allocation2 + $0x28] sm:$0xff] %v11090_v28 }
 0x101   :  { %70 = vst [vmem:[#allocation2 + $0x30] sm:$0xff] %v11090_v28  ;;  %71 = vst [vmem:[#allocation2 + $0x38] sm:$0xff] %v11090_v28  ;;  %v328_v31 = vrot.slane %v12003_v29, %v11909_v39 }
 0x102   :  { %v1456_v55 = vpop.f32.mrf.mxu0  ;;  %v1507_v34 = vpop.f32.mrf.mxu1  ;;  %72 = vst [vmem:[#allocation2 + $0x40] sm:$0xff] %v11090_v28  ;;  %73 = vst [vmem:[#allocation2 + $0x48] sm:$0xff] %v11090_v28 }
 0x103   :  { %74 = vst [vmem:[#allocation2 + $0x50] sm:$0xff] %v11090_v28  ;;  %75 = vst [vmem:[#allocation2 + $0x58] sm:$0xff] %v11090_v28  ;;  %v12012_v55 = vrot.slane %v12003_v29, %v11938_v58  ;;  %v307_v34 = vsub.s32 5, %v11898_v36 }
 0x11c   :  { %v1543_v47 = vpop.f32.mrf.mxu0  ;;  %v1594_v48 = vpop.f32.mrf.mxu1 }
 0x11d   :  { %v11927_v51 = vadd.f32 %v1543_v47, %v304_v45  ;;  %v11929_v43 = vadd.f32 %v1594_v48, %v312_v46  ;;  %v12018_v47 = vsub.s32 1, %v11898_v36 }
 0x11e   :  { %v11931_v52 = vpop.f32.mrf.mxu0  ;;  %v1596_v53 = vpop.f32.mrf.mxu1 }
 0x11f   :  { %v1917_v56 = vmax.f32 %v11923_v49, %v11927_v51  ;;  %v1919_v57 = vmax.f32 %v11925_v50, %v11929_v43  ;;  %v1597_v33 = vadd.f32 %v1596_v53, %v11964_v7  ;;  %v292_v49 = vrot.slane %v11903_v37, %v12018_v47 }
 0x120   :  { %v1547_v60 = vpop.f32.mrf.mxu0  ;;  %v1598_v61 = vpop.f32.mrf.mxu1 }
 0x121   :  { %v11945_v0 = vadd.f32 %v1547_v60, %v304_v45  ;;  %v11947_v1 = vadd.f32 %v1598_v61, %v312_v46  ;;  %v1920_v53 = vmax.f32 %v1495_v44, %v1597_v33 }
 0x122   :  { %v11949_v2 = vpop.f32.mrf.mxu0  ;;  %v11951_v3 = vpop.f32.mrf.mxu1 }
 0x123   :  { %v1921_v4 = vmax.f32 %v11941_v62, %v11945_v0  ;;  %v1923_v5 = vmax.f32 %v11943_v63, %v11947_v1 }
 0x124   :  { %v1553_v8 = vpop.f32.mrf.mxu0  ;;  %v1604_v9 = vpop.f32.mrf.mxu1 }
 0x125   :  { %v11970_v12 = vadd.f32 %v1553_v8, %v304_v45  ;;  %v11972_v13 = vadd.f32 %v1604_v9, %v312_v46  ;;  %v308_v9 = vrot.slane %v11903_v37, %v307_v34  ;;  %v324_v37 = vrot.slane %v12003_v29, %v12018_v47 }
 0x126   :  { %v1555_v14 = vpop.f32.mrf.mxu0  ;;  %v1606_v15 = vpop.f32.mrf.mxu1 }
 0x127   :  { %v1925_v17 = vmax.f32 %v11966_v10, %v11970_v12  ;;  %v1927_v18 = vmax.f32 %v11968_v11, %v11972_v13  ;;  %v11982_v19 = vadd.f32 %v1606_v15, %v11964_v7  ;;  %v1556_v51 = vadd.f32 %v1555_v14, %v308_v9 }
 0x128   :  { %v1557_v20 = vpop.f32.mrf.mxu0  ;;  %v1608_v21 = vpop.f32.mrf.mxu1 }
 0x129   :  { %v1928_v22 = vmax.f32 %v11975_v16, %v11982_v19  ;;  %v1454_v20 = vadd.f32 %v11896_v30, %v292_v49 }
 0x12a   :  { %v1558_v24 = vpop.f32.mrf.mxu0  ;;  %v1609_v25 = vpop.f32.mrf.mxu1 }
 0x12b   :  { %v1926_v33 = vmax.f32 %v1454_v20, %v1556_v51 }
 0x144   :  { %v1645_v35 = vpop.f32.mrf.mxu0  ;;  %v1696_v42 = vpop.f32.mrf.mxu1 }
 0x145   :  { %v1646_v45 = vadd.f32 %v1645_v35, %v320_v54  ;;  %v1697_v46 = vadd.f32 %v1696_v42, %v328_v31 }
 0x146   :  { %v12020_v48 = vpop.f32.mrf.mxu0  ;;  %v1698_v60 = vpop.f32.mrf.mxu1 }
 0x147   :  { %v12025_v61 = vmax.f32 %v1917_v56, %v1646_v45  ;;  %v12030_v8 = vmax.f32 %v1919_v57, %v1697_v46  ;;  %v1699_v32 = vadd.f32 %v1698_v60, %v12012_v55 }
 0x148   :  { %v1649_v10 = vpop.f32.mrf.mxu0  ;;  %v1700_v11 = vpop.f32.mrf.mxu1 }
 0x149   :  { %v12036_v12 = vmax.f32 %v1920_v53, %v1699_v32  ;;  %v1650_v13 = vadd.f32 %v1649_v10, %v320_v54  ;;  %v1701_v15 = vadd.f32 %v1700_v11, %v328_v31 }
 0x14a   :  { %v1651_v56 = vpop.f32.mrf.mxu0  ;;  %v1702_v50 = vpop.f32.mrf.mxu1 }
 0x14b   :  { %v12043_v43 = vmax.f32 %v1921_v4, %v1650_v13  ;;  %v12048_v57 = vmax.f32 %v1923_v5, %v1701_v15 }
 0x14c   :  { %v1655_v21 = vpop.f32.mrf.mxu0  ;;  %v1706_v24 = vpop.f32.mrf.mxu1 }
 0x14d   :  { %v1656_v14 = vadd.f32 %v1655_v21, %v320_v54  ;;  %v1707_v25 = vadd.f32 %v1706_v24, %v328_v31  ;;  %v281_v21 = vld [vmem:[%s14743_s1 + $0x10] sm:$0xf]  ;;  %v1546_v24 = vadd.f32 %v11931_v52, %v308_v9  ;;  %v340_v52 = vrot.slane %v12003_v29, %v307_v34 }
 0x14e   :  { %v1657_v35 = vpop.f32.mrf.mxu0  ;;  %v1708_v42 = vpop.f32.mrf.mxu1  ;;  %v12105_v36 = vrot.slane %v281_v21, %v11938_v58 }
 0x14f   :  { %v12053_v62 = vmax.f32 %v1925_v17, %v1656_v14  ;;  %v12055_v0 = vmax.f32 %v1927_v18, %v1707_v25  ;;  %v1658_v4 = vadd.f32 %v1657_v35, %v324_v37  ;;  %v1709_v63 = vadd.f32 %v1708_v42, %v12012_v55 }
 0x150   :  { %v1659_v1 = vpop.f32.mrf.mxu0  ;;  %v1710_v5 = vpop.f32.mrf.mxu1  ;;  %v1550_v14 = vadd.f32 %v11949_v2, %v308_v9  ;;  %v336_v25 = vrot.slane %v12003_v29, %v303_v40  ;;  %v1444_v35 = vadd.f32 %v11888_v23, %v292_v49  ;;  %v1601_v42 = vadd.f32 %v11951_v3, %v11964_v7 }
 0x151   :  { %v12058_v30 = vmax.f32 %v1926_v33, %v1658_v4  ;;  %v12063_v44 = vmax.f32 %v1928_v22, %v1709_v63  ;;  %v12082_v33 = vrot.slane %v12003_v29, %v311_v41  ;;  %v348_v2 = vrot.slane %v12003_v29, %v315_v59 }
 0x152   :  { %v1660_v54 = vpop.f32.mrf.mxu0  ;;  %v1711_v31 = vpop.f32.mrf.mxu1  ;;  %v1448_v40 = vadd.f32 %v11892_v26, %v292_v49  ;;  %v1499_v9 = vadd.f32 %v11894_v27, %v11959_v6  ;;  %v352_v41 = vrot.slane %v281_v21, %v11906_v38  ;;  %v12098_v23 = vrot.slane %v281_v21, %v11909_v39 }
 0x153   :  { %v1648_v3 = vadd.f32 %v12020_v48, %v324_v37  ;;  %v1652_v7 = vadd.f32 %v1651_v56, %v324_v37  ;;  %v12102_v4 = vrot.slane %v281_v21, %v12018_v47  ;;  %v1918_v59 = vmax.f32 %v1444_v35, %v1546_v24 }
 0x154   :  { %v1922_v29 = vmax.f32 %v1448_v40, %v1550_v14  ;;  %v1703_v26 = vadd.f32 %v1702_v50, %v12012_v55  ;;  %v1924_v27 = vmax.f32 %v1499_v9, %v1601_v42 }
 0x16c   :  { %v1747_v45 = vpop.f32.mrf.mxu0  ;;  %v1798_v46 = vpop.f32.mrf.mxu1 }
 0x16d   :  { %v1748_v34 = vadd.f32 %v1747_v45, %v336_v25  ;;  %v1799_v6 = vadd.f32 %v1798_v46, %v12082_v33 }
 0x16e   :  { %v1749_v17 = vpop.f32.mrf.mxu0  ;;  %v1800_v60 = vpop.f32.mrf.mxu1 }
 0x16f   :  { %v1750_v49 = vadd.f32 %v1749_v17, %v340_v52  ;;  %v1801_v63 = vadd.f32 %v1800_v60, %v348_v2 }
 0x170   :  { %v1751_v18 = vpop.f32.mrf.mxu0  ;;  %v1802_v53 = vpop.f32.mrf.mxu1 }
 0x171   :  { %v1752_v48 = vadd.f32 %v1751_v18, %v336_v25  ;;  %v1803_v56 = vadd.f32 %v1802_v53, %v12082_v33 }
 0x172   :  { %v1753_v32 = vpop.f32.mrf.mxu0  ;;  %v1804_v10 = vpop.f32.mrf.mxu1 }
 0x173   :  { %v1754_v37 = vadd.f32 %v1753_v32, %v340_v52  ;;  %v1805_v54 = vadd.f32 %v1804_v10, %v348_v2 }
 0x174   :  { %v1757_v11 = vpop.f32.mrf.mxu0  ;;  %v12065_v13 = vpop.f32.mrf.mxu1 }
 0x176   :  { %v12067_v15 = vpop.f32.mrf.mxu0  ;;  %v12069_v51 = vpop.f32.mrf.mxu1 }
 0x178   :  { %v1761_v16 = vpop.f32.mrf.mxu0  ;;  %v1812_v19 = vpop.f32.mrf.mxu1 }
 0x17a   :  { %v1762_v22 = vpop.f32.mrf.mxu0  ;;  %v1813_v20 = vpop.f32.mrf.mxu1 }
 0x194   :  { %v1849_v1 = vpop.f32.mrf.mxu0  ;;  %v1900_v5 = vpop.f32.mrf.mxu1 }
 0x195   :  { %24 = vsyncpa [#allocation5], 0  ;;  %v1930_v31 = vmax.f32 %v1918_v59, %v1648_v3  ;;  %v1934_v16 = vmax.f32 %v1922_v29, %v1652_v7  ;;  %v1850_v19 = vadd.f32 %v1849_v1, %v352_v41  ;;  %v1901_v22 = vadd.f32 %v1900_v5, %v12098_v23  ;;  %s14744_s27 = sld [smem:[#allocation10_spill]]  ;;  %s11095_s23 = smov 112  }
 0x196   :  { %v1851_v55 = vpop.f32.mrf.mxu0  ;;  %v1902_v50 = vpop.f32.mrf.mxu1  ;;  %v1936_v45 = vmax.f32 %v1924_v27, %v1703_v26  ;;  %v1941_v46 = vmax.f32 %v12025_v61, %v1748_v34  ;;  %v1943_v18 = vmax.f32 %v12030_v8, %v1799_v6  ;;  %v1944_v32 = vmax.f32 %v12036_v12, %v1801_v63  ;;  %s11096_s25 = smov 98   ;;  %s11097_s3 = smov 68  }
 0x197   :  { %v1852_v17 = vadd.f32 %v1851_v55, %v12102_v4  ;;  %v1903_v60 = vadd.f32 %v1902_v50, %v12105_v36  ;;  %v1942_v53 = vmax.f32 %v1930_v31, %v1750_v49  ;;  %v1758_v10 = vadd.f32 %v1757_v11, %v336_v25  ;;  %s11101_s29 = smov 80   ;;  %s11102_s0 = smov 32  }
 0x198   :  { %v1853_v20 = vpop.f32.mrf.mxu0  ;;  %v1904_v21 = vpop.f32.mrf.mxu1  ;;  %v1945_v24 = vmax.f32 %v12043_v43, %v1752_v48  ;;  %v1947_v14 = vmax.f32 %v12048_v57, %v1803_v56  ;;  %v1946_v35 = vmax.f32 %v1934_v16, %v1754_v37  ;;  %v1948_v42 = vmax.f32 %v1936_v45, %v1805_v54  ;;  %s11103_s20 = smov 110   ;;  %s11104_s26 = smov 74  }
 0x199   :  { %v1953_v40 = vmax.f32 %v1941_v46, %v1850_v19  ;;  %v1955_v61 = vmax.f32 %v1943_v18, %v1901_v22  ;;  %v1854_v9 = vadd.f32 %v1853_v20, %v352_v41  ;;  %v1905_v3 = vadd.f32 %v1904_v21, %v12098_v23 }
 0x19a   :  { %v1855_v7 = vpop.f32.mrf.mxu0  ;;  %v1906_v59 = vpop.f32.mrf.mxu1  ;;  %v1954_v8 = vmax.f32 %v1942_v53, %v1852_v17  ;;  %v1956_v29 = vmax.f32 %v1944_v32, %v1903_v60  ;;  %v1949_v25 = vmax.f32 %v12053_v62, %v1758_v10  ;;  %v1760_v43 = vadd.f32 %v12067_v15, %v340_v52 }
 0x19b   :  { %v1856_v12 = vadd.f32 %v1855_v7, %v12102_v4  ;;  %v1907_v11 = vadd.f32 %v1906_v59, %v12105_v36  ;;  %v1957_v57 = vmax.f32 %v1945_v24, %v1854_v9  ;;  %v1959_v26 = vmax.f32 %v1947_v14, %v1905_v3  ;;  %v2156_v14 = vld [vmem:[%s14744_s27 + $0x18] sm:$0xff]  ;;  %v2336_v3 = vld [vmem:[%s14744_s27 + $0x40] sm:$0xff]  ;;  %v2512_v59 = vld [vmem:[%s14744_s27 + $0x48] sm:$0xff] }
 0x19c   :  { %v1859_v34 = vpop.f32.mrf.mxu0  ;;  %v1910_v27 = vpop.f32.mrf.mxu1  ;;  %v1811_v6 = vadd.f32 %v12069_v51, %v348_v2  ;;  %v12124_v5 = vmax.f32 %v1953_v40, 0.0  ;;  %v12126_v48 = vmax.f32 %v1955_v61, 0.0  ;;  %v12132_v15 = vmax.f32 %v1954_v8, 0.0  ;;  %v2334_v40 = vld [vmem:[%s14744_s27 + $0x30] sm:$0xff]  ;;  %v12240_v61 = vld [vmem:[#allocation2] sm:$0xff] }
 0x19d   :  { %v1958_v49 = vmax.f32 %v1946_v35, %v1856_v12  ;;  %v1960_v63 = vmax.f32 %v1948_v42, %v1907_v11  ;;  %v1860_v1 = vadd.f32 %v1859_v34, %v352_v41  ;;  %v12128_v56 = vmax.f32 %v1957_v57, 0.0  ;;  %v2157_v35 = vld [vmem:[%s14744_s27 + $0x20] sm:$0xff]  ;;  %v2158_v42 = vld [vmem:[%s14744_s27 + $0x28] sm:$0xff]  ;;  %v10166_v9 = vld [vmem:[%s14717_s4 + $0x174] ss:$8 sps:$4 sm:$0xff]  }
 0x19e   :  { %v12130_v37 = vmax.f32 %v1959_v26, 0.0  ;;  %v1861_v62 = vpop.f32.mrf.mxu0  ;;  %v1912_v54 = vpop.f32.mrf.mxu1  ;;  %v12134_v52 = vmax.f32 %v1956_v29, 0.0  ;;  %v1950_v2 = vmax.f32 %v12058_v30, %v1760_v43  ;;  %v1809_v30 = vadd.f32 %v12065_v13, %v12082_v33  ;;  %v1979_v33 = vld [vmem:[%s14744_s27 + $0x10] sm:$0xff]  ;;  %v10172_v29 = vld [vmem:[%s14717_s4 + $0x164] ss:$8 sps:$4 sm:$0xff]   ;;  %v2514_v57 = vld [vmem:[%s14744_s27 + $0x58] sm:$0xff] }
 0x19f   :  { %v12136_v31 = vmax.f32 %v1958_v49, 0.0  ;;  %v12138_v51 = vmax.f32 %v1960_v63, 0.0  ;;  %v1862_v41 = vadd.f32 %v1861_v62, %v12102_v4  ;;  %v2690_v22 = vpack.c.bf16 %v12128_v56, %v12124_v5  ;;  %v10164_v7 = vld [vmem:[%s14717_s4 + $0x170] ss:$8 sps:$4 sm:$0xff]   ;;  %v10142_v8 = vld [vmem:[%s14717_s4 + $0x74] ss:$8 sps:$4 sm:$0xff]  }
 0x1a0   :  { %v1863_v16 = vpop.f32.mrf.mxu0  ;;  %v1914_v19 = vpop.f32.mrf.mxu1  ;;  %v4142_v55 = vpack.c.bf16 %v12130_v37, %v12126_v48  ;;  %v1961_v50 = vmax.f32 %v1949_v25, %v1860_v1  ;;  %v1913_v4 = vadd.f32 %v1912_v54, %v12105_v36  ;;  %v1952_v53 = vmax.f32 %v12063_v44, %v1811_v6  ;;  %v1978_v36 = vld [vmem:[%s14744_s27 + $0x8] sm:$0xff]  ;;  %v2513_v11 = vld [vmem:[%s14744_s27 + $0x50] sm:$0xff] }
 0x1a1   :  { %v3416_v45 = vpack.c.bf16 %v12136_v31, %v12132_v15  ;;  %v4680_v46 = vpack.c.bf16 %v12138_v51, %v12134_v52  ;;  %v1962_v17 = vmax.f32 %v1950_v2, %v1862_v41  ;;  %v1911_v32 = vadd.f32 %v1910_v27, %v12098_v23  ;;  %v10170_v12 = vld [vmem:[%s14717_s4 + $0x160] ss:$8 sps:$4 sm:$0xff]   ;;  %v10178_v25 = vld [vmem:[%s14717_s4 + $0x154] ss:$8 sps:$4 sm:$0xff]   ;;  %v10176_v43 = vld [vmem:[%s14717_s4 + $0x150] ss:$8 sps:$4 sm:$0xff]  }
 0x1a2   :  { %v1864_v60 = vpop.f32.mrf.mxu0  ;;  %v1915_v18 = vpop.f32.mrf.mxu1  ;;  %v12157_v20 = vmax.f32 %v1961_v50, 0.0  ;;  %v1951_v21 = vmax.f32 %v12055_v0, %v1809_v30  ;;  %v1964_v24 = vmax.f32 %v1952_v53, %v1913_v4  ;;  %v1977_v0 = vld [vmem:[%s14744_s27] sm:$0xff]  ;;  %vm1980_vm1 = vcmask 195584   ;;  %v10140_v26 = vld [vmem:[%s14717_s4 + $0x70] ss:$8 sps:$4 sm:$0xff]  }
 0x1a3   :  { %v12155_v10 = vmax.f32 %v1962_v17, 0.0  ;;  %v10145_v34 = vld [vmem:[%s14717_s4 + $0x64] ss:$8 sps:$4 sm:$0xff]   ;;  %v10182_v6 = vld [vmem:[%s14717_s4 + $0x140] ss:$8 sps:$4 sm:$0xff]   ;;  %vm3387_vm2 = vcmask 162816  }
 0x1a4   :  { %v1963_v13 = vmax.f32 %v1951_v21, %v1911_v32  ;;  %v12171_v44 = vmax.f32 %v1964_v24, 0.0  ;;  %v10184_v27 = vld [vmem:[%s14717_s4 + $0x144] ss:$8 sps:$4 sm:$0xff]   ;;  %v10143_v49 = vld [vmem:[%s14717_s4 + $0x60] ss:$8 sps:$4 sm:$0xff]   ;;  %vm3412_vm3 = vcmask 293888  }
 0x1a5   :  { %2016 = vmatprep.subr.mxu0 %v12155_v10  ;;  %9795 = vmatprep.subr.mxu1 %v12155_v10  ;;  %v10148_v63 = vld [vmem:[%s14717_s4 + $0x54] ss:$8 sps:$4 sm:$0xff]   ;;  %v10188_v62 = vld [vmem:[%s14717_s4 + $0x130] ss:$8 sps:$4 sm:$0xff]   ;;  %v10196_v2 = vld [vmem:[%s14717_s4 + $0x124] ss:$8 sps:$4 sm:$0xff]  }
 0x1a6   :  { %2017 = vmatpush1.msra.mxu0 %v12157_v20  ;;  %9798 = vmatpush1.msra.mxu1 %v12157_v20  ;;  %v12180_v23 = vmax.f32 %v1963_v13, 0.0  ;;  %v10190_v1 = vld [vmem:[%s14717_s4 + $0x134] ss:$8 sps:$4 sm:$0xff]   ;;  %v10146_v54 = vld [vmem:[%s14717_s4 + $0x50] ss:$8 sps:$4 sm:$0xff]   ;;  %vm4125_vm4 = vcmask 64512  }
 0x1a7   :  { %2018 = vmatprep.subr.mxu0 %v12136_v31  ;;  %9796 = vmatprep.subr.mxu1 %v12136_v31  ;;  %v10151_v41 = vld [vmem:[%s14717_s4 + $0x44] ss:$8 sps:$4 sm:$0xff]   ;;  %v10194_v16 = vld [vmem:[%s14717_s4 + $0x120] ss:$8 sps:$4 sm:$0xff]   ;;  %v10202_v50 = vld [vmem:[%s14717_s4 + $0x114] ss:$8 sps:$4 sm:$0xff]  }
 0x1a8   :  { %2019 = vmatpush1.msra.mxu0 %v12128_v56  ;;  %9799 = vmatpush1.msra.mxu1 %v12128_v56  ;;  %v10149_v19 = vld [vmem:[%s14717_s4 + $0x40] ss:$8 sps:$4 sm:$0xff]   ;;  %v10154_v30 = vld [vmem:[%s14717_s4 + $0x34] ss:$8 sps:$4 sm:$0xff]   ;;  %v10200_v17 = vld [vmem:[%s14717_s4 + $0x110] ss:$8 sps:$4 sm:$0xff]  }
 0x1a9   :  { %2020 = vmatprep.subr.mxu0 %v12132_v15  ;;  %9797 = vmatprep.subr.mxu1 %v12132_v15  ;;  %v10152_v4 = vld [vmem:[%s14717_s4 + $0x30] ss:$8 sps:$4 sm:$0xff]   ;;  %v10157_v60 = vld [vmem:[%s14717_s4 + $0x24] ss:$8 sps:$4 sm:$0xff]   ;;  %v10206_v18 = vld [vmem:[%s14717_s4 + $0x100] ss:$8 sps:$4 sm:$0xff]  }
 0x1aa   :  { %2021 = vmatpush1.msra.mxu0 %v12124_v5  ;;  %9800 = vmatpush1.msra.mxu1 %v12124_v5  ;;  %v10208_v53 = vld [vmem:[%s14717_s4 + $0x104] ss:$8 sps:$4 sm:$0xff]   ;;  %v10155_v32 = vld [vmem:[%s14717_s4 + $0x20] ss:$8 sps:$4 sm:$0xff]   ;;  %v10160_v21 = vld [vmem:[%s14717_s4 + $0x14] ss:$8 sps:$4 sm:$0xff]  }
 0x1ab   :  { %8916 = vmatmul.mubr.msk.f32.vlgmr.msra.gmra.mxu0 %vm1980_vm1, %v1977_v0  ;;  %2099 = vmatprep.subr.mxu0 %v12171_v44  ;;  %v10158_v24 = vld [vmem:[%s14717_s4 + $0x10] ss:$8 sps:$4 sm:$0xff]   ;;  %v10163_v13 = vld [vmem:[%s14717_s4 + $0x4] ss:$8 sps:$4 sm:$0xff]   ;;  %vm4138_vm5 = vcmask 244736   ;;  %vm5215_vm6 = vcmask 146432  }
 0x1ac   :  { %2277 = vmatprep.subr.mxu1 %v12171_v44  ;;  %8918 = vmatmul.mubr.msk.f32.vlgmr.msra.gmra.mxu1 %vm1980_vm1, %v1979_v33  ;;  %vm8454_vm7 = vcmask 392192   ;;  %vm11106_vm8 = vmmov 0   ;;  %vm8554_vm9 = vcmask 523264   ;;  %vm8620_vm10 = vcmask 785408  }
 0x1ad   :  { %2100 = vmatpush1.msra.mxu0 %v12180_v23  ;;  %2278 = vmatpush1.msra.mxu1 %v12180_v23  ;;  %vm8664_vm11 = vcmask 80896   ;;  %vm8676_vm12 = vcmask 74752  }
 0x1ae   :  { %2101 = vmatprep.subr.mxu0 %v12138_v51  ;;  %2279 = vmatprep.subr.mxu1 %v12138_v51 }
 0x1af   :  { %2060 = vmatprep.mubr.f32.mxu0 %v11090_v28  ;;  %2102 = vmatpush1.msra.mxu0 %v12130_v37 }
 0x1b0   :  { %2280 = vmatpush1.msra.mxu1 %v12130_v37  ;;  %8917 = vmatmul.mubr.msk.f32.gmra.mxu0 %vm1980_vm1, %v1978_v36 }
 0x1b1   :  { %2103 = vmatprep.subr.mxu0 %v12134_v52  ;;  %2281 = vmatprep.subr.mxu1 %v12134_v52 }
 0x1b2   :  { %2104 = vmatpush1.msra.mxu0 %v12126_v48  ;;  %2282 = vmatpush1.msra.mxu1 %v12126_v48 }
 0x1b3   :  { %2315 = vmatprep.mubr.f32.mxu1 %v11090_v28  ;;  %2194 = vmatprep.subr.mxu0 %v12155_v10 }
 0x1b4   :  { %8925 = vmatmul.mubr.msk.f32.vlgmr.msra.gmra.mxu1 %vm1980_vm1, %v2156_v14  ;;  %2455 = vmatprep.subr.mxu1 %v12171_v44 }
 0x1b5   :  { %2137 = vmatprep.mubr.f32.mxu0 %v11090_v28  ;;  %2456 = vmatpush1.msra.mxu1 %v12180_v23 }
 0x1b6   :  { %8919 = vmatmul.mubr.msk.f32.vlgmr.msra.gmra.mxu0 %vm1980_vm1, %v1977_v0  ;;  %2457 = vmatprep.subr.mxu1 %v12138_v51  ;;  %v10212_v0 = vld [vmem:[%s14717_s4 + $0x1f0] ss:$8 sps:$4 sm:$0xff]  }
 0x1b7   :  { %2195 = vmatpush1.msra.mxu0 %v12157_v20  ;;  %2321 = vmatprep.mubr.f32.mxu1 %v11090_v28 }
 0x1b8   :  { %2196 = vmatprep.subr.mxu0 %v12136_v31  ;;  %2458 = vmatpush1.msra.mxu1 %v12130_v37 }
 0x1b9   :  { %2197 = vmatpush1.msra.mxu0 %v12128_v56  ;;  %8926 = vmatmul.mubr.msk.f32.gmra.mxu1 %vm1980_vm1, %v2157_v35 }
 0x1ba   :  { %2459 = vmatprep.subr.mxu1 %v12134_v52  ;;  %2143 = vmatprep.mubr.f32.mxu0 %v11090_v28 }
 0x1bb   :  { %2198 = vmatprep.subr.mxu0 %v12132_v15  ;;  %2460 = vmatpush1.msra.mxu1 %v12126_v48 }
 0x1bc   :  { %8920 = vmatmul.mubr.msk.f32.gmra.mxu0 %vm1980_vm1, %v1978_v36  ;;  %2633 = vmatprep.subr.mxu1 %v12171_v44  ;;  %v10161_v36 = vld [vmem:[%s14717_s4] ss:$8 sps:$4 sm:$0xff]  }
 0x1bd   :  { %2199 = vmatpush1.msra.mxu0 %v12124_v5  ;;  %2327 = vmatprep.mubr.f32.mxu1 %v11090_v28 }
 0x1be   :  { %2372 = vmatprep.subr.mxu0 %v12155_v10  ;;  %8927 = vmatmul.mubr.msk.f32.gmra.mxu1 %vm1980_vm1, %v2158_v42 }
 0x1bf   :  { %2149 = vmatprep.mubr.f32.mxu0 %v11090_v28  ;;  %2493 = vmatprep.mubr.f32.mxu1 %v11090_v28  ;;  %v2335_v28 = vld [vmem:[%s14744_s27 + $0x38] sm:$0xff] }
 0x1c0   :  { %8921 = vmatmul.mubr.msk.f32.gmra.mxu0 %vm1980_vm1, %v1979_v33  ;;  %v10214_v33 = vld [vmem:[%s14717_s4 + $0x1f4] ss:$8 sps:$4 sm:$0xff]  }
 0x1c1   :  { %2232 = vmatprep.mubr.f32.mxu0 %v12240_v61 }
 0x1c2   :  { %8931 = vmatmul.mubr.msk.f32.vlgmr.msra.gmra.mxu1 %vm1980_vm1, %v2334_v40 }
 0x1c3   :  { %2634 = vmatpush1.msra.mxu1 %v12180_v23  ;;  %2499 = vmatprep.mubr.f32.mxu1 %v12240_v61 }
 0x1c4   :  { %2635 = vmatprep.subr.mxu1 %v12138_v51  ;;  %8922 = vmatmul.mubr.msk.f32.vlgmr.msra.gmra.mxu0 %vm1980_vm1, %v2156_v14  ;;  %v10169_v14 = vld [vmem:[%s14717_s4 + $0xf4] ss:$8 sps:$4 sm:$0xff]  }
 0x1c5   :  { %2373 = vmatpush1.msra.mxu0 %v12157_v20  ;;  %2636 = vmatpush1.msra.mxu1 %v12130_v37 }
 0x1c6   :  { %2374 = vmatprep.subr.mxu0 %v12136_v31  ;;  %2637 = vmatprep.subr.mxu1 %v12134_v52  ;;  %v10454_v52 = vld [vmem:[%s14720_s7 + $0x128] sm:$0xff]  }
 0x1c7   :  { %2375 = vmatpush1.msra.mxu0 %v12128_v56  ;;  %2638 = vmatpush1.msra.mxu1 %v12126_v48  ;;  %v10409_v48 = vld [vmem:[%s14719_s6 + $0xd0] sm:$0xff]  }
 0x1c8   :  { %2238 = vmatprep.mubr.f32.mxu0 %v12240_v61  ;;  %2376 = vmatprep.subr.mxu0 %v12132_v15 }
 0x1c9   :  { %8923 = vmatmul.mubr.msk.f32.gmra.mxu0 %vm1980_vm1, %v2157_v35  ;;  %8932 = vmatmul.mubr.msk.f32.gmra.mxu1 %vm1980_vm1, %v2335_v28  ;;  %v10215_v35 = vld [vmem:[%s14717_s4 + $0x1e0] ss:$8 sps:$4 sm:$0xff]  }
 0x1ca   :  { %2377 = vmatpush1.msra.mxu0 %v12124_v5  ;;  %2244 = vmatprep.mubr.f32.mxu0 %v12240_v61 }
 0x1cb   :  { %2550 = vmatprep.subr.mxu0 %v12155_v10  ;;  %2505 = vmatprep.mubr.f32.mxu1 %v12240_v61 }
 0x1cc   :  { %3243 = vmatprep.subr.bf16.mxu1 %v10166_v9  ;;  %v10181_v9 = vld [vmem:[%s14717_s4 + $0xd4] ss:$8 sps:$4 sm:$0xff]  }
 0x1cd   :  { %8924 = vmatmul.mubr.msk.f32.gmra.mxu0 %vm1980_vm1, %v2158_v42  ;;  %8933 = vmatmul.mubr.msk.f32.gmra.mxu1 %vm1980_vm1, %v2336_v3  ;;  %v10217_v42 = vld [vmem:[%s14717_s4 + $0x1e4] ss:$8 sps:$4 sm:$0xff]  }
 0x1ce   :  { %2410 = vmatprep.mubr.f32.mxu0 %v12240_v61  ;;  %2671 = vmatprep.mubr.f32.mxu1 %v12240_v61 }
 0x1d1   :  { %8928 = vmatmul.mubr.msk.f32.vlgmr.msra.gmra.mxu0 %vm1980_vm1, %v2334_v40  ;;  %8937 = vmatmul.mubr.msk.f32.vlgmr.msra.gmra.mxu1 %vm1980_vm1, %v2512_v59  ;;  %v10167_v40 = vld [vmem:[%s14717_s4 + $0xf0] ss:$8 sps:$4 sm:$0xff]  }
 0x1d2   :  { %2551 = vmatpush1.msra.mxu0 %v12157_v20  ;;  %2416 = vmatprep.mubr.f32.mxu0 %v12240_v61 }
 0x1d3   :  { %2552 = vmatprep.subr.mxu0 %v12136_v31  ;;  %3244 = vmatpush1.bf16.msra.mxu1 %v10164_v7  ;;  %v10220_v7 = vld [vmem:[%s14717_s4 + $0x1d4] ss:$8 sps:$4 sm:$0xff]   ;;  %v10359_v31 = vld [vmem:[%s14718_s5 + $0x180] ss:$8 sps:$4 sm:$0xff]  }
 0x1d4   :  { %2553 = vmatpush1.msra.mxu0 %v12128_v56  ;;  %2677 = vmatprep.mubr.f32.mxu1 %v12240_v61  ;;  %v2695_v56 = vpack.c.bf16 %v12157_v20, %v12157_v20  ;;  %v10239_v20 = vld [vmem:[%s14717_s4 + $0x240] ss:$8 sps:$4 sm:$0xff]  }
 0x1d5   :  { %2554 = vmatprep.subr.mxu0 %v12132_v15  ;;  %8929 = vmatmul.mubr.msk.f32.gmra.mxu0 %vm1980_vm1, %v2335_v28  ;;  %v10173_v28 = vld [vmem:[%s14717_s4 + $0xe0] ss:$8 sps:$4 sm:$0xff]   ;;  %v10364_v15 = vld [vmem:[%s14718_s5 + $0x254] ss:$8 sps:$4 sm:$0xff]  }
 0x1d6   :  { %2555 = vmatpush1.msra.mxu0 %v12124_v5  ;;  %2422 = vmatprep.mubr.f32.mxu0 %v12240_v61  ;;  %v10233_v5 = vld [vmem:[%s14717_s4 + $0x250] ss:$8 sps:$4 sm:$0xff]  }
 0x1d7   :  { %3192 = vmatprep.subr.bf16.mxu0 %v10142_v8  ;;  %8938 = vmatmul.mubr.msk.f32.gmra.mxu1 %vm1980_vm1, %v2513_v11  ;;  %v10187_v8 = vld [vmem:[%s14717_s4 + $0xc4] ss:$8 sps:$4 sm:$0xff]  }
 0x1d8   :  { %3245 = vmatprep.subr.bf16.mxu1 %v10172_v29  ;;  %2683 = vmatprep.mubr.f32.mxu1 %v12240_v61  ;;  %v10224_v29 = vld [vmem:[%s14717_s4 + $0x1c0] ss:$8 sps:$4 sm:$0xff]  }
 0x1d9   :  { %8930 = vmatmul.mubr.msk.f32.gmra.mxu0 %vm1980_vm1, %v2336_v3  ;;  %3246 = vmatpush1.bf16.msra.mxu1 %v10170_v12  ;;  %v10218_v3 = vld [vmem:[%s14717_s4 + $0x1d0] ss:$8 sps:$4 sm:$0xff]   ;;  %v10226_v12 = vld [vmem:[%s14717_s4 + $0x1c4] ss:$8 sps:$4 sm:$0xff]  }
 0x1da   :  { %2588 = vmatprep.mubr.f32.mxu0 %v12240_v61  ;;  %3247 = vmatprep.subr.bf16.mxu1 %v10178_v25  ;;  %v10230_v25 = vld [vmem:[%s14717_s4 + $0x1b0] ss:$8 sps:$4 sm:$0xff]  }
 0x1db   :  { %8939 = vmatmul.mubr.msk.f32.gmra.mxu1 %vm1980_vm1, %v2514_v57 }
 0x1dd   :  { %8934 = vmatmul.mubr.msk.f32.vlgmr.msra.gmra.mxu0 %vm1980_vm1, %v2512_v59  ;;  %3248 = vmatpush1.bf16.msra.mxu1 %v10176_v43  ;;  %v10179_v59 = vld [vmem:[%s14717_s4 + $0xd0] ss:$8 sps:$4 sm:$0xff]   ;;  %v10193_v43 = vld [vmem:[%s14717_s4 + $0xb4] ss:$8 sps:$4 sm:$0xff]  }
 0x1de   :  { %2594 = vmatprep.mubr.f32.mxu0 %v12240_v61  ;;  %3193 = vmatpush1.bf16.msra.mxu0 %v10140_v26  ;;  %v10191_v26 = vld [vmem:[%s14717_s4 + $0xb0] ss:$8 sps:$4 sm:$0xff]  }
 0x1df   :  { %3194 = vmatprep.subr.bf16.mxu0 %v10145_v34  ;;  %3249 = vmatprep.subr.bf16.mxu1 %v10184_v27  ;;  %v10199_v34 = vld [vmem:[%s14717_s4 + $0xa4] ss:$8 sps:$4 sm:$0xff]  }
 0x1e0   :  { %v10238_v27 = vld [vmem:[%s14717_s4 + $0x1a4] ss:$8 sps:$4 sm:$0xff]  }
 0x1e1   :  { %8935 = vmatmul.mubr.msk.f32.gmra.mxu0 %vm1980_vm1, %v2513_v11  ;;  %3250 = vmatpush1.bf16.msra.mxu1 %v10182_v6  ;;  %v10185_v11 = vld [vmem:[%s14717_s4 + $0xc0] ss:$8 sps:$4 sm:$0xff]  }
 0x1e2   :  { %2600 = vmatprep.mubr.f32.mxu0 %v12240_v61  ;;  %3195 = vmatpush1.bf16.msra.mxu0 %v10143_v49  ;;  %v10175_v61 = vld [vmem:[%s14717_s4 + $0xe4] ss:$8 sps:$4 sm:$0xff]   ;;  %v10236_v6 = vld [vmem:[%s14717_s4 + $0x1a0] ss:$8 sps:$4 sm:$0xff]  }
 0x1e3   :  { %3196 = vmatprep.subr.bf16.mxu0 %v10148_v63  ;;  %3251 = vmatprep.subr.bf16.mxu1 %v10190_v1  ;;  %v10197_v49 = vld [vmem:[%s14717_s4 + $0xa0] ss:$8 sps:$4 sm:$0xff]   ;;  %v10205_v63 = vld [vmem:[%s14717_s4 + $0x94] ss:$8 sps:$4 sm:$0xff]  }
 0x1e4   :  { %v10244_v1 = vld [vmem:[%s14717_s4 + $0x194] ss:$8 sps:$4 sm:$0xff]  }
 0x1e5   :  { %8936 = vmatmul.mubr.msk.f32.gmra.mxu0 %vm1980_vm1, %v2514_v57  ;;  %3252 = vmatpush1.bf16.msra.mxu1 %v10188_v62  ;;  %v10232_v57 = vld [vmem:[%s14717_s4 + $0x1b4] ss:$8 sps:$4 sm:$0xff]   ;;  %v10242_v62 = vld [vmem:[%s14717_s4 + $0x190] ss:$8 sps:$4 sm:$0xff]  }
 0x1e6   :  { %3197 = vmatpush1.bf16.msra.mxu0 %v10146_v54  ;;  %3253 = vmatprep.subr.bf16.mxu1 %v10196_v2  ;;  %v10203_v54 = vld [vmem:[%s14717_s4 + $0x90] ss:$8 sps:$4 sm:$0xff]   ;;  %v10211_v2 = vld [vmem:[%s14717_s4 + $0x84] ss:$8 sps:$4 sm:$0xff]  }
 0x1e7   :  { %3198 = vmatprep.subr.bf16.mxu0 %v10151_v41  ;;  %v10248_v41 = vld [vmem:[%s14717_s4 + $0x180] ss:$8 sps:$4 sm:$0xff]  }
 0x1e9   :  { %3254 = vmatpush1.bf16.msra.mxu1 %v10194_v16  ;;  %v10250_v16 = vld [vmem:[%s14717_s4 + $0x184] ss:$8 sps:$4 sm:$0xff]  }
 0x1ea   :  { %3199 = vmatpush1.bf16.msra.mxu0 %v10149_v19  ;;  %3255 = vmatprep.subr.bf16.mxu1 %v10202_v50  ;;  %v10209_v19 = vld [vmem:[%s14717_s4 + $0x80] ss:$8 sps:$4 sm:$0xff]   ;;  %v10223_v50 = vld [vmem:[%s14717_s4 + $0x274] ss:$8 sps:$4 sm:$0xff]  }
 0x1eb   :  { %3200 = vmatprep.subr.bf16.mxu0 %v10154_v30  ;;  %v10256_v30 = vld [vmem:[%s14718_s5 + $0x74] ss:$8 sps:$4 sm:$0xff]  }
 0x1ed   :  { %3256 = vmatpush1.bf16.msra.mxu1 %v10200_v17 }
 0x1ee   :  { %3201 = vmatpush1.bf16.msra.mxu0 %v10152_v4  ;;  %3257 = vmatprep.subr.bf16.mxu1 %v10208_v53 }
 0x1ef   :  { %3202 = vmatprep.subr.bf16.mxu0 %v10157_v60 }
 0x1f1   :  { %3258 = vmatpush1.bf16.msra.mxu1 %v10206_v18 }
 0x1f2   :  { %3203 = vmatpush1.bf16.msra.mxu0 %v10155_v32  ;;  %3259 = vmatprep.subr.bf16.mxu1 %v10214_v33 }
 0x1f3   :  { %3204 = vmatprep.subr.bf16.mxu0 %v10160_v21  ;;  %v10221_v21 = vld [vmem:[%s14717_s4 + $0x270] ss:$8 sps:$4 sm:$0xff]  }
 0x1f5   :  { %3260 = vmatpush2.bf16.msra.mxu1 %v10212_v0  ;;  %v10227_v0 = vld [vmem:[%s14717_s4 + $0x260] ss:$8 sps:$4 sm:$0xff]  }
 0x1f6   :  { %3205 = vmatpush1.bf16.msra.mxu0 %v10158_v24  ;;  %3261 = vmatprep.subr.bf16.mxu1 %v10217_v42 }
 0x1f7   :  { %3206 = vmatprep.subr.bf16.mxu0 %v10163_v13  ;;  %v10229_v13 = vld [vmem:[%s14717_s4 + $0x264] ss:$8 sps:$4 sm:$0xff]  }
 0x1f9   :  { %3262 = vmatpush2.bf16.msra.mxu1 %v10215_v35 }
 0x1fa   :  { %3207 = vmatpush1.bf16.msra.mxu0 %v10161_v36  ;;  %3263 = vmatprep.subr.bf16.mxu1 %v10220_v7  ;;  %v10235_v36 = vld [vmem:[%s14717_s4 + $0x254] ss:$8 sps:$4 sm:$0xff]  }
 0x1fb   :  { %3208 = vmatprep.subr.bf16.mxu0 %v10169_v14 }
 0x1fd   :  { %3264 = vmatpush2.bf16.msra.mxu1 %v10218_v3  ;;  %v10247_v3 = vld [vmem:[%s14717_s4 + $0x234] ss:$8 sps:$4 sm:$0xff]  }
 0x1fe   :  { %3209 = vmatpush2.bf16.msra.mxu0 %v10167_v40  ;;  %3265 = vmatprep.subr.bf16.mxu1 %v10226_v12  ;;  %v10245_v12 = vld [vmem:[%s14717_s4 + $0x230] ss:$8 sps:$4 sm:$0xff]  }
 0x1ff   :  { %3210 = vmatprep.subr.bf16.mxu0 %v10175_v61 }
 0x201   :  { %3266 = vmatpush2.bf16.msra.mxu1 %v10224_v29 }
 0x202   :  { %3211 = vmatpush2.bf16.msra.mxu0 %v10173_v28  ;;  %3267 = vmatprep.subr.bf16.mxu1 %v10232_v57  ;;  %v11091_v28 = vmov 0  }
 0x203   :  { %3212 = vmatprep.subr.bf16.mxu0 %v10181_v9 }
 0x205   :  { %3268 = vmatpush2.bf16.msra.mxu1 %v10230_v25  ;;  %v10253_v25 = vld [vmem:[%s14717_s4 + $0x224] ss:$8 sps:$4 sm:$0xff]  }
 0x206   :  { %3213 = vmatpush2.bf16.msra.mxu0 %v10179_v59  ;;  %3269 = vmatprep.subr.bf16.mxu1 %v10238_v27 }
 0x207   :  { %3214 = vmatprep.subr.bf16.mxu0 %v10187_v8 }
 0x209   :  { %3270 = vmatpush2.bf16.msra.mxu1 %v10236_v6  ;;  %v10259_v6 = vld [vmem:[%s14717_s4 + $0x214] ss:$8 sps:$4 sm:$0xff]  }
 0x20a   :  { %3215 = vmatpush2.bf16.msra.mxu0 %v10185_v11  ;;  %3271 = vmatprep.subr.bf16.mxu1 %v10244_v1  ;;  %v10265_v1 = vld [vmem:[%s14717_s4 + $0x204] ss:$8 sps:$4 sm:$0xff]  }
 0x20b   :  { %3216 = vmatprep.subr.bf16.mxu0 %v10193_v43 }
 0x20d   :  { %3272 = vmatpush2.bf16.msra.mxu1 %v10242_v62 }
 0x20e   :  { %3217 = vmatpush2.bf16.msra.mxu0 %v10191_v26  ;;  %3273 = vmatprep.subr.bf16.mxu1 %v10250_v16  ;;  %v10271_v16 = vld [vmem:[%s14718_s5 + $0x174] ss:$8 sps:$4 sm:$0xff]  }
 0x20f   :  { %3218 = vmatprep.subr.bf16.mxu0 %v10199_v34  ;;  %v10251_v34 = vld [vmem:[%s14717_s4 + $0x220] ss:$8 sps:$4 sm:$0xff]  }
 0x211   :  { %3274 = vmatpush2.bf16.msra.mxu1 %v10248_v41  ;;  %v10263_v41 = vld [vmem:[%s14717_s4 + $0x200] ss:$8 sps:$4 sm:$0xff]  }
 0x212   :  { %3219 = vmatpush2.bf16.msra.mxu0 %v10197_v49  ;;  %3918 = vmatprep.subr.bf16.mxu1 %v10256_v30 }
 0x213   :  { %3220 = vmatprep.subr.bf16.mxu0 %v10205_v63  ;;  %v10257_v63 = vld [vmem:[%s14717_s4 + $0x210] ss:$8 sps:$4 sm:$0xff]  }
 0x216   :  { %3221 = vmatpush2.bf16.msra.mxu0 %v10203_v54 }
 0x217   :  { %3222 = vmatprep.subr.bf16.mxu0 %v10211_v2 }
 0x21a   :  { %3223 = vmatpush2.bf16.msra.mxu0 %v10209_v19 }
 0x21b   :  { %3294 = vmatprep.subr.bf16.mxu0 %v10223_v50 }
 0x26b   :  { %v2056_v17 = vpop.f32.mrf.mxu0 }
 0x26c   :  { %v2068_v60 = vpop.f32.mrf.mxu1 }
 0x26d   :  { %v12500_v4 = vpop.f32.mrf.mxu0  ;;  %v2696_v32 = vpack.c.bf16 %v2068_v60, %v2068_v60 }
 0x26e   :  { %v12531_v35 = vpop.f32.mrf.mxu1 }
 0x270   :  { %v2062_v18 = vpop.f32.mrf.mxu0 }
 0x271   :  { %v2691_v53 = vpack.c.bf16 %v2062_v18, %v2056_v17  ;;  %v10254_v18 = vld [vmem:[%s14718_s5 + $0x70] ss:$8 sps:$4 sm:$0xff]  }
 0x272   :  { %v12505_v24 = vpop.f32.mrf.mxu0 }
 0x273   :  { %3224 = vmatprep.mubr.bf16.mxu0 %v2691_v53 }
 0x274   :  { %3225 = vmatmul.mubr.bf16.vlgmr.msra.gmra.mxu0 %v2690_v22  ;;  %v10241_v22 = vld [vmem:[%s14717_s4 + $0x244] ss:$8 sps:$4 sm:$0xff]   ;;  %v12535_v40 = vpop.f32.mrf.mxu1  ;;  %s11094_s4 = smov 20  }
 0x275   :  { %3234 = vmatprep.mubr.bf16.mxu0 %v2696_v32  ;;  %3295 = vmatpush1.bf16.msra.mxu0 %v10221_v21  ;;  %v10262_v21 = vld [vmem:[%s14718_s5 + $0x64] ss:$8 sps:$4 sm:$0xff]  }
 0x276   :  { %v12516_v33 = vpop.f32.mrf.mxu0  ;;  %3296 = vmatprep.subr.bf16.mxu0 %v10229_v13  ;;  %v12548_v7 = vpop.f32.mrf.mxu1 }
 0x278   :  { %v12521_v14 = vpop.f32.mrf.mxu0 }
 0x279   :  { %3297 = vmatpush1.bf16.msra.mxu0 %v10227_v0  ;;  %v12554_v29 = vpop.f32.mrf.mxu1 }
 0x27a   :  { %3298 = vmatprep.subr.bf16.mxu0 %v10235_v36  ;;  %v10260_v36 = vld [vmem:[%s14718_s5 + $0x60] ss:$8 sps:$4 sm:$0xff]  }
 0x27b   :  { %v12564_v43 = vpop.f32.mrf.mxu1 }
 0x27c   :  { %v12533_v42 = vpop.f32.mrf.mxu0  ;;  %3235 = vmatmul.mubr.bf16.gmra.mxu0 %v2695_v56  ;;  %v4682_v57 = vpack.c.bf16 %v12564_v43, %v12548_v7  ;;  %v10268_v56 = vld [vmem:[%s14718_s5 + $0x54] ss:$8 sps:$4 sm:$0xff]   ;;  %v10459_v7 = vld [vmem:[%s14720_s7 + $0x100] sm:$0xff]  }
 0x27d   :  { %v4143_v61 = vpack.c.bf16 %v12533_v42, %v12516_v33  ;;  %3299 = vmatpush1.bf16.msra.mxu0 %v10233_v5  ;;  %3326 = vmatprep.mubr.bf16.mxu0 %v11091_v28  ;;  %v10388_v33 = vld [vmem:[%s14718_s5 + $0x204] ss:$8 sps:$4 sm:$0xff]  }
 0x27e   :  { %v12543_v9 = vpop.f32.mrf.mxu0  ;;  %3300 = vmatprep.subr.bf16.mxu0 %v10241_v22 }
 0x27f   :  { %v4681_v59 = vpack.c.bf16 %v12543_v9, %v12521_v14  ;;  %v10432_v14 = vld [vmem:[%s14720_s7 + $0xb0] sm:$0xff]   ;;  %v10433_v9 = vld [vmem:[%s14720_s7 + $0x18] sm:$0xff]  }
 0x280   :  { %v12552_v8 = vpop.f32.mrf.mxu0 }
 0x281   :  { %3301 = vmatpush1.bf16.msra.mxu0 %v10239_v20  ;;  %v10266_v20 = vld [vmem:[%s14718_s5 + $0x50] ss:$8 sps:$4 sm:$0xff]  }
 0x282   :  { %v12559_v11 = vpop.f32.mrf.mxu0  ;;  %3302 = vmatprep.subr.bf16.mxu0 %v10247_v3 }
 0x284   :  { %v2234_v26 = vpop.f32.mrf.mxu0 }
 0x285   :  { %3303 = vmatpush1.bf16.msra.mxu0 %v10245_v12 }
 0x286   :  { %v12571_v27 = vpop.f32.mrf.mxu0  ;;  %3304 = vmatprep.subr.bf16.mxu0 %v10253_v25  ;;  %v10274_v25 = vld [vmem:[%s14718_s5 + $0x44] ss:$8 sps:$4 sm:$0xff]  }
 0x289   :  { %v2240_v49 = vpop.f32.mrf.mxu0  ;;  %3305 = vmatpush1.bf16.msra.mxu0 %v10251_v34 }
 0x28a   :  { %3306 = vmatprep.subr.bf16.mxu0 %v10259_v6  ;;  %v2692_v53 = vpack.c.bf16 %v2240_v49, %v2234_v26  ;;  %v3417_v26 = vpack.c.bf16 %v12505_v24, %v12500_v4  ;;  %v10269_v6 = vld [vmem:[%s14718_s5 + $0x170] ss:$8 sps:$4 sm:$0xff]   ;;  %v10280_v4 = vld [vmem:[%s14718_s5 + $0x34] ss:$8 sps:$4 sm:$0xff]  }
 0x28b   :  { %v12582_v62 = vpop.f32.mrf.mxu0 }
 0x28c   :  { %v3418_v54 = vpack.c.bf16 %v12582_v62, %v12571_v27  ;;  %v10378_v27 = vld [vmem:[%s14718_s5 + $0x224] ss:$8 sps:$4 sm:$0xff]  }
 0x28d   :  { %v2246_v2 = vpop.f32.mrf.mxu0  ;;  %3307 = vmatpush1.bf16.msra.mxu0 %v10257_v63  ;;  %v10272_v63 = vld [vmem:[%s14718_s5 + $0x40] ss:$8 sps:$4 sm:$0xff]  }
 0x28e   :  { %3308 = vmatprep.subr.bf16.mxu0 %v10265_v1  ;;  %v2697_v3 = vpack.c.bf16 %v2246_v2, %v2246_v2  ;;  %v10277_v1 = vld [vmem:[%s14718_s5 + $0x164] ss:$8 sps:$4 sm:$0xff]  }
 0x28f   :  { %v12592_v19 = vpop.f32.mrf.mxu0 }
 0x291   :  { %v2412_v50 = vpop.f32.mrf.mxu0  ;;  %3309 = vmatpush1.bf16.msra.mxu0 %v10263_v41  ;;  %v10275_v41 = vld [vmem:[%s14718_s5 + $0x160] ss:$8 sps:$4 sm:$0xff]  }
 0x292   :  { %3969 = vmatprep.subr.bf16.mxu0 %v10271_v16 }
 0x293   :  { %v2414_v30 = vpop.f32.mrf.mxu0 }
 0x295   :  { %v2418_v17 = vpop.f32.mrf.mxu0 }
 0x296   :  { %v2693_v60 = vpack.c.bf16 %v2418_v17, %v2412_v50  ;;  %v10278_v50 = vld [vmem:[%s14718_s5 + $0x30] ss:$8 sps:$4 sm:$0xff]   ;;  %v10283_v17 = vld [vmem:[%s14718_s5 + $0x154] ss:$8 sps:$4 sm:$0xff]  }
 0x297   :  { %v2420_v32 = vpop.f32.mrf.mxu0 }
 0x298   :  { %3275 = vmatprep.mubr.bf16.mxu1 %v2693_v60  ;;  %v10286_v60 = vld [vmem:[%s14718_s5 + $0x24] ss:$8 sps:$4 sm:$0xff]  }
 0x299   :  { %v2424_v13 = vpop.f32.mrf.mxu0  ;;  %3276 = vmatmul.mubr.bf16.vlgmr.msra.gmra.mxu1 %v2692_v53  ;;  %v10281_v53 = vld [vmem:[%s14718_s5 + $0x150] ss:$8 sps:$4 sm:$0xff]  }
 0x29a   :  { %v2698_v0 = vpack.c.bf16 %v2424_v13, %v2424_v13  ;;  %3919 = vmatpush1.bf16.msra.mxu1 %v10254_v18  ;;  %v10289_v13 = vld [vmem:[%s14718_s5 + $0x144] ss:$8 sps:$4 sm:$0xff]  }
 0x29b   :  { %v12603_v5 = vpop.f32.mrf.mxu0  ;;  %3920 = vmatprep.subr.bf16.mxu1 %v10262_v21  ;;  %v10284_v21 = vld [vmem:[%s14718_s5 + $0x20] ss:$8 sps:$4 sm:$0xff]  }
 0x29c   :  { %3285 = vmatprep.mubr.bf16.mxu1 %v2698_v0  ;;  %v3419_v0 = vpack.c.bf16 %v2420_v32, %v2414_v30  ;;  %v10295_v30 = vld [vmem:[%s14718_s5 + $0x134] ss:$8 sps:$4 sm:$0xff]   ;;  %v10298_v32 = vld [vmem:[%s14718_s5 + $0x4] ss:$8 sps:$4 sm:$0xff]  }
 0x29d   :  { %v2590_v22 = vpop.f32.mrf.mxu0 }
 0x29e   :  { %3921 = vmatpush1.bf16.msra.mxu1 %v10260_v36  ;;  %v10292_v36 = vld [vmem:[%s14718_s5 + $0x14] ss:$8 sps:$4 sm:$0xff]  }
 0x29f   :  { %v12611_v12 = vpop.f32.mrf.mxu0  ;;  %3922 = vmatprep.subr.bf16.mxu1 %v10268_v56  ;;  %v10287_v56 = vld [vmem:[%s14718_s5 + $0x140] ss:$8 sps:$4 sm:$0xff]  }
 0x2a1   :  { %v2596_v34 = vpop.f32.mrf.mxu0  ;;  %3286 = vmatmul.mubr.bf16.gmra.mxu1 %v2697_v3  ;;  %v10296_v3 = vld [vmem:[%s14718_s5] ss:$8 sps:$4 sm:$0xff]  }
 0x2a2   :  { %v2694_v49 = vpack.c.bf16 %v2596_v34, %v2590_v22  ;;  %3923 = vmatpush1.bf16.msra.mxu1 %v10266_v20  ;;  %3950 = vmatprep.mubr.bf16.mxu1 %v3417_v26  ;;  %v10290_v22 = vld [vmem:[%s14718_s5 + $0x10] ss:$8 sps:$4 sm:$0xff]   ;;  %v10304_v26 = vld [vmem:[%s14718_s5 + $0xf4] ss:$8 sps:$4 sm:$0xff]   ;;  %v10299_v34 = vld [vmem:[%s14718_s5 + $0x120] ss:$8 sps:$4 sm:$0xff]  }
 0x2a3   :  { %3924 = vmatprep.subr.bf16.mxu1 %v10274_v25  ;;  %v12627_v2 = vpop.f32.mrf.mxu0  ;;  %v10293_v20 = vld [vmem:[%s14718_s5 + $0x130] ss:$8 sps:$4 sm:$0xff]   ;;  %v10301_v25 = vld [vmem:[%s14718_s5 + $0x124] ss:$8 sps:$4 sm:$0xff]  }
 0x2a4   :  { %3327 = vmatmul.mubr.bf16.vlgmr.msra.gmra.mxu0 %v2694_v49  ;;  %v3420_v24 = vpack.c.bf16 %v12627_v2, %v12611_v12  ;;  %v10307_v49 = vld [vmem:[%s14718_s5 + $0x114] ss:$8 sps:$4 sm:$0xff]   ;;  %v10400_v12 = vld [vmem:[%s14719_s6 + $0xe8] sm:$0xff]  }
 0x2a5   :  { %3970 = vmatpush1.bf16.msra.mxu0 %v10269_v6  ;;  %v2602_v16 = vpop.f32.mrf.mxu0  ;;  %3336 = vmatprep.mubr.bf16.mxu0 %v11091_v28  ;;  %v10302_v6 = vld [vmem:[%s14718_s5 + $0xf0] ss:$8 sps:$4 sm:$0xff]  }
 0x2a6   :  { %3925 = vmatpush1.bf16.msra.mxu1 %v10272_v63  ;;  %3971 = vmatprep.subr.bf16.mxu0 %v10277_v1  ;;  %v2699_v18 = vpack.c.bf16 %v2602_v16, %v2602_v16  ;;  %v10310_v63 = vld [vmem:[%s14718_s5 + $0xe4] ss:$8 sps:$4 sm:$0xff]   ;;  %v10305_v1 = vld [vmem:[%s14718_s5 + $0x110] ss:$8 sps:$4 sm:$0xff]   ;;  %v10316_v16 = vld [vmem:[%s14718_s5 + $0xd4] ss:$8 sps:$4 sm:$0xff]  }
 0x2a7   :  { %3926 = vmatprep.subr.bf16.mxu1 %v10280_v4  ;;  %v10308_v4 = vld [vmem:[%s14718_s5 + $0xe0] ss:$8 sps:$4 sm:$0xff]   ;;  %v2604_v2 = vpop.f32.mrf.mxu0 }
 0x2a9   :  { %3972 = vmatpush1.bf16.msra.mxu0 %v10275_v41  ;;  %v10313_v41 = vld [vmem:[%s14718_s5 + $0x104] ss:$8 sps:$4 sm:$0xff]  }
 0x2aa   :  { %3927 = vmatpush1.bf16.msra.mxu1 %v10278_v50  ;;  %3973 = vmatprep.subr.bf16.mxu0 %v10283_v17  ;;  %v10311_v50 = vld [vmem:[%s14718_s5 + $0x100] ss:$8 sps:$4 sm:$0xff]   ;;  %v10314_v17 = vld [vmem:[%s14718_s5 + $0xd0] ss:$8 sps:$4 sm:$0xff]  }
 0x2ab   :  { %3928 = vmatprep.subr.bf16.mxu1 %v10286_v60  ;;  %v10319_v60 = vld [vmem:[%s14718_s5 + $0x1f4] ss:$8 sps:$4 sm:$0xff]  }
 0x2ac   :  { %3337 = vmatmul.mubr.bf16.gmra.mxu0 %v2699_v18  ;;  %v10322_v18 = vld [vmem:[%s14718_s5 + $0xc4] ss:$8 sps:$4 sm:$0xff]  }
 0x2ad   :  { %3974 = vmatpush1.bf16.msra.mxu0 %v10281_v53  ;;  %4001 = vmatprep.mubr.bf16.mxu0 %v3419_v0  ;;  %v10317_v53 = vld [vmem:[%s14718_s5 + $0x1f0] ss:$8 sps:$4 sm:$0xff]   ;;  %v10328_v0 = vld [vmem:[%s14718_s5 + $0xb4] ss:$8 sps:$4 sm:$0xff]  }
 0x2ae   :  { %3929 = vmatpush1.bf16.msra.mxu1 %v10284_v21  ;;  %3975 = vmatprep.subr.bf16.mxu0 %v10289_v13  ;;  %v10320_v21 = vld [vmem:[%s14718_s5 + $0xc0] ss:$8 sps:$4 sm:$0xff]   ;;  %v10325_v13 = vld [vmem:[%s14718_s5 + $0x1e4] ss:$8 sps:$4 sm:$0xff]  }
 0x2af   :  { %3930 = vmatprep.subr.bf16.mxu1 %v10292_v36  ;;  %v10323_v36 = vld [vmem:[%s14718_s5 + $0x1e0] ss:$8 sps:$4 sm:$0xff]  }
 0x2b1   :  { %3976 = vmatpush1.bf16.msra.mxu0 %v10287_v56  ;;  %v10326_v56 = vld [vmem:[%s14718_s5 + $0xb0] ss:$8 sps:$4 sm:$0xff]  }
 0x2b2   :  { %3931 = vmatpush1.bf16.msra.mxu1 %v10290_v22  ;;  %3977 = vmatprep.subr.bf16.mxu0 %v10295_v30  ;;  %v10331_v22 = vld [vmem:[%s14718_s5 + $0x1d4] ss:$8 sps:$4 sm:$0xff]   ;;  %v10334_v30 = vld [vmem:[%s14718_s5 + $0xa4] ss:$8 sps:$4 sm:$0xff]  }
 0x2b3   :  { %3932 = vmatprep.subr.bf16.mxu1 %v10298_v32  ;;  %v10329_v32 = vld [vmem:[%s14718_s5 + $0x1d0] ss:$8 sps:$4 sm:$0xff]  }
 0x2b5   :  { %3978 = vmatpush1.bf16.msra.mxu0 %v10293_v20  ;;  %v10332_v20 = vld [vmem:[%s14718_s5 + $0xa0] ss:$8 sps:$4 sm:$0xff]  }
 0x2b6   :  { %3933 = vmatpush1.bf16.msra.mxu1 %v10296_v3  ;;  %3979 = vmatprep.subr.bf16.mxu0 %v10301_v25  ;;  %v10337_v3 = vld [vmem:[%s14718_s5 + $0x1c4] ss:$8 sps:$4 sm:$0xff]   ;;  %v10340_v25 = vld [vmem:[%s14718_s5 + $0x94] ss:$8 sps:$4 sm:$0xff]  }
 0x2b7   :  { %3934 = vmatprep.subr.bf16.mxu1 %v10304_v26  ;;  %v10335_v26 = vld [vmem:[%s14718_s5 + $0x1c0] ss:$8 sps:$4 sm:$0xff]  }
 0x2b9   :  { %3980 = vmatpush1.bf16.msra.mxu0 %v10299_v34  ;;  %v10338_v34 = vld [vmem:[%s14718_s5 + $0x90] ss:$8 sps:$4 sm:$0xff]  }
 0x2ba   :  { %3935 = vmatpush2.bf16.msra.mxu1 %v10302_v6  ;;  %3981 = vmatprep.subr.bf16.mxu0 %v10307_v49  ;;  %v10343_v6 = vld [vmem:[%s14718_s5 + $0x1b4] ss:$8 sps:$4 sm:$0xff]   ;;  %v10346_v49 = vld [vmem:[%s14718_s5 + $0x84] ss:$8 sps:$4 sm:$0xff]  }
 0x2bb   :  { %3936 = vmatprep.subr.bf16.mxu1 %v10310_v63  ;;  %v10341_v63 = vld [vmem:[%s14718_s5 + $0x1b0] ss:$8 sps:$4 sm:$0xff]  }
 0x2bd   :  { %3982 = vmatpush1.bf16.msra.mxu0 %v10305_v1  ;;  %v10344_v1 = vld [vmem:[%s14718_s5 + $0x80] ss:$8 sps:$4 sm:$0xff]  }
 0x2be   :  { %3937 = vmatpush2.bf16.msra.mxu1 %v10308_v4  ;;  %3983 = vmatprep.subr.bf16.mxu0 %v10313_v41  ;;  %v10349_v4 = vld [vmem:[%s14718_s5 + $0x1a4] ss:$8 sps:$4 sm:$0xff]   ;;  %v10352_v41 = vld [vmem:[%s14718_s5 + $0x274] ss:$8 sps:$4 sm:$0xff]  }
 0x2bf   :  { %3938 = vmatprep.subr.bf16.mxu1 %v10316_v16  ;;  %v10347_v16 = vld [vmem:[%s14718_s5 + $0x1a0] ss:$8 sps:$4 sm:$0xff]  }
 0x2c1   :  { %3984 = vmatpush1.bf16.msra.mxu0 %v10311_v50  ;;  %v10350_v50 = vld [vmem:[%s14718_s5 + $0x270] ss:$8 sps:$4 sm:$0xff]  }
 0x2c2   :  { %3939 = vmatpush2.bf16.msra.mxu1 %v10314_v17  ;;  %3985 = vmatprep.subr.bf16.mxu0 %v10319_v60  ;;  %v10355_v17 = vld [vmem:[%s14718_s5 + $0x194] ss:$8 sps:$4 sm:$0xff]   ;;  %v10358_v60 = vld [vmem:[%s14718_s5 + $0x264] ss:$8 sps:$4 sm:$0xff]  }
 0x2c3   :  { %3940 = vmatprep.subr.bf16.mxu1 %v10322_v18  ;;  %v3422_v18 = vpack.c.bf16 %v12531_v35, %v12531_v35  ;;  %v10365_v35 = vld [vmem:[%s14719_s6 + $0x78] sm:$0xff]  }
 0x2c5   :  { %3986 = vmatpush2.bf16.msra.mxu0 %v10317_v53  ;;  %v10353_v53 = vld [vmem:[%s14718_s5 + $0x190] ss:$8 sps:$4 sm:$0xff]  }
 0x2c6   :  { %3941 = vmatpush2.bf16.msra.mxu1 %v10320_v21  ;;  %3987 = vmatprep.subr.bf16.mxu0 %v10325_v13  ;;  %v10356_v21 = vld [vmem:[%s14718_s5 + $0x260] ss:$8 sps:$4 sm:$0xff]   ;;  %v10361_v13 = vld [vmem:[%s14718_s5 + $0x184] ss:$8 sps:$4 sm:$0xff]  }
 0x2c7   :  { %3942 = vmatprep.subr.bf16.mxu1 %v10328_v0  ;;  %v3421_v0 = vpack.c.bf16 %v12155_v10, %v12155_v10  ;;  %v10370_v10 = vld [vmem:[%s14719_s6 + $0x70] sm:$0xff]  }
 0x2c9   :  { %3988 = vmatpush2.bf16.msra.mxu0 %v10323_v36  ;;  %v10368_v36 = vld [vmem:[%s14718_s5 + $0x244] ss:$8 sps:$4 sm:$0xff]  }
 0x2ca   :  { %3943 = vmatpush2.bf16.msra.mxu1 %v10326_v56  ;;  %3989 = vmatprep.subr.bf16.mxu0 %v10331_v22  ;;  %v12822_v56 = vpop.f32.mrf.mxu1  ;;  %v10369_v22 = vld [vmem:[%s14719_s6 + $0x38] sm:$0xff]  }
 0x2cb   :  { %3944 = vmatprep.subr.bf16.mxu1 %v10334_v30  ;;  %v10366_v30 = vld [vmem:[%s14718_s5 + $0x240] ss:$8 sps:$4 sm:$0xff]  }
 0x2cd   :  { %3990 = vmatpush2.bf16.msra.mxu0 %v10329_v32  ;;  %v3424_v32 = vpack.c.bf16 %v12603_v5, %v12603_v5  ;;  %v10371_v5 = vld [vmem:[%s14718_s5 + $0x230] ss:$8 sps:$4 sm:$0xff]  }
 0x2ce   :  { %3945 = vmatpush2.bf16.msra.mxu1 %v10332_v20  ;;  %3991 = vmatprep.subr.bf16.mxu0 %v10337_v3  ;;  %v10373_v20 = vld [vmem:[%s14718_s5 + $0x234] ss:$8 sps:$4 sm:$0xff]   ;;  %v12842_v3 = vpop.f32.mrf.mxu1 }
 0x2cf   :  { %3946 = vmatprep.subr.bf16.mxu1 %v10340_v25  ;;  %v10374_v25 = vld [vmem:[%s14719_s6 + $0x30] sm:$0xff]  }
 0x2d0   :  { %v12856_v62 = vpop.f32.mrf.mxu1 }
 0x2d1   :  { %3992 = vmatpush2.bf16.msra.mxu0 %v10335_v26  ;;  %v10375_v26 = vld [vmem:[%s14719_s6 + $0x68] sm:$0xff]  }
 0x2d2   :  { %3947 = vmatpush2.bf16.msra.mxu1 %v10338_v34  ;;  %3993 = vmatprep.subr.bf16.mxu0 %v10343_v6  ;;  %v3423_v34 = vpack.c.bf16 %v12592_v19, %v12592_v19  ;;  %v10376_v6 = vld [vmem:[%s14718_s5 + $0x220] ss:$8 sps:$4 sm:$0xff]  }
 0x2d3   :  { %3948 = vmatprep.subr.bf16.mxu1 %v10346_v49  ;;  %v10380_v49 = vld [vmem:[%s14719_s6 + $0x60] sm:$0xff]  }
 0x2d4   :  { %v10384_v19 = vld [vmem:[%s14719_s6 + $0x20] sm:$0xff]  }
 0x2d5   :  { %3994 = vmatpush2.bf16.msra.mxu0 %v10341_v63  ;;  %v10383_v63 = vld [vmem:[%s14718_s5 + $0x214] ss:$8 sps:$4 sm:$0xff]  }
 0x2d6   :  { %3949 = vmatpush2.bf16.msra.mxu1 %v10344_v1  ;;  %3995 = vmatprep.subr.bf16.mxu0 %v10349_v4  ;;  %v12872_v1 = vpop.f32.mrf.mxu1  ;;  %v10381_v4 = vld [vmem:[%s14718_s5 + $0x210] ss:$8 sps:$4 sm:$0xff]  }
 0x2d7   :  { %4020 = vmatprep.subr.bf16.mxu1 %v10352_v41  ;;  %v10385_v41 = vld [vmem:[%s14719_s6 + $0x58] sm:$0xff]  }
 0x2d8   :  { %v2501_v42 = vpop.f32.mrf.mxu1 }
 0x2d9   :  { %3951 = vmatmul.mubr.bf16.vlgmr.msra.gmra.mxu1 %v3416_v45  ;;  %3996 = vmatpush2.bf16.msra.mxu0 %v10347_v16  ;;  %v10362_v45 = vld [vmem:[%s14718_s5 + $0x250] ss:$8 sps:$4 sm:$0xff]   ;;  %v10386_v16 = vld [vmem:[%s14718_s5 + $0x200] ss:$8 sps:$4 sm:$0xff]   ;;  %s11099_s5 = smov 38  }
 0x2da   :  { %3960 = vmatprep.mubr.bf16.mxu1 %v3422_v18  ;;  %4021 = vmatpush1.bf16.msra.mxu1 %v10350_v50  ;;  %v10390_v50 = vld [vmem:[%s14719_s6 + $0x50] sm:$0xff]  }
 0x2db   :  { %3997 = vmatprep.subr.bf16.mxu0 %v10355_v17  ;;  %4022 = vmatprep.subr.bf16.mxu1 %v10358_v60  ;;  %v10392_v17 = vld [vmem:[%s14719_s6 + $0xf8] sm:$0xff]   ;;  %v12901_v60 = vpop.f32.mrf.mxu1  ;;  %v10391_v18 = vld [vmem:[%s14719_s6 + $0x10] sm:$0xff]  }
 0x2dd   :  { %3998 = vmatpush2.bf16.msra.mxu0 %v10353_v53  ;;  %v10393_v53 = vld [vmem:[%s14719_s6 + $0xb8] sm:$0xff]  }
 0x2de   :  { %4023 = vmatpush1.bf16.msra.mxu1 %v10356_v21  ;;  %3999 = vmatprep.subr.bf16.mxu0 %v10361_v13  ;;  %v10394_v21 = vld [vmem:[%s14719_s6 + $0x48] sm:$0xff]   ;;  %v10396_v13 = vld [vmem:[%s14719_s6 + $0xf0] sm:$0xff]  }
 0x2df   :  { %4024 = vmatprep.subr.bf16.mxu1 %v10364_v15  ;;  %v12915_v15 = vpop.f32.mrf.mxu1 }
 0x2e1   :  { %3961 = vmatmul.mubr.bf16.gmra.mxu1 %v3421_v0  ;;  %4000 = vmatpush2.bf16.msra.mxu0 %v10359_v31  ;;  %v10395_v31 = vld [vmem:[%s14719_s6 + $0x8] sm:$0xff]   ;;  %v10399_v0 = vld [vmem:[%s14719_s6] sm:$0xff]  }
 0x2e2   :  { %4025 = vmatpush1.bf16.msra.mxu1 %v10362_v45  ;;  %9600 = vmatprep.subr.bf16.mxu0 %v10365_v35  ;;  %v10397_v45 = vld [vmem:[%s14719_s6 + $0xb0] sm:$0xff]   ;;  %v10398_v35 = vld [vmem:[%s14719_s6 + $0x40] sm:$0xff]  }
 0x2e3   :  { %4026 = vmatprep.subr.bf16.mxu1 %v10368_v36  ;;  %4052 = vmatprep.mubr.bf16.mxu1 %v11091_v28  ;;  %v10401_v36 = vld [vmem:[%s14719_s6 + $0xa8] sm:$0xff]  }
 0x2e4   :  { %4002 = vmatmul.mubr.bf16.vlgmr.msra.gmra.mxu0 %v3418_v54  ;;  %v10379_v54 = vld [vmem:[%s14719_s6 + $0x28] sm:$0xff]  }
 0x2e5   :  { %4011 = vmatprep.mubr.bf16.mxu0 %v3424_v32  ;;  %9601 = vmatpush3.bf16.msra.mxu0 %v10369_v22  ;;  %v10402_v22 = vld [vmem:[%s14719_s6 + $0x138] sm:$0xff]   ;;  %v4145_v32 = vpack.c.bf16 %v2501_v42, %v12856_v62 }
 0x2e6   :  { %4027 = vmatpush1.bf16.msra.mxu1 %v10366_v30  ;;  %9602 = vmatprep.subr.bf16.mxu0 %v10370_v10  ;;  %v3425_v30 = vpack.c.bf16 %v2604_v2, %v2604_v2  ;;  %v10403_v10 = vld [vmem:[%s14719_s6 + $0xe0] sm:$0xff]   ;;  %v10418_v42 = vld [vmem:[%s14720_s7 + $0x78] sm:$0xff]  }
 0x2e7   :  { %4028 = vmatprep.subr.bf16.mxu1 %v10373_v20  ;;  %v10428_v2 = vld [vmem:[%s14720_s7 + $0xb8] sm:$0xff]  }
 0x2e9   :  { %9603 = vmatpush3.bf16.msra.mxu0 %v10374_v25  ;;  %v10404_v25 = vld [vmem:[%s14719_s6 + $0xa0] sm:$0xff]  }
 0x2ea   :  { %4029 = vmatpush1.bf16.msra.mxu1 %v10371_v5  ;;  %9604 = vmatprep.subr.bf16.mxu0 %v10375_v26  ;;  %v10405_v5 = vld [vmem:[%s14719_s6 + $0x130] sm:$0xff]   ;;  %v4148_v26 = vpack.c.bf16 %v12552_v8, %v12552_v8  ;;  %v10407_v8 = vld [vmem:[%s14719_s6 + $0x98] sm:$0xff]  }
 0x2eb   :  { %4030 = vmatprep.subr.bf16.mxu1 %v10378_v27  ;;  %v10406_v27 = vld [vmem:[%s14719_s6 + $0xd8] sm:$0xff]  }
 0x2ec   :  { %4012 = vmatmul.mubr.bf16.gmra.mxu0 %v3423_v34  ;;  %v4147_v34 = vpack.c.bf16 %v12180_v23, %v12180_v23  ;;  %v10413_v23 = vld [vmem:[%s14719_s6 + $0x88] sm:$0xff]  }
 0x2ed   :  { %9605 = vmatpush3.bf16.msra.mxu0 %v10379_v54  ;;  %4511 = vmatprep.mubr.bf16.mxu0 %v4143_v61  ;;  %v10389_v61 = vld [vmem:[%s14719_s6 + $0x18] sm:$0xff]   ;;  %v10408_v54 = vld [vmem:[%s14719_s6 + $0x128] sm:$0xff]  }
 0x2ee   :  { %4031 = vmatpush1.bf16.msra.mxu1 %v10376_v6  ;;  %9606 = vmatprep.subr.bf16.mxu0 %v10380_v49  ;;  %v10410_v6 = vld [vmem:[%s14719_s6 + $0x90] sm:$0xff]   ;;  %v10411_v49 = vld [vmem:[%s14719_s6 + $0x120] sm:$0xff]  }
 0x2ef   :  { %4032 = vmatprep.subr.bf16.mxu1 %v10383_v63  ;;  %v10412_v63 = vld [vmem:[%s14719_s6 + $0xc8] sm:$0xff]  }
 0x2f1   :  { %9607 = vmatpush3.bf16.msra.mxu0 %v10384_v19  ;;  %v10414_v19 = vld [vmem:[%s14719_s6 + $0x118] sm:$0xff]  }
 0x2f2   :  { %4033 = vmatpush1.bf16.msra.mxu1 %v10381_v4  ;;  %9608 = vmatprep.subr.bf16.mxu0 %v10385_v41  ;;  %v10415_v4 = vld [vmem:[%s14719_s6 + $0xc0] sm:$0xff]  }
 0x2f3   :  { %4034 = vmatprep.subr.bf16.mxu1 %v10388_v33  ;;  %v10416_v41 = vld [vmem:[%s14719_s6 + $0x80] sm:$0xff]   ;;  %v10417_v33 = vld [vmem:[%s14719_s6 + $0x110] sm:$0xff]  }
 0x2f5   :  { %9609 = vmatpush3.bf16.msra.mxu0 %v10389_v61  ;;  %v10419_v61 = vld [vmem:[%s14720_s7 + $0x38] sm:$0xff]  }
 0x2f6   :  { %4035 = vmatpush1.bf16.msra.mxu1 %v10386_v16  ;;  %9610 = vmatprep.subr.bf16.mxu0 %v10390_v50  ;;  %v10420_v16 = vld [vmem:[%s14719_s6 + $0x108] sm:$0xff]   ;;  %v4144_v50 = vpack.c.bf16 %v12554_v29, %v12535_v40  ;;  %v10423_v40 = vld [vmem:[%s14719_s6 + $0x100] sm:$0xff]  }
 0x2f7   :  { %9628 = vmatprep.subr.bf16.mxu1 %v10392_v17  ;;  %v4150_v17 = vpack.c.bf16 %v12915_v15, %v12915_v15  ;;  %v10425_v15 = vld [vmem:[%s14720_s7 + $0x28] sm:$0xff]  }
 0x2f9   :  { %4053 = vmatmul.mubr.bf16.vlgmr.msra.gmra.mxu1 %v3420_v24  ;;  %9611 = vmatpush3.bf16.msra.mxu0 %v10391_v18  ;;  %v12933_v24 = vpop.f32.mrf.mxu1  ;;  %v10421_v18 = vld [vmem:[%s14720_s7 + $0x70] sm:$0xff]  }
 0x2fa   :  { %9629 = vmatpush3.bf16.msra.mxu1 %v10393_v53  ;;  %9612 = vmatprep.subr.bf16.mxu0 %v10394_v21  ;;  %v10422_v53 = vld [vmem:[%s14720_s7 + $0x30] sm:$0xff]   ;;  %v10424_v21 = vld [vmem:[%s14720_s7 + $0x68] sm:$0xff]  }
 0x2fb   :  { %9630 = vmatprep.subr.bf16.mxu1 %v10396_v13  ;;  %4062 = vmatprep.mubr.bf16.mxu1 %v11091_v28  ;;  %v2673_v20 = vpop.f32.mrf.mxu1 }
 0x2fd   :  { %9613 = vmatpush3.bf16.msra.mxu0 %v10395_v31  ;;  %v12962_v62 = vpop.f32.mrf.mxu1  ;;  %v4149_v31 = vpack.c.bf16 %v12822_v56, %v12822_v56  ;;  %v10429_v56 = vld [vmem:[%s14720_s7 + $0x20] sm:$0xff]  }
 0x2fe   :  { %9631 = vmatpush3.bf16.msra.mxu1 %v10397_v45  ;;  %9614 = vmatprep.subr.bf16.mxu0 %v10398_v35  ;;  %v10426_v45 = vld [vmem:[%s14720_s7 + $0xf8] sm:$0xff]   ;;  %v10427_v35 = vld [vmem:[%s14720_s7 + $0x60] sm:$0xff]  }
 0x2ff   :  { %9632 = vmatprep.subr.bf16.mxu1 %v10400_v12  ;;  %v2679_v37 = vpop.f32.mrf.mxu1 }
 0x301   :  { %4063 = vmatmul.mubr.bf16.gmra.mxu1 %v3425_v30  ;;  %9615 = vmatpush3.bf16.msra.mxu0 %v10399_v0  ;;  %v13021_v29 = vpop.f32.mrf.mxu1  ;;  %v10430_v0 = vld [vmem:[%s14720_s7 + $0xf0] sm:$0xff]  }
 0x302   :  { %9633 = vmatpush3.bf16.msra.mxu1 %v10401_v36  ;;  %9739 = vmatprep.subr.bf16.mxu0 %v10402_v22  ;;  %v4683_v36 = vpack.c.bf16 %v12901_v60, %v12872_v1  ;;  %v10435_v1 = vld [vmem:[%s14720_s7 + $0x50] sm:$0xff]   ;;  %v10436_v60 = vld [vmem:[%s14720_s7 + $0xa8] sm:$0xff]  }
 0x303   :  { %9634 = vmatprep.subr.bf16.mxu1 %v10403_v10  ;;  %4559 = vmatprep.mubr.bf16.mxu1 %v4145_v32  ;;  %v2685_v13 = vpop.f32.mrf.mxu1  ;;  %v10437_v30 = vld [vmem:[%s14720_s7 + $0x10] sm:$0xff]   ;;  %v10438_v10 = vld [vmem:[%s14720_s7 + $0xe0] sm:$0xff]   ;;  %v10439_v32 = vld [vmem:[%s14720_s7 + $0x48] sm:$0xff]  }
 0x304   :  { %4512 = vmatmul.mubr.bf16.vlgmr.msra.gmra.mxu0 %v4142_v55  ;;  %v4146_v55 = vpack.c.bf16 %v2679_v37, %v2673_v20  ;;  %v4151_v12 = vpack.c.bf16 %v2685_v13, %v2685_v13  ;;  %v10440_v20 = vld [vmem:[%s14720_s7 + $0xa0] sm:$0xff]  }
 0x305   :  { %4519 = vmatprep.mubr.bf16.mxu0 %v4148_v26  ;;  %9740 = vmatpush3.bf16.msra.mxu0 %v10402_v22  ;;  %v10431_v22 = vld [vmem:[%s14720_s7 + $0x58] sm:$0xff]   ;;  %v10443_v26 = vld [vmem:[%s14720_s7 + $0x40] sm:$0xff]   ;;  %v2687_v43 = vpop.f32.mrf.mxu1 }
 0x306   :  { %9635 = vmatpush3.bf16.msra.mxu1 %v10404_v25  ;;  %9741 = vmatprep.subr.bf16.mxu0 %v10405_v5  ;;  %v10441_v25 = vld [vmem:[%s14720_s7 + $0x8] sm:$0xff]  }
 0x307   :  { %9636 = vmatprep.subr.bf16.mxu1 %v10406_v27  ;;  %v10444_v27 = vld [vmem:[%s14720_s7 + $0x98] sm:$0xff]  }
 0x309   :  { %9742 = vmatpush3.bf16.msra.mxu0 %v10405_v5  ;;  %v10442_v5 = vld [vmem:[%s14720_s7 + $0xd8] sm:$0xff]  }
 0x30a   :  { %9637 = vmatpush3.bf16.msra.mxu1 %v10407_v8  ;;  %9743 = vmatprep.subr.bf16.mxu0 %v10408_v54  ;;  %v10445_v8 = vld [vmem:[%s14720_s7] sm:$0xff]  }
 0x30b   :  { %9638 = vmatprep.subr.bf16.mxu1 %v10409_v48  ;;  %v10448_v48 = vld [vmem:[%s14720_s7 + $0x138] sm:$0xff]  }
 0x30c   :  { %4520 = vmatmul.mubr.bf16.gmra.mxu0 %v4147_v34 }
 0x30d   :  { %9744 = vmatpush3.bf16.msra.mxu0 %v10408_v54  ;;  %9755 = vmatprep.mubr.bf16.mxu0 %v4146_v55  ;;  %v10446_v54 = vld [vmem:[%s14720_s7 + $0xd0] sm:$0xff]  }
 0x30e   :  { %9639 = vmatpush3.bf16.msra.mxu1 %v10410_v6  ;;  %9745 = vmatprep.subr.bf16.mxu0 %v10411_v49  ;;  %v10447_v55 = vld [vmem:[%s14720_s7 + $0x90] sm:$0xff]   ;;  %v10449_v6 = vld [vmem:[%s14720_s7 + $0xc8] sm:$0xff]  }
 0x30f   :  { %9640 = vmatprep.subr.bf16.mxu1 %v10412_v63  ;;  %v4686_v63 = vpack.c.bf16 %v12559_v11, %v12559_v11 }
 0x311   :  { %9746 = vmatpush3.bf16.msra.mxu0 %v10411_v49  ;;  %v10451_v49 = vld [vmem:[%s14720_s7 + $0x130] sm:$0xff]  }
 0x312   :  { %9641 = vmatpush3.bf16.msra.mxu1 %v10413_v23  ;;  %9747 = vmatprep.subr.bf16.mxu0 %v10414_v19 }
 0x313   :  { %9642 = vmatprep.subr.bf16.mxu1 %v10415_v4 }
 0x315   :  { %9748 = vmatpush3.bf16.msra.mxu0 %v10414_v19  ;;  %v10450_v19 = vld [vmem:[%s14720_s7 + $0x88] sm:$0xff]  }
 0x316   :  { %9643 = vmatpush3.bf16.msra.mxu1 %v10416_v41  ;;  %9749 = vmatprep.subr.bf16.mxu0 %v10417_v33  ;;  %v10452_v41 = vld [vmem:[%s14720_s7 + $0xc0] sm:$0xff]  }
 0x317   :  { %9666 = vmatprep.subr.bf16.mxu1 %v10418_v42  ;;  %v10455_v42 = vld [vmem:[%s14720_s7 + $0x120] sm:$0xff]  }
 0x319   :  { %4560 = vmatmul.mubr.bf16.vlgmr.msra.gmra.mxu1 %v4144_v50  ;;  %9750 = vmatpush3.bf16.msra.mxu0 %v10417_v33  ;;  %v4685_v33 = vpack.c.bf16 %v12171_v44, %v12171_v44  ;;  %v10456_v44 = vld [vmem:[%s14720_s7 + $0x118] sm:$0xff]  }
 0x31a   :  { %9667 = vmatpush3.bf16.msra.mxu1 %v10419_v61  ;;  %9751 = vmatprep.subr.bf16.mxu0 %v10420_v16  ;;  %v4684_v61 = vpack.c.bf16 %v13021_v29, %v12962_v62  ;;  %v10457_v62 = vld [vmem:[%s14720_s7 + $0x110] sm:$0xff]  }
 0x31b   :  { %9668 = vmatprep.subr.bf16.mxu1 %v10421_v18  ;;  %4567 = vmatprep.mubr.bf16.mxu1 %v4150_v17  ;;  %v4688_v17 = vpack.c.bf16 %v12933_v24, %v12933_v24  ;;  %v4687_v18 = vpack.c.bf16 %v12842_v3, %v12842_v3  ;;  %v10458_v24 = vld [vmem:[%s14720_s7 + $0x108] sm:$0xff]  }
 0x31d   :  { %9752 = vmatpush3.bf16.msra.mxu0 %v10420_v16 }
 0x31e   :  { %9669 = vmatpush3.bf16.msra.mxu1 %v10422_v53  ;;  %9753 = vmatprep.subr.bf16.mxu0 %v10423_v40  ;;  %v13163_v53 = vld [vmem:[#allocation2] sm:$0xff] }
 0x31f   :  { %9670 = vmatprep.subr.bf16.mxu1 %v10424_v21 }
 0x321   :  { %4568 = vmatmul.mubr.bf16.gmra.mxu1 %v4149_v31  ;;  %9754 = vmatpush3.bf16.msra.mxu0 %v10423_v40  ;;  %v2780_v40 = vld [vmem:[%s14721_s8] sm:$0x3]  ;;  %s11093_s8 = smov 92  }
 0x322   :  { %9671 = vmatpush3.bf16.msra.mxu1 %v10425_v15  ;;  %5049 = vmatprep.mubr.bf16.mxu1 %v4681_v59  ;;  %v10434_v59 = vld [vmem:[%s14720_s7 + $0xe8] sm:$0xff]   ;;  %v2785_v21 = vrot.slane %v2780_v40, %v11906_v38 }
 0x323   :  { %9694 = vmatprep.subr.bf16.mxu0 %v10426_v45  ;;  %9672 = vmatprep.subr.bf16.mxu1 %v10427_v35  ;;  %v2789_v45 = vrot.slane %v2780_v40, %v12018_v47 }
 0x324   :  { %9756 = vmatmul.mubr.bf16.vlgmr.msra.gmra.mxu0 %v4151_v12 }
 0x325   :  { %9695 = vmatpush3.bf16.msra.mxu0 %v10428_v2  ;;  %5097 = vmatprep.mubr.bf16.mxu0 %v4683_v36 }
 0x326   :  { %9673 = vmatpush3.bf16.msra.mxu1 %v10429_v56  ;;  %9696 = vmatprep.subr.bf16.mxu0 %v10430_v0 }
 0x327   :  { %9674 = vmatprep.subr.bf16.mxu1 %v10431_v22 }
 0x329   :  { %9697 = vmatpush3.bf16.msra.mxu0 %v10432_v14 }
 0x32a   :  { %9675 = vmatpush3.bf16.msra.mxu1 %v10433_v9  ;;  %9698 = vmatprep.subr.bf16.mxu0 %v10434_v59 }
 0x32b   :  { %9676 = vmatprep.subr.bf16.mxu1 %v10435_v1 }
 0x32d   :  { %9699 = vmatpush3.bf16.msra.mxu0 %v10436_v60 }
 0x32e   :  { %9677 = vmatpush3.bf16.msra.mxu1 %v10437_v30  ;;  %9700 = vmatprep.subr.bf16.mxu0 %v10438_v10 }
 0x32f   :  { %9678 = vmatprep.subr.bf16.mxu1 %v10439_v32 }
 0x331   :  { %9701 = vmatpush3.bf16.msra.mxu0 %v10440_v20 }
 0x332   :  { %9679 = vmatpush3.bf16.msra.mxu1 %v10441_v25  ;;  %9702 = vmatprep.subr.bf16.mxu0 %v10442_v5 }
 0x333   :  { %9680 = vmatprep.subr.bf16.mxu1 %v10443_v26 }
 0x334   :  { %v13102_v37 = vpop.f32.mrf.mxu0 }
 0x335   :  { %9703 = vmatpush3.bf16.msra.mxu0 %v10444_v27  ;;  %v3227_v31 = vadd.f32 %v13102_v37, %v2785_v21 }
 0x336   :  { %9681 = vmatpush3.bf16.msra.mxu1 %v10445_v8  ;;  %9704 = vmatprep.subr.bf16.mxu0 %v10446_v54  ;;  %v13107_v34 = vpop.f32.mrf.mxu0 }
 0x337   :  { %9759 = vmatprep.subr.bf16.mxu1 %v10448_v48  ;;  %v3229_v0 = vadd.f32 %v13107_v34, %v2789_v45 }
 0x338   :  { %v13117_v23 = vpop.f32.mrf.mxu0 }
 0x339   :  { %5050 = vmatmul.mubr.bf16.vlgmr.msra.gmra.mxu1 %v4680_v46  ;;  %9705 = vmatpush3.bf16.msra.mxu0 %v10447_v55  ;;  %v10453_v46 = vld [vmem:[%s14720_s7 + $0x80] sm:$0xff]   ;;  %s11092_s7 = smov 56   ;;  %v3231_v60 = vadd.f32 %v13117_v23, %v2785_v21 }
 0x33a   :  { %5057 = vmatprep.mubr.bf16.mxu1 %v4686_v63  ;;  %9760 = vmatpush3.bf16.msra.mxu1 %v10448_v48  ;;  %v13125_v4 = vpop.f32.mrf.mxu0 }
 0x33b   :  { %9706 = vmatprep.subr.bf16.mxu0 %v10449_v6  ;;  %9761 = vmatprep.subr.bf16.mxu1 %v10451_v49  ;;  %v3233_v25 = vadd.f32 %v13125_v4, %v2789_v45 }
 0x33c   :  { %v13133_v51 = vpop.f32.mrf.mxu0 }
 0x33d   :  { %9707 = vmatpush3.bf16.msra.mxu0 %v10450_v19  ;;  %v3237_v54 = vadd.f32 %v13133_v51, %v2785_v21 }
 0x33e   :  { %9762 = vmatpush3.bf16.msra.mxu1 %v10451_v49  ;;  %9708 = vmatprep.subr.bf16.mxu0 %v10452_v41  ;;  %v13138_v11 = vpop.f32.mrf.mxu0 }
 0x33f   :  { %9763 = vmatprep.subr.bf16.mxu1 %v10454_v52  ;;  %v3239_v6 = vadd.f32 %v13138_v11, %v2789_v45 }
 0x340   :  { %v3240_v16 = vpop.f32.mrf.mxu0 }
 0x341   :  { %5058 = vmatmul.mubr.bf16.gmra.mxu1 %v4685_v33  ;;  %9709 = vmatpush3.bf16.msra.mxu0 %v10453_v46 }
 0x342   :  { %9764 = vmatpush3.bf16.msra.mxu1 %v10454_v52  ;;  %9775 = vmatprep.mubr.bf16.mxu1 %v4684_v61  ;;  %v3241_v50 = vpop.f32.mrf.mxu0 }
 0x343   :  { %9765 = vmatprep.subr.bf16.mxu1 %v10455_v42 }
 0x344   :  { %5098 = vmatmul.mubr.bf16.vlgmr.msra.gmra.mxu0 %v4682_v57  ;;  %v4689_v57 = vpack.c.bf16 %v2687_v43, %v2687_v43 }
 0x345   :  { %5105 = vmatprep.mubr.bf16.mxu0 %v4688_v17 }
 0x346   :  { %9766 = vmatpush3.bf16.msra.mxu1 %v10455_v42 }
 0x347   :  { %9767 = vmatprep.subr.bf16.mxu1 %v10456_v44 }
 0x34a   :  { %9768 = vmatpush3.bf16.msra.mxu1 %v10456_v44  ;;  %v3506_v44 = vld [vmem:[%s14722_s9] sm:$0x3]  ;;  %s11098_s9 = smov 8  }
 0x34b   :  { %9769 = vmatprep.subr.bf16.mxu1 %v10457_v62 }
 0x34c   :  { %5106 = vmatmul.mubr.bf16.gmra.mxu0 %v4687_v18  ;;  %v3511_v18 = vrot.slane %v3506_v44, %v11906_v38 }
 0x34d   :  { %5420 = vmatprep.mubr.f32.mxu0 %v13163_v53 }
 0x34e   :  { %9770 = vmatpush3.bf16.msra.mxu1 %v10457_v62 }
 0x34f   :  { %9771 = vmatprep.subr.bf16.mxu1 %v10458_v24 }
 0x352   :  { %9772 = vmatpush3.bf16.msra.mxu1 %v10458_v24 }
 0x353   :  { %9773 = vmatprep.subr.bf16.mxu1 %v10459_v7 }
 0x356   :  { %9774 = vmatpush3.bf16.msra.mxu1 %v10459_v7 }
 0x359   :  { %9776 = vmatmul.mubr.bf16.vlgmr.msra.gmra.mxu1 %v4689_v57  ;;  %v3277_v3 = vpop.f32.mrf.mxu1 }
 0x35a   :  { %5319 = vmatprep.mubr.f32.mxu1 %v13163_v53  ;;  %v3278_v12 = vadd.f32 %v3277_v3, %v3227_v31  ;;  %v3515_v3 = vrot.slane %v3506_v44, %v12018_v47 }
 0x35b   :  { %v3279_v29 = vpop.f32.mrf.mxu1 }
 0x35c   :  { %v3280_v9 = vadd.f32 %v3279_v29, %v3229_v0 }
 0x35d   :  { %v3281_v13 = vpop.f32.mrf.mxu1 }
 0x35e   :  { %v3282_v32 = vadd.f32 %v3281_v13, %v3231_v60 }
 0x35f   :  { %v3283_v15 = vpop.f32.mrf.mxu1 }
 0x360   :  { %v3284_v27 = vadd.f32 %v3283_v15, %v3233_v25 }
 0x361   :  { %v3287_v35 = vpop.f32.mrf.mxu1 }
 0x362   :  { %v3288_v55 = vadd.f32 %v3287_v35, %v3237_v54 }
 0x363   :  { %v3289_v2 = vpop.f32.mrf.mxu1 }
 0x364   :  { %v3328_v56 = vpop.f32.mrf.mxu0  ;;  %v3290_v49 = vadd.f32 %v3289_v2, %v3239_v6 }
 0x365   :  { %v13177_v36 = vadd.f32 %v3328_v56, %v3278_v12  ;;  %v3291_v22 = vpop.f32.mrf.mxu1 }
 0x366   :  { %v3330_v14 = vpop.f32.mrf.mxu0 }
 0x367   :  { %v3292_v59 = vpop.f32.mrf.mxu1  ;;  %3360 = vrot.lane.b32.xlu0 %v13177_v36, %s11092_s7  ;;  %3348 = vrot.lane.b32.xlu1 %v13177_v36, %s11093_s8  ;;  %v3331_v30 = vadd.f32 %v3330_v14, %v3280_v9 }
 0x368   :  { %v3332_v1 = vpop.f32.mrf.mxu0 }
 0x369   :  { %v13186_v5 = vadd.f32 %v3332_v1, %v3282_v32 }
 0x36a   :  { %v3334_v10 = vpop.f32.mrf.mxu0 }
 0x36b   :  { %3377 = vrot.lane.b32.xlu0 %v3331_v30, %s11094_s4  ;;  %3375 = vrot.lane.b32.xlu1 %v13177_v36, %s11094_s4  ;;  %v3335_v48 = vadd.f32 %v3334_v10, %v3284_v27 }
 0x36c   :  { %v3338_v20 = vpop.f32.mrf.mxu0 }
 0x36d   :  { %v13194_v34 = vadd.f32 %v3338_v20, %v3288_v55 }
 0x36e   :  { %v3340_v26 = vpop.f32.mrf.mxu0 }
 0x36f   :  { %3362 = vrot.lane.b32.xlu0 %v13186_v5, %s11092_s7  ;;  %3397 = vrot.lane.b32.xlu1 %v3331_v30, %s11095_s23  ;;  %v3341_v63 = vadd.f32 %v3340_v26, %v3290_v49 }
 0x370   :  { %v3342_v8 = vpop.f32.mrf.mxu0 }
 0x372   :  { %v3343_v37 = vpop.f32.mrf.mxu0 }
 0x373   :  { %3381 = vrot.lane.b32.xlu0 %v3335_v48, %s11094_s4  ;;  %3350 = vrot.lane.b32.xlu1 %v13186_v5, %s11093_s8 }
 0x377   :  { %3352 = vrot.lane.b32.xlu0 %v13194_v34, %s11093_s8  ;;  %3379 = vrot.lane.b32.xlu1 %v13186_v5, %s11094_s4 }
 0x37b   :  { %3364 = vrot.lane.b32.xlu0 %v13194_v34, %s11092_s7  ;;  %3399 = vrot.lane.b32.xlu1 %v3335_v48, %s11095_s23 }
 0x37f   :  { %3383 = vrot.lane.b32.xlu0 %v13194_v34, %s11094_s4  ;;  %3385 = vrot.lane.b32.xlu1 %v3341_v63, %s11094_s4 }
 0x383   :  { %3401 = vrot.lane.b32.xlu1 %v3341_v63, %s11095_s23 }
 0x399   :  { %v3952_v23 = vpop.f32.mrf.mxu1 }
 0x39a   :  { %v3953_v7 = vadd.f32 %v3952_v23, %v3511_v18 }
 0x39b   :  { %v3954_v19 = vpop.f32.mrf.mxu1 }
 0x39c   :  { %v3955_v13 = vadd.f32 %v3954_v19, %v3515_v3 }
 0x39d   :  { %v3956_v4 = vpop.f32.mrf.mxu1 }
 0x39e   :  { %v3957_v15 = vadd.f32 %v3956_v4, %v3511_v18 }
 0x39f   :  { %v3958_v41 = vpop.f32.mrf.mxu1 }
 0x3a0   :  { %v3959_v10 = vadd.f32 %v3958_v41, %v3515_v3 }
 0x3a1   :  { %v3962_v52 = vpop.f32.mrf.mxu1 }
 0x3a2   :  { %v3963_v9 = vadd.f32 %v3962_v52, %v3511_v18 }
 0x3a3   :  { %v3964_v51 = vpop.f32.mrf.mxu1 }
 0x3a4   :  { %v4003_v46 = vpop.f32.mrf.mxu0  ;;  %v3965_v27 = vadd.f32 %v3964_v51, %v3515_v3 }
 0x3a5   :  { %v3966_v11 = vpop.f32.mrf.mxu1  ;;  %v4004_v43 = vadd.f32 %v4003_v46, %v3953_v7 }
 0x3a6   :  { %v4005_v33 = vpop.f32.mrf.mxu0 }
 0x3a7   :  { %v3967_v42 = vpop.f32.mrf.mxu1  ;;  %v4006_v45 = vadd.f32 %v4005_v33, %v3955_v13 }
 0x3a8   :  { %v4007_v61 = vpop.f32.mrf.mxu0 }
 0x3a9   :  { %v4008_v35 = vadd.f32 %v4007_v61, %v3957_v15  ;;  %v9100_v61 = vld [vmem:[%s14723_s10] ss:$0 sm:$0xff]  ;;  %s11100_s10 = smov 104  }
 0x3aa   :  { %v4009_v16 = vpop.f32.mrf.mxu0 }
 0x3ab   :  { %v4010_v25 = vadd.f32 %v4009_v16, %v3959_v10 }
 0x3ac   :  { %v4013_v50 = vpop.f32.mrf.mxu0 }
 0x3ad   :  { %v4014_v60 = vadd.f32 %v4013_v50, %v3963_v9 }
 0x3ae   :  { %v4015_v17 = vpop.f32.mrf.mxu0 }
 0x3af   :  { %v4016_v48 = vadd.f32 %v4015_v17, %v3965_v27 }
 0x3b0   :  { %v4017_v62 = vpop.f32.mrf.mxu0 }
 0x3b2   :  { %v4018_v24 = vpop.f32.mrf.mxu0 }
 0x3b9   :  { %v4054_v57 = vpop.f32.mrf.mxu1 }
 0x3ba   :  { %v13210_v40 = vadd.f32 %v4054_v57, %v4004_v43 }
 0x3bb   :  { %v4056_v29 = vpop.f32.mrf.mxu1 }
 0x3bc   :  { %4074 = vrot.lane.b32.xlu0 %v13210_v40, %s11096_s25  ;;  %4086 = vrot.lane.b32.xlu1 %v13210_v40, %s11097_s3  ;;  %v4057_v2 = vadd.f32 %v4056_v29, %v4006_v45 }
 0x3bd   :  { %v4058_v21 = vpop.f32.mrf.mxu1 }
 0x3be   :  { %v13219_v56 = vadd.f32 %v4058_v21, %v4008_v35 }
 0x3bf   :  { %v4060_v31 = vpop.f32.mrf.mxu1 }
 0x3c0   :  { %4113 = vrot.lane.b32.xlu0 %v13210_v40, %s11098_s9  ;;  %4098 = vrot.lane.b32.xlu1 %v13210_v40, %s11099_s5  ;;  %v4061_v8 = vadd.f32 %v4060_v31, %v4010_v25 }
 0x3c1   :  { %v4064_v12 = vpop.f32.mrf.mxu1 }
 0x3c2   :  { %v13227_v32 = vadd.f32 %v4064_v12, %v4014_v60 }
 0x3c3   :  { %v4066_v0 = vpop.f32.mrf.mxu1 }
 0x3c4   :  { %v9616_v22 = vpop.f32.mrf.mxu0  ;;  %4100 = vrot.lane.b32.xlu0 %v13219_v56, %s11099_s5  ;;  %4115 = vrot.lane.b32.xlu1 %v4057_v2, %s11098_s9  ;;  %v4067_v55 = vadd.f32 %v4066_v0, %v4016_v48 }
 0x3c5   :  { %v4068_v14 = vpop.f32.mrf.mxu1 }
 0x3c6   :  { %v9617_v59 = vpop.f32.mrf.mxu0 }
 0x3c7   :  { %v4069_v1 = vpop.f32.mrf.mxu1  ;;  %v9618_v11 = vadd.f32 %v9617_v59, %v9616_v22 }
 0x3c8   :  { %v9619_v30 = vpop.f32.mrf.mxu0  ;;  %4117 = vrot.lane.b32.xlu0 %v13219_v56, %s11098_s9  ;;  %4076 = vrot.lane.b32.xlu1 %v13219_v56, %s11096_s25 }
 0x3c9   :  { %v4514_v18 = vadd.f32 %v9618_v11, %v9100_v61 }
 0x3ca   :  { %v9620_v20 = vpop.f32.mrf.mxu0 }
 0x3cb   :  { %v9621_v24 = vadd.f32 %v9620_v20, %v9619_v30 }
 0x3cc   :  { %v9622_v26 = vpop.f32.mrf.mxu0  ;;  %4078 = vrot.lane.b32.xlu0 %v13227_v32, %s11096_s25  ;;  %4088 = vrot.lane.b32.xlu1 %v13219_v56, %s11097_s3 }
 0x3cd   :  { %v4517_v0 = vadd.f32 %v9621_v24, %v9100_v61 }
 0x3ce   :  { %v9623_v54 = vpop.f32.mrf.mxu0 }
 0x3cf   :  { %v9624_v16 = vadd.f32 %v9623_v54, %v9622_v26 }
 0x3d0   :  { %v9625_v37 = vpop.f32.mrf.mxu0  ;;  %4102 = vrot.lane.b32.xlu0 %v13227_v32, %s11099_s5  ;;  %4119 = vrot.lane.b32.xlu1 %v4061_v8, %s11098_s9 }
 0x3d1   :  { %v4522_v57 = vadd.f32 %v9624_v16, %v9100_v61 }
 0x3d2   :  { %v9626_v6 = vpop.f32.mrf.mxu0 }
 0x3d4   :  { %4123 = vrot.lane.b32.xlu0 %v4067_v55, %s11098_s9  ;;  %4090 = vrot.lane.b32.xlu1 %v13227_v32, %s11097_s3  ;;  %s11107_s3 = smov 96  }
 0x3d8   :  { %4121 = vrot.lane.b32.xlu1 %v13227_v32, %s11098_s9  ;;  %s11108_s9 = smov [#allocation4]  }
 0x3d9   :  { %v9644_v49 = vpop.f32.mrf.mxu1  ;;  %v3361_v63 = vpop.permute.xlu0 %3360  ;;  %s8684_s5 = sshll.u32 %s11108_s9, 4  ;;  %s8685_s5 = int_to_ptr.vmem [resolvable:$true] %s8684_s5 }
 0x3da   :  { %v3349_v23 = vpop.permute.xlu1 %3348  ;;  %p11073_p1 = scmp.lt.s32.totalorder %s8685_s5, %s8685_s5 }
 0x3db   :  { %v3357_v19 = vmax.f32 %v13177_v36, %v3349_v23  ;;  %v9645_v4 = vpop.f32.mrf.mxu1 }
 0x3dc   :  { %v9646_v17 = vadd.f32 %v9645_v4, %v9644_v49 }
 0x3dd   :  { %v3369_v41 = vmax.f32 %v3357_v19, %v3361_v63  ;;  %v9647_v52 = vpop.f32.mrf.mxu1  ;;  %v3378_v51 = vpop.permute.xlu0 %3377 }
 0x3de   :  { %v3376_v46 = vpop.permute.xlu1 %3375  ;;  %v4562_v31 = vadd.f32 %v9646_v17, %v4514_v18 }
 0x3df   :  { %v3388_v33 = vsel %vm3387_vm2, %v3376_v46, %v3378_v51  ;;  %v9648_v42 = vpop.f32.mrf.mxu1 }
 0x3e0   :  { %v3394_v50 = vmax.f32 %v3369_v41, %v3388_v33  ;;  %v9649_v21 = vadd.f32 %v9648_v42, %v9647_v52 }
 0x3e1   :  { %v9650_v44 = vpop.f32.mrf.mxu1  ;;  %v3363_v62 = vpop.permute.xlu0 %3362 }
 0x3e2   :  { %v3398_v36 = vpop.permute.xlu1 %3397  ;;  %v4565_v30 = vadd.f32 %v9649_v21, %v4517_v0 }
 0x3e3   :  { %v3406_v7 = vmax.f32 %v3394_v50, %v3398_v36  ;;  %v9651_v43 = vpop.f32.mrf.mxu1 }
 0x3e4   :  { %v9652_v3 = vadd.f32 %v9651_v43, %v9650_v44  ;;  %v9757_v29 = vpop.f32.mrf.mxu0 }
 0x3e5   :  { %v3409_v13 = vmax.f32 %v3406_v7, 0.0  ;;  %v9653_v15 = vpop.f32.mrf.mxu1  ;;  %v3382_v45 = vpop.permute.xlu0 %3381 }
 0x3e6   :  { %v4570_v35 = vadd.f32 %v9652_v3, %v4522_v57  ;;  %v4609_v12 = vpop.f32.mrf.mxu0  ;;  %v3351_v2 = vpop.permute.xlu1 %3350  ;;  %v9141_v3 = vld [vmem:[%s14724_s11] ss:$0 sm:$0xff]  ;;  %s11105_s11 = smov 64  }
 0x3e7   :  { %3413 = vst.msk [vmem:[#allocation2] sm:$0xff] %vm3412_vm3, %v3409_v13  ;;  %v13246_v22 = vadd.f32 %v4609_v12, %v4562_v31  ;;  %v3358_v14 = vmax.f32 %v13186_v5, %v3351_v2  ;;  %v9654_v9 = vpop.f32.mrf.mxu1 }
 0x3e8   :  { %v13249_v59 = vadd.f32 %v9757_v29, %v4570_v35  ;;  %v9758_v1 = vpop.f32.mrf.mxu0 }
 0x3e9   :  { %v3370_v60 = vmax.f32 %v3358_v14, %v3363_v62  ;;  %4626 = vrot.lane.b32.xlu0 %v13246_v22, %s11100_s10  ;;  %v3353_v10 = vpop.permute.xlu0 %3352 }
 0x3ea   :  { %v4612_v20 = vpop.f32.mrf.mxu0  ;;  %4630 = vrot.lane.b32.xlu1 %v13249_v59, %s11100_s10  ;;  %v3380_v25 = vpop.permute.xlu1 %3379  ;;  %v3359_v37 = vmax.f32 %v13194_v34, %v3353_v10 }
 0x3eb   :  { %v13253_v26 = vadd.f32 %v4612_v20, %v4565_v30  ;;  %v3389_v27 = vsel %vm3387_vm2, %v3380_v25, %v3382_v45 }
 0x3ec   :  { %v3395_v8 = vmax.f32 %v3370_v60, %v3389_v27 }
 0x3ed   :  { %4638 = vrot.lane.b32.xlu0 %v13246_v22, %s11101_s29  ;;  %v3365_v5 = vpop.permute.xlu0 %3364 }
 0x3ee   :  { %4628 = vrot.lane.b32.xlu1 %v13253_v26, %s11100_s10  ;;  %v3400_v54 = vpop.permute.xlu1 %3399  ;;  %v3371_v49 = vmax.f32 %v3359_v37, %v3365_v5 }
 0x3ef   :  { %v3407_v48 = vmax.f32 %v3395_v8, %v3400_v54 }
 0x3f1   :  { %v3410_v55 = vmax.f32 %v3407_v48, 0.0  ;;  %4650 = vrot.lane.b32.xlu0 %v13246_v22, %s11092_s7  ;;  %v3384_v6 = vpop.permute.xlu0 %3383 }
 0x3f2   :  { %4640 = vrot.lane.b32.xlu1 %v13253_v26, %s11101_s29  ;;  %v3386_v63 = vpop.permute.xlu1 %3385 }
 0x3f3   :  { %3414 = vst.msk [vmem:[#allocation2 + $0x20] sm:$0xff] %vm3412_vm3, %v3410_v55  ;;  %v3390_v23 = vsel %vm3387_vm2, %v3384_v6, %v3386_v63 }
 0x3f4   :  { %v3396_v19 = vmax.f32 %v3371_v49, %v3390_v23 }
 0x3f5   :  { %4642 = vrot.lane.b32.xlu0 %v13249_v59, %s11101_s29 }
 0x3f6   :  { %4652 = vrot.lane.b32.xlu1 %v13253_v26, %s11092_s7  ;;  %v3402_v34 = vpop.permute.xlu1 %3401 }
 0x3f7   :  { %v3408_v4 = vmax.f32 %v3396_v19, %v3402_v34 }
 0x3f9   :  { %v3411_v41 = vmax.f32 %v3408_v4, 0.0  ;;  %v9682_v52 = vpop.f32.mrf.mxu1  ;;  %4654 = vrot.lane.b32.xlu0 %v13249_v59, %s11092_s7 }
 0x3fb   :  { %3415 = vst.msk [vmem:[#allocation2 + $0x40] sm:$0xff] %vm3412_vm3, %v3411_v41  ;;  %v9683_v51 = vpop.f32.mrf.mxu1 }
 0x3fc   :  { %v9684_v29 = vadd.f32 %v9683_v51, %v9682_v52 }
 0x3fd   :  { %v9685_v46 = vpop.f32.mrf.mxu1  ;;  %4666 = vrot.lane.b32.xlu0 %v13249_v59, %s11102_s0 }
 0x3fe   :  { %v5052_v45 = vadd.f32 %v9684_v29, %v9141_v3 }
 0x3ff   :  { %v9686_v11 = vpop.f32.mrf.mxu1 }
 0x400   :  { %v9687_v14 = vadd.f32 %v9686_v11, %v9685_v46 }
 0x401   :  { %v9688_v33 = vpop.f32.mrf.mxu1 }
 0x402   :  { %v5055_v60 = vadd.f32 %v9687_v14, %v9141_v3  ;;  %v10463_v14 = vld [vmem:[%s14726_s13 + $0x60] ss:$8 sps:$4 sm:$0xff]  }
 0x403   :  { %v9689_v42 = vpop.f32.mrf.mxu1 }
 0x404   :  { %v9710_v61 = vpop.f32.mrf.mxu0  ;;  %v9690_v7 = vadd.f32 %v9689_v42, %v9688_v33 }
 0x405   :  { %v9691_v16 = vpop.f32.mrf.mxu1 }
 0x406   :  { %v9711_v50 = vpop.f32.mrf.mxu0  ;;  %v5060_v21 = vadd.f32 %v9690_v7, %v9141_v3  ;;  %v10462_v3 = vld [vmem:[%s14726_s13 + $0x74] ss:$8 sps:$4 sm:$0xff]  }
 0x407   :  { %v9692_v17 = vpop.f32.mrf.mxu1  ;;  %v9712_v13 = vadd.f32 %v9711_v50, %v9710_v61 }
 0x408   :  { %v9713_v44 = vpop.f32.mrf.mxu0 }
 0x409   :  { %v5100_v2 = vadd.f32 %v9712_v13, %v5052_v45  ;;  %v13321_v13 = vld [vmem:[%s14725_s12] sm:$0xff] }
 0x40a   :  { %v9714_v62 = vpop.f32.mrf.mxu0  ;;  %v10465_v45 = vld [vmem:[%s14726_s13 + $0x64] ss:$8 sps:$4 sm:$0xff]  }
 0x40b   :  { %v9715_v1 = vadd.f32 %v9714_v62, %v9713_v44 }
 0x40c   :  { %v9716_v36 = vpop.f32.mrf.mxu0 }
 0x40d   :  { %v5103_v10 = vadd.f32 %v9715_v1, %v5055_v60 }
 0x40e   :  { %v9717_v18 = vpop.f32.mrf.mxu0 }
 0x40f   :  { %v9718_v57 = vadd.f32 %v9717_v18, %v9716_v36 }
 0x410   :  { %v9719_v24 = vpop.f32.mrf.mxu0 }
 0x411   :  { %v5108_v15 = vadd.f32 %v9718_v57, %v5060_v21 }
 0x412   :  { %v9720_v43 = vpop.f32.mrf.mxu0 }
 0x413   :  { %v5233_v43 = vld [vmem:[#allocation2 + $0x40] sm:$0xff] }
 0x419   :  { %v9777_v31 = vpop.f32.mrf.mxu1 }
 0x41a   :  { %v13278_v35 = vadd.f32 %v9777_v31, %v5108_v15  ;;  %v10460_v15 = vld [vmem:[%s14726_s13 + $0x70] ss:$8 sps:$4 sm:$0xff]   ;;  %v5225_v31 = vld [vmem:[#allocation2] sm:$0xff] }
 0x41b   :  { %v5147_v12 = vpop.f32.mrf.mxu1 }
 0x41c   :  { %5168 = vrot.lane.b32.xlu0 %v13278_v35, %s11103_s20  ;;  %5192 = vrot.lane.b32.xlu1 %v13278_v35, %s11104_s26  ;;  %v13282_v9 = vadd.f32 %v5147_v12, %v5100_v2 }
 0x41d   :  { %v9778_v0 = vpop.f32.mrf.mxu1 }
 0x41e   :  { %v13336_v0 = vld [vmem:[%s14725_s12 + $0x8] sm:$0xff] }
 0x41f   :  { %v5150_v30 = vpop.f32.mrf.mxu1 }
 0x420   :  { %5180 = vrot.lane.b32.xlu0 %v13278_v35, %s11093_s8  ;;  %5164 = vrot.lane.b32.xlu1 %v13282_v9, %s11103_s20  ;;  %v13290_v20 = vadd.f32 %v5150_v30, %v5103_v10  ;;  %v13354_v30 = vld [vmem:[%s14725_s12 + $0x10] sm:$0xff] }
 0x421   :  { %v10466_v10 = vld [vmem:[%s14726_s13 + $0x50] ss:$8 sps:$4 sm:$0xff]  }
 0x424   :  { %5204 = vrot.lane.b32.xlu0 %v13278_v35, %s11092_s7  ;;  %5188 = vrot.lane.b32.xlu1 %v13282_v9, %s11104_s26 }
 0x428   :  { %5176 = vrot.lane.b32.xlu0 %v13282_v9, %s11093_s8  ;;  %5166 = vrot.lane.b32.xlu1 %v13290_v20, %s11103_s20 }
 0x42c   :  { %5178 = vrot.lane.b32.xlu0 %v13290_v20, %s11093_s8  ;;  %5190 = vrot.lane.b32.xlu1 %v13290_v20, %s11104_s26 }
 0x42e   :  { %v4075_v25 = vpop.permute.xlu0 %4074  ;;  %v4087_v27 = vpop.permute.xlu1 %4086 }
 0x42f   :  { %v4083_v8 = vmax.f32 %v13210_v40, %v4075_v25 }
 0x430   :  { %5202 = vrot.lane.b32.xlu0 %v13290_v20, %s11092_s7  ;;  %4664 = vrot.lane.b32.xlu1 %v13253_v26, %s11102_s0 }
 0x431   :  { %v4095_v5 = vmax.f32 %v4083_v8, %v4087_v27  ;;  %v10471_v27 = vld [vmem:[%s14726_s13 + $0x44] ss:$8 sps:$4 sm:$0xff]  }
 0x432   :  { %v4114_v54 = vpop.permute.xlu0 %4113  ;;  %v4099_v48 = vpop.permute.xlu1 %4098 }
 0x433   :  { %v4107_v37 = vmax.f32 %v4095_v5, %v4099_v48  ;;  %v13373_v48 = vld [vmem:[%s14725_s12 + $0x18] sm:$0xff] }
 0x434   :  { %5200 = vrot.lane.b32.xlu0 %v13282_v9, %s11092_s7  ;;  %4662 = vrot.lane.b32.xlu1 %v13246_v22, %s11102_s0 }
 0x436   :  { %v4101_v55 = vpop.permute.xlu0 %4100  ;;  %v4116_v6 = vpop.permute.xlu1 %4115 }
 0x437   :  { %v4126_v40 = vsel %vm4125_vm4, %v4114_v54, %v4116_v6  ;;  %v10469_v54 = vld [vmem:[%s14726_s13 + $0x40] ss:$8 sps:$4 sm:$0xff]  }
 0x438   :  { %v4132_v49 = vmax.f32 %v4107_v37, %v4126_v40  ;;  %v10474_v37 = vld [vmem:[%s14726_s13 + $0x34] ss:$8 sps:$4 sm:$0xff]   ;;  %v10472_v40 = vld [vmem:[%s14726_s13 + $0x30] ss:$8 sps:$4 sm:$0xff]  }
 0x43a   :  { %v4135_v63 = vmax.f32 %v4132_v49, 0.0  ;;  %v4118_v23 = vpop.permute.xlu0 %4117  ;;  %v4077_v19 = vpop.permute.xlu1 %4076  ;;  %v13388_v49 = vld [vmem:[%s14725_s12 + $0x20] sm:$0xff] }
 0x43b   :  { %v4084_v34 = vmax.f32 %v13219_v56, %v4077_v19 }
 0x43c   :  { %4139 = vst.msk [vmem:[#allocation2 + $0x8] sm:$0xff] %vm4138_vm5, %v4135_v63 }
 0x43e   :  { %v4079_v4 = vpop.permute.xlu0 %4078  ;;  %v4089_v41 = vpop.permute.xlu1 %4088 }
 0x43f   :  { %v4096_v52 = vmax.f32 %v4084_v34, %v4089_v41  ;;  %v4085_v61 = vmax.f32 %v13227_v32, %v4079_v4  ;;  %v5229_v32 = vld [vmem:[#allocation2 + $0x20] sm:$0xff]  ;;  %v10480_v41 = vld [vmem:[%s14726_s13 + $0x14] ss:$8 sps:$4 sm:$0xff]  }
 0x440   :  { %v10475_v34 = vld [vmem:[%s14726_s13 + $0x20] ss:$8 sps:$4 sm:$0xff]  }
 0x441   :  { %v4108_v51 = vmax.f32 %v4096_v52, %v4101_v55 }
 0x442   :  { %v4120_v46 = vpop.permute.xlu1 %4119  ;;  %v4103_v33 = vpop.permute.xlu0 %4102 }
 0x443   :  { %v4127_v11 = vsel %vm4125_vm4, %v4118_v23, %v4120_v46  ;;  %v5226_v21 = vld [vmem:[#allocation2 + $0x8] sm:$0xff] }
 0x444   :  { %v4133_v42 = vmax.f32 %v4108_v51, %v4127_v11  ;;  %v10478_v51 = vld [vmem:[%s14726_s13 + $0x10] ss:$8 sps:$4 sm:$0xff]   ;;  %v10483_v46 = vld [vmem:[%s14726_s13 + $0x4] ss:$8 sps:$4 sm:$0xff]   ;;  %v10481_v11 = vld [vmem:[%s14726_s13] ss:$8 sps:$4 sm:$0xff]  }
 0x446   :  { %v4136_v16 = vmax.f32 %v4133_v42, 0.0  ;;  %v4091_v50 = vpop.permute.xlu1 %4090  ;;  %v4124_v62 = vpop.permute.xlu0 %4123  ;;  %v10484_v42 = vld [vmem:[%s14726_s13 + $0xf0] ss:$8 sps:$4 sm:$0xff]  }
 0x447   :  { %v4097_v17 = vmax.f32 %v4085_v61, %v4091_v50  ;;  %v10489_v61 = vld [vmem:[%s14726_s13 + $0xe4] ss:$8 sps:$4 sm:$0xff]   ;;  %v10487_v50 = vld [vmem:[%s14726_s13 + $0xe0] ss:$8 sps:$4 sm:$0xff]  }
 0x448   :  { %4140 = vst.msk [vmem:[#allocation2 + $0x28] sm:$0xff] %vm4138_vm5, %v4136_v16 }
 0x449   :  { %v4109_v44 = vmax.f32 %v4097_v17, %v4103_v33  ;;  %v10486_v33 = vld [vmem:[%s14726_s13 + $0xf4] ss:$8 sps:$4 sm:$0xff]  }
 0x44a   :  { %v4122_v36 = vpop.permute.xlu1 %4121  ;;  %v10492_v17 = vld [vmem:[%s14726_s13 + $0xd4] ss:$8 sps:$4 sm:$0xff]  }
 0x44b   :  { %v4128_v56 = vsel %vm4125_vm4, %v4122_v36, %v4124_v62  ;;  %v10495_v36 = vld [vmem:[%s14726_s13 + $0xc4] ss:$8 sps:$4 sm:$0xff]  }
 0x44c   :  { %v4134_v18 = vmax.f32 %v4109_v44, %v4128_v56  ;;  %v10490_v44 = vld [vmem:[%s14726_s13 + $0xd0] ss:$8 sps:$4 sm:$0xff]   ;;  %v10493_v56 = vld [vmem:[%s14726_s13 + $0xc0] ss:$8 sps:$4 sm:$0xff]  }
 0x44e   :  { %v4137_v24 = vmax.f32 %v4134_v18, 0.0  ;;  %v10498_v18 = vld [vmem:[%s14726_s13 + $0xb4] ss:$8 sps:$4 sm:$0xff]  }
 0x44f   :  { %v5230_v57 = vld [vmem:[#allocation2 + $0x28] sm:$0xff] }
 0x450   :  { %4141 = vst.msk [vmem:[#allocation2 + $0x48] sm:$0xff] %vm4138_vm5, %v4137_v24 }
 0x457   :  { %v5234_v7 = vld [vmem:[#allocation2 + $0x48] sm:$0xff] }
 0x458   :  { %5281 = vmatprep.subr.mxu1 %v5234_v7  ;;  %v10496_v7 = vld [vmem:[%s14726_s13 + $0xb0] ss:$8 sps:$4 sm:$0xff]  }
 0x459   :  { %5282 = vmatpush1.msra.mxu1 %v5233_v43  ;;  %v10501_v43 = vld [vmem:[%s14726_s13 + $0xa4] ss:$8 sps:$4 sm:$0xff]  }
 0x45a   :  { %5283 = vmatprep.subr.mxu1 %v5230_v57 }
 0x45b   :  { %v4627_v29 = vpop.permute.xlu0 %4626  ;;  %5284 = vmatpush1.msra.mxu1 %v5229_v32 }
 0x45c   :  { %5285 = vmatprep.subr.mxu1 %v5226_v21  ;;  %v4635_v12 = vmax.f32 %v13246_v22, %v4627_v29  ;;  %v10468_v22 = vld [vmem:[%s14726_s13 + $0x54] ss:$8 sps:$4 sm:$0xff]   ;;  %v4631_v8 = vpop.permute.xlu1 %4630 }
 0x45d   :  { %5286 = vmatpush1.msra.mxu1 %v5225_v31  ;;  %v4637_v55 = vmax.f32 %v13249_v59, %v4631_v8  ;;  %v10477_v59 = vld [vmem:[%s14726_s13 + $0x24] ss:$8 sps:$4 sm:$0xff]   ;;  %v10504_v29 = vld [vmem:[%s14726_s13 + $0x94] ss:$8 sps:$4 sm:$0xff]  }
 0x45e   :  { %9182 = vmatmul.mubr.msk.f32.vlgmr.msra.gmra.mxu1 %vm1980_vm1, %v13321_v13  ;;  %7845 = vmatprep.subr.bf16.mxu1 %v10462_v3  ;;  %v10499_v3 = vld [vmem:[%s14726_s13 + $0xa0] ss:$8 sps:$4 sm:$0xff]  }
 0x45f   :  { %v4639_v2 = vpop.permute.xlu0 %4638  ;;  %5325 = vmatprep.mubr.f32.mxu1 %v13163_v53  ;;  %7846 = vmatpush1.bf16.msra.mxu1 %v10460_v15 }
 0x460   :  { %v13341_v1 = vmax.f32 %v4635_v12, %v4639_v2  ;;  %7847 = vmatprep.subr.bf16.mxu1 %v10465_v45  ;;  %v4629_v16 = vpop.permute.xlu1 %4628  ;;  %v10502_v12 = vld [vmem:[%s14726_s13 + $0x90] ss:$8 sps:$4 sm:$0xff]  }
 0x462   :  { %9183 = vmatmul.mubr.msk.f32.gmra.mxu1 %vm1980_vm1, %v13336_v0 }
 0x463   :  { %v13348_v60 = vpop.permute.xlu0 %4650  ;;  %5331 = vmatprep.mubr.f32.mxu1 %v13163_v53  ;;  %7848 = vmatpush1.bf16.msra.mxu1 %v10463_v14 }
 0x464   :  { %v4659_v25 = vmax.f32 %v13341_v1, %v13348_v60  ;;  %7849 = vmatprep.subr.bf16.mxu1 %v10468_v22  ;;  %v4641_v62 = vpop.permute.xlu1 %4640  ;;  %v10526_v1 = vld [vmem:[%s14726_s13 + $0x170] ss:$8 sps:$4 sm:$0xff]   ;;  %v10528_v60 = vld [vmem:[%s14726_s13 + $0x174] ss:$8 sps:$4 sm:$0xff]  }
 0x466   :  { %9184 = vmatmul.mubr.msk.f32.gmra.mxu1 %vm1980_vm1, %v13354_v30 }
 0x467   :  { %v4643_v5 = vpop.permute.xlu0 %4642  ;;  %7850 = vmatpush1.bf16.msra.mxu1 %v10466_v10  ;;  %5337 = vmatprep.mubr.f32.mxu1 %v13163_v53 }
 0x468   :  { %7851 = vmatprep.subr.bf16.mxu1 %v10471_v27  ;;  %v4649_v63 = vmax.f32 %v4637_v55, %v4643_v5  ;;  %v4653_v24 = vpop.permute.xlu1 %4652 }
 0x46a   :  { %9185 = vmatmul.mubr.msk.f32.gmra.mxu1 %vm1980_vm1, %v13373_v48 }
 0x46b   :  { %v4655_v6 = vpop.permute.xlu0 %4654  ;;  %7852 = vmatpush1.bf16.msra.mxu1 %v10469_v54  ;;  %5343 = vmatprep.mubr.f32.mxu1 %v13163_v53 }
 0x46c   :  { %7853 = vmatprep.subr.bf16.mxu1 %v10474_v37  ;;  %v4661_v23 = vmax.f32 %v4649_v63, %v4655_v6  ;;  %v10507_v6 = vld [vmem:[%s14726_s13 + $0x84] ss:$8 sps:$4 sm:$0xff]  }
 0x46e   :  { %9186 = vmatmul.mubr.msk.f32.gmra.mxu1 %vm1980_vm1, %v13388_v49 }
 0x46f   :  { %v4667_v19 = vpop.permute.xlu0 %4666  ;;  %7854 = vmatpush1.bf16.msra.mxu1 %v10472_v40  ;;  %5349 = vmatprep.mubr.f32.mxu1 %v13163_v53 }
 0x470   :  { %v4673_v4 = vmax.f32 %v4661_v23, %v4667_v19  ;;  %7855 = vmatprep.subr.bf16.mxu1 %v10477_v59  ;;  %v10505_v23 = vld [vmem:[%s14726_s13 + $0x80] ss:$8 sps:$4 sm:$0xff]  }
 0x472   :  { %v4676_v52 = vmax.f32 %v4673_v4, 0.0 }
 0x473   :  { %7856 = vmatpush1.bf16.msra.mxu1 %v10475_v34 }
 0x474   :  { %4679 = vst.msk [vmem:[#allocation2 + $0x50] sm:$0xff] %vm1980_vm1, %v4676_v52  ;;  %7857 = vmatprep.subr.bf16.mxu1 %v10480_v41  ;;  %v10510_v52 = vld [vmem:[%s14726_s13 + $0x274] ss:$8 sps:$4 sm:$0xff]  }
 0x477   :  { %7858 = vmatpush1.bf16.msra.mxu1 %v10478_v51 }
 0x478   :  { %7859 = vmatprep.subr.bf16.mxu1 %v10483_v46 }
 0x47b   :  { %7860 = vmatpush1.bf16.msra.mxu1 %v10481_v11  ;;  %v5235_v11 = vld [vmem:[#allocation2 + $0x50] sm:$0xff] }
 0x47c   :  { %7861 = vmatprep.subr.bf16.mxu1 %v10486_v33 }
 0x47f   :  { %7862 = vmatpush2.bf16.msra.mxu1 %v10484_v42 }
 0x480   :  { %7863 = vmatprep.subr.bf16.mxu1 %v10489_v61 }
 0x483   :  { %7864 = vmatpush2.bf16.msra.mxu1 %v10487_v50 }
 0x484   :  { %7865 = vmatprep.subr.bf16.mxu1 %v10492_v17 }
 0x487   :  { %7866 = vmatpush2.bf16.msra.mxu1 %v10490_v44 }
 0x488   :  { %7867 = vmatprep.subr.bf16.mxu1 %v10495_v36 }
 0x48b   :  { %7868 = vmatpush2.bf16.msra.mxu1 %v10493_v56 }
 0x48c   :  { %7869 = vmatprep.subr.bf16.mxu1 %v10498_v18 }
 0x48e   :  { %v5169_v57 = vpop.permute.xlu0 %5168  ;;  %v5193_v32 = vpop.permute.xlu1 %5192 }
 0x48f   :  { %7870 = vmatpush2.bf16.msra.mxu1 %v10496_v7  ;;  %v5175_v21 = vmax.f32 %v13278_v35, %v5169_v57  ;;  %v4636_v35 = vmax.f32 %v13253_v26, %v4629_v16  ;;  %v13468_v26 = vld [vmem:[%s14725_s12 + $0x28] sm:$0xff] }
 0x490   :  { %7871 = vmatprep.subr.bf16.mxu1 %v10501_v43  ;;  %9187 = vmatmul.mubr.msk.f32.gmra.mxu1 %vm1980_vm1, %v13468_v26  ;;  %v10544_v43 = vld [vmem:[%s14726_s13 + $0x140] ss:$8 sps:$4 sm:$0xff]   ;;  %v10546_v57 = vld [vmem:[%s14726_s13 + $0x144] ss:$8 sps:$4 sm:$0xff]  }
 0x491   :  { %v4648_v40 = vmax.f32 %v4636_v35, %v4641_v62  ;;  %v10600_v35 = vld [vmem:[%s14726_s13 + $0x1b4] ss:$8 sps:$4 sm:$0xff]  }
 0x492   :  { %v5181_v15 = vpop.permute.xlu0 %5180  ;;  %v5165_v31 = vpop.permute.xlu1 %5164 }
 0x493   :  { %v5187_v45 = vmax.f32 %v5175_v21, %v5181_v15  ;;  %7872 = vmatpush2.bf16.msra.mxu1 %v10499_v3  ;;  %v5173_v63 = vmax.f32 %v13282_v9, %v5165_v31  ;;  %v10558_v3 = vld [vmem:[%s14726_s13 + $0x124] ss:$8 sps:$4 sm:$0xff]   ;;  %v10564_v21 = vld [vmem:[%s14726_s13 + $0x114] ss:$8 sps:$4 sm:$0xff]   ;;  %v10568_v15 = vld [vmem:[%s14726_s13 + $0x100] ss:$8 sps:$4 sm:$0xff]  }
 0x494   :  { %7873 = vmatprep.subr.bf16.mxu1 %v10504_v29  ;;  %v10562_v29 = vld [vmem:[%s14726_s13 + $0x110] ss:$8 sps:$4 sm:$0xff]   ;;  %v10570_v31 = vld [vmem:[%s14726_s13 + $0x104] ss:$8 sps:$4 sm:$0xff]  }
 0x495   :  { %v5199_v2 = vmax.f32 %v5187_v45, %v5193_v32  ;;  %v10552_v32 = vld [vmem:[%s14726_s13 + $0x134] ss:$8 sps:$4 sm:$0xff]   ;;  %v10574_v45 = vld [vmem:[%s14726_s13 + $0x1f0] ss:$8 sps:$4 sm:$0xff]  }
 0x496   :  { %v5205_v14 = vpop.permute.xlu0 %5204  ;;  %v5189_v22 = vpop.permute.xlu1 %5188 }
 0x497   :  { %v5211_v10 = vmax.f32 %v5199_v2, %v5205_v14  ;;  %7874 = vmatpush2.bf16.msra.mxu1 %v10502_v12  ;;  %v10576_v12 = vld [vmem:[%s14726_s13 + $0x1f4] ss:$8 sps:$4 sm:$0xff]   ;;  %v10580_v2 = vld [vmem:[%s14726_s13 + $0x1e0] ss:$8 sps:$4 sm:$0xff]   ;;  %v10582_v14 = vld [vmem:[%s14726_s13 + $0x1e4] ss:$8 sps:$4 sm:$0xff]  }
 0x498   :  { %7875 = vmatprep.subr.bf16.mxu1 %v10507_v6  ;;  %v10612_v6 = vld [vmem:[%s14726_s13 + $0x194] ss:$8 sps:$4 sm:$0xff]  }
 0x499   :  { %v5214_v27 = vmax.f32 %v5211_v10, 0.0  ;;  %v10588_v10 = vld [vmem:[%s14726_s13 + $0x1d4] ss:$8 sps:$4 sm:$0xff]  }
 0x49a   :  { %v5177_v8 = vpop.permute.xlu0 %5176  ;;  %v5167_v5 = vpop.permute.xlu1 %5166 }
 0x49b   :  { %5218 = vst.msk [vmem:[#allocation2 + $0x58] sm:$0xff] %vm5215_vm6, %v5214_v27  ;;  %v5174_v54 = vmax.f32 %v13290_v20, %v5167_v5  ;;  %v4660_v20 = vmax.f32 %v4648_v40, %v4653_v24  ;;  %v5185_v19 = vmax.f32 %v5173_v63, %v5177_v8  ;;  %7876 = vmatpush2.bf16.msra.mxu1 %v10505_v23  ;;  %v10592_v27 = vld [vmem:[%s14726_s13 + $0x1c0] ss:$8 sps:$4 sm:$0xff]   ;;  %v10594_v8 = vld [vmem:[%s14726_s13 + $0x1c4] ss:$8 sps:$4 sm:$0xff]  }
 0x49c   :  { %7927 = vmatprep.subr.bf16.mxu1 %v10510_v52  ;;  %v10598_v5 = vld [vmem:[%s14726_s13 + $0x1b0] ss:$8 sps:$4 sm:$0xff]   ;;  %v10618_v40 = vld [vmem:[%s14726_s13 + $0x184] ss:$8 sps:$4 sm:$0xff]   ;;  %v10616_v63 = vld [vmem:[%s14726_s13 + $0x180] ss:$8 sps:$4 sm:$0xff]  }
 0x49d   :  { %v5197_v61 = vmax.f32 %v5185_v19, %v5189_v22  ;;  %v10586_v22 = vld [vmem:[%s14726_s13 + $0x1d0] ss:$8 sps:$4 sm:$0xff]   ;;  %v10511_v52 = vld [vmem:[%s14726_s13 + $0x260] ss:$8 sps:$4 sm:$0xff]  }
 0x49e   :  { %v5179_v37 = vpop.permute.xlu0 %5178  ;;  %v5191_v55 = vpop.permute.xlu1 %5190 }
 0x49f   :  { %v5186_v59 = vmax.f32 %v5174_v54, %v5179_v37  ;;  %v10604_v54 = vld [vmem:[%s14726_s13 + $0x1a0] ss:$8 sps:$4 sm:$0xff]   ;;  %v10606_v37 = vld [vmem:[%s14726_s13 + $0x1a4] ss:$8 sps:$4 sm:$0xff]  }
 0x4a1   :  { %v5198_v34 = vmax.f32 %v5186_v59, %v5191_v55  ;;  %v10610_v55 = vld [vmem:[%s14726_s13 + $0x190] ss:$8 sps:$4 sm:$0xff]   ;;  %v10624_v59 = vld [vmem:[%s14726_s13 + $0x374] ss:$8 sps:$4 sm:$0xff]  }
 0x4a2   :  { %v5203_v4 = vpop.permute.xlu0 %5202  ;;  %v4665_v41 = vpop.permute.xlu1 %4664  ;;  %v5236_v9 = vld [vmem:[#allocation2 + $0x58] sm:$0xff] }
 0x4a3   :  { %v5210_v51 = vmax.f32 %v5198_v34, %v5203_v4  ;;  %v4672_v46 = vmax.f32 %v4660_v20, %v4665_v41  ;;  %5382 = vmatprep.subr.mxu0 %v5236_v9  ;;  %v10508_v34 = vld [vmem:[%s14726_s13 + $0x270] ss:$8 sps:$4 sm:$0xff]   ;;  %v10513_v4 = vld [vmem:[%s14726_s13 + $0x264] ss:$8 sps:$4 sm:$0xff]  }
 0x4a4   :  { %5383 = vmatpush1.msra.mxu0 %v5235_v11  ;;  %v10514_v11 = vld [vmem:[%s14726_s13 + $0x250] ss:$8 sps:$4 sm:$0xff]  }
 0x4a5   :  { %v5213_v33 = vmax.f32 %v5210_v51, 0.0  ;;  %v4675_v42 = vmax.f32 %v4672_v46, 0.0  ;;  %v10516_v46 = vld [vmem:[%s14726_s13 + $0x254] ss:$8 sps:$4 sm:$0xff]  }
 0x4a6   :  { %v5201_v16 = vpop.permute.xlu0 %5200  ;;  %v4663_v50 = vpop.permute.xlu1 %4662 }
 0x4a7   :  { %5217 = vst.msk [vmem:[#allocation2 + $0x38] sm:$0xff] %vm5215_vm6, %v5213_v33  ;;  %v5209_v17 = vmax.f32 %v5197_v61, %v5201_v16  ;;  %v4671_v44 = vmax.f32 %v4659_v25, %v4663_v50  ;;  %v10538_v25 = vld [vmem:[%s14726_s13 + $0x150] ss:$8 sps:$4 sm:$0xff]   ;;  %v10519_v33 = vld [vmem:[%s14726_s13 + $0x244] ss:$8 sps:$4 sm:$0xff]  }
 0x4a8   :  { %4678 = vst.msk [vmem:[#allocation2 + $0x30] sm:$0xff] %vm1980_vm1, %v4675_v42  ;;  %v10517_v42 = vld [vmem:[%s14726_s13 + $0x240] ss:$8 sps:$4 sm:$0xff]   ;;  %v10522_v61 = vld [vmem:[%s14726_s13 + $0x234] ss:$8 sps:$4 sm:$0xff]  }
 0x4a9   :  { %v5212_v62 = vmax.f32 %v5209_v17, 0.0  ;;  %v4674_v36 = vmax.f32 %v4671_v44, 0.0  ;;  %v10520_v16 = vld [vmem:[%s14726_s13 + $0x230] ss:$8 sps:$4 sm:$0xff]   ;;  %v10525_v50 = vld [vmem:[%s14726_s13 + $0x224] ss:$8 sps:$4 sm:$0xff]  }
 0x4aa   :  { %v10523_v17 = vld [vmem:[%s14726_s13 + $0x220] ss:$8 sps:$4 sm:$0xff]   ;;  %v10531_v44 = vld [vmem:[%s14726_s13 + $0x214] ss:$8 sps:$4 sm:$0xff]  }
 0x4ab   :  { %5216 = vst.msk [vmem:[#allocation2 + $0x18] sm:$0xff] %vm5215_vm6, %v5212_v62  ;;  %v10529_v62 = vld [vmem:[%s14726_s13 + $0x210] ss:$8 sps:$4 sm:$0xff]  }
 0x4ac   :  { %4677 = vst.msk [vmem:[#allocation2 + $0x10] sm:$0xff] %vm1980_vm1, %v4674_v36  ;;  %v10537_v36 = vld [vmem:[%s14726_s13 + $0x204] ss:$8 sps:$4 sm:$0xff]  }
 0x4ae   :  { %v5232_v56 = vld [vmem:[#allocation2 + $0x38] sm:$0xff] }
 0x4af   :  { %v5231_v18 = vld [vmem:[#allocation2 + $0x30] sm:$0xff]  ;;  %5384 = vmatprep.subr.mxu0 %v5232_v56  ;;  %v10535_v56 = vld [vmem:[%s14726_s13 + $0x200] ss:$8 sps:$4 sm:$0xff]  }
 0x4b0   :  { %5385 = vmatpush1.msra.mxu0 %v5231_v18  ;;  %v10543_v18 = vld [vmem:[%s14726_s13 + $0x2f4] ss:$8 sps:$4 sm:$0xff]  }
 0x4b2   :  { %v5228_v24 = vld [vmem:[#allocation2 + $0x18] sm:$0xff] }
 0x4b3   :  { %v5227_v7 = vld [vmem:[#allocation2 + $0x10] sm:$0xff]  ;;  %5386 = vmatprep.subr.mxu0 %v5228_v24 }
 0x4b4   :  { %5387 = vmatpush1.msra.mxu0 %v5227_v7  ;;  %v10541_v24 = vld [vmem:[%s14726_s13 + $0x2f0] ss:$8 sps:$4 sm:$0xff]   ;;  %v10549_v7 = vld [vmem:[%s14726_s13 + $0x2e4] ss:$8 sps:$4 sm:$0xff]  }
 0x4b5   :  { %9188 = vmatmul.mubr.msk.f32.vlgmr.msra.gmra.mxu0 %vm1980_vm1, %v13321_v13  ;;  %7886 = vmatprep.subr.bf16.mxu0 %v10528_v60  ;;  %v10532_v13 = vld [vmem:[%s14726_s13 + $0x160] ss:$8 sps:$4 sm:$0xff]   ;;  %v10555_v60 = vld [vmem:[%s14726_s13 + $0x2d4] ss:$8 sps:$4 sm:$0xff]  }
 0x4b6   :  { %5426 = vmatprep.mubr.f32.mxu0 %v13163_v53  ;;  %7887 = vmatpush1.bf16.msra.mxu0 %v10526_v1  ;;  %v10547_v1 = vld [vmem:[%s14726_s13 + $0x2e0] ss:$8 sps:$4 sm:$0xff]  }
 0x4b9   :  { %9189 = vmatmul.mubr.msk.f32.gmra.mxu0 %vm1980_vm1, %v13336_v0  ;;  %v10534_v0 = vld [vmem:[%s14726_s13 + $0x164] ss:$8 sps:$4 sm:$0xff]  }
 0x4ba   :  { %5432 = vmatprep.mubr.f32.mxu0 %v13163_v53  ;;  %7888 = vmatprep.subr.bf16.mxu0 %v10534_v0  ;;  %v10561_v0 = vld [vmem:[%s14726_s13 + $0x2c4] ss:$8 sps:$4 sm:$0xff]  }
 0x4bb   :  { %7889 = vmatpush1.bf16.msra.mxu0 %v10532_v13  ;;  %v10553_v13 = vld [vmem:[%s14726_s13 + $0x2d0] ss:$8 sps:$4 sm:$0xff]  }
 0x4bd   :  { %9190 = vmatmul.mubr.msk.f32.gmra.mxu0 %vm1980_vm1, %v13354_v30  ;;  %v10540_v30 = vld [vmem:[%s14726_s13 + $0x154] ss:$8 sps:$4 sm:$0xff]  }
 0x4be   :  { %5438 = vmatprep.mubr.f32.mxu0 %v13163_v53  ;;  %7890 = vmatprep.subr.bf16.mxu0 %v10540_v30  ;;  %v10567_v30 = vld [vmem:[%s14726_s13 + $0x2b4] ss:$8 sps:$4 sm:$0xff]  }
 0x4bf   :  { %7891 = vmatpush1.bf16.msra.mxu0 %v10538_v25  ;;  %v10559_v25 = vld [vmem:[%s14726_s13 + $0x2c0] ss:$8 sps:$4 sm:$0xff]  }
 0x4c0   :  { %7892 = vmatprep.subr.bf16.mxu0 %v10546_v57  ;;  %v10573_v57 = vld [vmem:[%s14726_s13 + $0x2a4] ss:$8 sps:$4 sm:$0xff]  }
 0x4c1   :  { %9191 = vmatmul.mubr.msk.f32.gmra.mxu0 %vm1980_vm1, %v13373_v48  ;;  %v10550_v48 = vld [vmem:[%s14726_s13 + $0x130] ss:$8 sps:$4 sm:$0xff]  }
 0x4c2   :  { %5444 = vmatprep.mubr.f32.mxu0 %v13163_v53 }
 0x4c3   :  { %7893 = vmatpush1.bf16.msra.mxu0 %v10544_v43  ;;  %v10565_v43 = vld [vmem:[%s14726_s13 + $0x2b0] ss:$8 sps:$4 sm:$0xff]  }
 0x4c4   :  { %7894 = vmatprep.subr.bf16.mxu0 %v10552_v32  ;;  %v10579_v32 = vld [vmem:[%s14726_s13 + $0x294] ss:$8 sps:$4 sm:$0xff]  }
 0x4c5   :  { %9192 = vmatmul.mubr.msk.f32.gmra.mxu0 %vm1980_vm1, %v13388_v49  ;;  %v10556_v49 = vld [vmem:[%s14726_s13 + $0x120] ss:$8 sps:$4 sm:$0xff]  }
 0x4c6   :  { %5450 = vmatprep.mubr.f32.mxu0 %v13163_v53 }
 0x4c7   :  { %7895 = vmatpush1.bf16.msra.mxu0 %v10550_v48  ;;  %v10571_v48 = vld [vmem:[%s14726_s13 + $0x2a0] ss:$8 sps:$4 sm:$0xff]  }
 0x4c8   :  { %7896 = vmatprep.subr.bf16.mxu0 %v10558_v3  ;;  %v10585_v3 = vld [vmem:[%s14726_s13 + $0x284] ss:$8 sps:$4 sm:$0xff]  }
 0x4c9   :  { %9193 = vmatmul.mubr.msk.f32.gmra.mxu0 %vm1980_vm1, %v13468_v26 }
 0x4cb   :  { %7897 = vmatpush1.bf16.msra.mxu0 %v10556_v49  ;;  %v10577_v49 = vld [vmem:[%s14726_s13 + $0x290] ss:$8 sps:$4 sm:$0xff]  }
 0x4cc   :  { %7898 = vmatprep.subr.bf16.mxu0 %v10564_v21  ;;  %v10583_v21 = vld [vmem:[%s14726_s13 + $0x280] ss:$8 sps:$4 sm:$0xff]  }
 0x4cf   :  { %7899 = vmatpush1.bf16.msra.mxu0 %v10562_v29 }
 0x4d0   :  { %7900 = vmatprep.subr.bf16.mxu0 %v10570_v31 }
 0x4d3   :  { %7901 = vmatpush1.bf16.msra.mxu0 %v10568_v15  ;;  %v10591_v15 = vld [vmem:[%s14726_s13 + $0x474] ss:$8 sps:$4 sm:$0xff]  }
 0x4d4   :  { %7902 = vmatprep.subr.bf16.mxu0 %v10576_v12  ;;  %v10589_v12 = vld [vmem:[%s14726_s13 + $0x470] ss:$8 sps:$4 sm:$0xff]  }
 0x4d7   :  { %7903 = vmatpush2.bf16.msra.mxu0 %v10574_v45 }
 0x4d8   :  { %7904 = vmatprep.subr.bf16.mxu0 %v10582_v14  ;;  %v10597_v14 = vld [vmem:[%s14726_s13 + $0x464] ss:$8 sps:$4 sm:$0xff]  }
 0x4db   :  { %7905 = vmatpush2.bf16.msra.mxu0 %v10580_v2 }
 0x4dc   :  { %7906 = vmatprep.subr.bf16.mxu0 %v10588_v10  ;;  %v10603_v10 = vld [vmem:[%s14726_s13 + $0x454] ss:$8 sps:$4 sm:$0xff]  }
 0x4df   :  { %7907 = vmatpush2.bf16.msra.mxu0 %v10586_v22  ;;  %v10595_v22 = vld [vmem:[%s14726_s13 + $0x460] ss:$8 sps:$4 sm:$0xff]  }
 0x4e0   :  { %7908 = vmatprep.subr.bf16.mxu0 %v10594_v8  ;;  %v10609_v8 = vld [vmem:[%s14726_s13 + $0x444] ss:$8 sps:$4 sm:$0xff]  }
 0x4e3   :  { %7909 = vmatpush2.bf16.msra.mxu0 %v10592_v27  ;;  %v10601_v27 = vld [vmem:[%s14726_s13 + $0x450] ss:$8 sps:$4 sm:$0xff]  }
 0x4e4   :  { %7910 = vmatprep.subr.bf16.mxu0 %v10600_v35  ;;  %v10615_v35 = vld [vmem:[%s14726_s13 + $0x434] ss:$8 sps:$4 sm:$0xff]  }
 0x4e7   :  { %7911 = vmatpush2.bf16.msra.mxu0 %v10598_v5  ;;  %v10607_v5 = vld [vmem:[%s14726_s13 + $0x440] ss:$8 sps:$4 sm:$0xff]  }
 0x4e8   :  { %7912 = vmatprep.subr.bf16.mxu0 %v10606_v37  ;;  %v10621_v37 = vld [vmem:[%s14726_s13 + $0x424] ss:$8 sps:$4 sm:$0xff]  }
 0x4eb   :  { %7913 = vmatpush2.bf16.msra.mxu0 %v10604_v54  ;;  %v10613_v54 = vld [vmem:[%s14726_s13 + $0x430] ss:$8 sps:$4 sm:$0xff]  }
 0x4ec   :  { %7914 = vmatprep.subr.bf16.mxu0 %v10612_v6  ;;  %v10619_v6 = vld [vmem:[%s14726_s13 + $0x420] ss:$8 sps:$4 sm:$0xff]  }
 0x4ef   :  { %7915 = vmatpush2.bf16.msra.mxu0 %v10610_v55 }
 0x4f0   :  { %7916 = vmatprep.subr.bf16.mxu0 %v10618_v40  ;;  %v10627_v40 = vld [vmem:[%s14726_s13 + $0x414] ss:$8 sps:$4 sm:$0xff]  }
 0x4f3   :  { %7917 = vmatpush2.bf16.msra.mxu0 %v10616_v63 }
 0x4f4   :  { %7968 = vmatprep.subr.bf16.mxu0 %v10624_v59 }
 0x51e   :  { %v5321_v23 = vpop.f32.mrf.mxu1 }
 0x51f   :  { %v5505_v26 = vpack.c.bf16 %v5321_v23, %v5321_v23  ;;  %v10622_v23 = vld [vmem:[%s14726_s13 + $0x370] ss:$8 sps:$4 sm:$0xff]  }
 0x520   :  { %v5323_v20 = vpop.f32.mrf.mxu1 }
 0x521   :  { %v5506_v19 = vpack.c.bf16 %v5323_v20, %v5323_v20  ;;  %v10625_v20 = vld [vmem:[%s14726_s13 + $0x410] ss:$8 sps:$4 sm:$0xff]  }
 0x522   :  { %v13604_v41 = vpop.f32.mrf.mxu1 }
 0x523   :  { %7877 = vmatprep.mubr.bf16.mxu1 %v5506_v19  ;;  %v5509_v45 = vpack.c.bf16 %v13604_v41, %v13604_v41  ;;  %v10630_v19 = vld [vmem:[%s14726_s13 + $0x364] ss:$8 sps:$4 sm:$0xff]  }
 0x524   :  { %7878 = vmatmul.mubr.bf16.vlgmr.msra.gmra.mxu1 %v5505_v26  ;;  %v5329_v9 = vpop.f32.mrf.mxu1 }
 0x525   :  { %7928 = vmatpush1.bf16.msra.mxu1 %v10508_v34  ;;  %v5510_v51 = vpack.c.bf16 %v5329_v9, %v5329_v9  ;;  %v10628_v9 = vld [vmem:[%s14726_s13 + $0x360] ss:$8 sps:$4 sm:$0xff]  }
 0x526   :  { %7929 = vmatprep.subr.bf16.mxu1 %v10513_v4  ;;  %v13690_v29 = vpop.f32.mrf.mxu1  ;;  %v10633_v4 = vld [vmem:[%s14726_s13 + $0x404] ss:$8 sps:$4 sm:$0xff]  }
 0x527   :  { %7959 = vmatprep.mubr.bf16.mxu1 %v5510_v51  ;;  %v10631_v51 = vld [vmem:[%s14726_s13 + $0x400] ss:$8 sps:$4 sm:$0xff]  }
 0x528   :  { %v5335_v31 = vpop.f32.mrf.mxu1 }
 0x529   :  { %7930 = vmatpush1.bf16.msra.mxu1 %v10511_v52  ;;  %v5514_v2 = vpack.c.bf16 %v5335_v31, %v5335_v31  ;;  %v10681_v31 = vld [vmem:[%s14726_s13 + $0x484] ss:$8 sps:$4 sm:$0xff]  }
 0x52a   :  { %7931 = vmatprep.subr.bf16.mxu1 %v10516_v46  ;;  %v10636_v46 = vld [vmem:[%s14726_s13 + $0x354] ss:$8 sps:$4 sm:$0xff]  }
 0x52d   :  { %7932 = vmatpush1.bf16.msra.mxu1 %v10514_v11  ;;  %v10639_v11 = vld [vmem:[%s14726_s13 + $0x4f4] ss:$8 sps:$4 sm:$0xff]  }
 0x52e   :  { %7933 = vmatprep.subr.bf16.mxu1 %v10519_v33  ;;  %v10634_v33 = vld [vmem:[%s14726_s13 + $0x350] ss:$8 sps:$4 sm:$0xff]  }
 0x531   :  { %7934 = vmatpush1.bf16.msra.mxu1 %v10517_v42  ;;  %v10637_v42 = vld [vmem:[%s14726_s13 + $0x4f0] ss:$8 sps:$4 sm:$0xff]  }
 0x532   :  { %7935 = vmatprep.subr.bf16.mxu1 %v10522_v61  ;;  %v10642_v61 = vld [vmem:[%s14726_s13 + $0x344] ss:$8 sps:$4 sm:$0xff]  }
 0x535   :  { %7936 = vmatpush1.bf16.msra.mxu1 %v10520_v16  ;;  %v10645_v16 = vld [vmem:[%s14726_s13 + $0x4e4] ss:$8 sps:$4 sm:$0xff]  }
 0x536   :  { %7937 = vmatprep.subr.bf16.mxu1 %v10525_v50  ;;  %v10640_v50 = vld [vmem:[%s14726_s13 + $0x340] ss:$8 sps:$4 sm:$0xff]  }
 0x539   :  { %7938 = vmatpush1.bf16.msra.mxu1 %v10523_v17  ;;  %v10643_v17 = vld [vmem:[%s14726_s13 + $0x4e0] ss:$8 sps:$4 sm:$0xff]  }
 0x53a   :  { %7939 = vmatprep.subr.bf16.mxu1 %v10531_v44  ;;  %v10648_v44 = vld [vmem:[%s14726_s13 + $0x334] ss:$8 sps:$4 sm:$0xff]  }
 0x53d   :  { %7940 = vmatpush1.bf16.msra.mxu1 %v10529_v62  ;;  %v10651_v62 = vld [vmem:[%s14726_s13 + $0x4d4] ss:$8 sps:$4 sm:$0xff]  }
 0x53e   :  { %7941 = vmatprep.subr.bf16.mxu1 %v10537_v36  ;;  %v10646_v36 = vld [vmem:[%s14726_s13 + $0x330] ss:$8 sps:$4 sm:$0xff]  }
 0x541   :  { %7942 = vmatpush1.bf16.msra.mxu1 %v10535_v56  ;;  %v10649_v56 = vld [vmem:[%s14726_s13 + $0x4d0] ss:$8 sps:$4 sm:$0xff]  }
 0x542   :  { %7943 = vmatprep.subr.bf16.mxu1 %v10543_v18  ;;  %v10654_v18 = vld [vmem:[%s14726_s13 + $0x324] ss:$8 sps:$4 sm:$0xff]  }
 0x545   :  { %7944 = vmatpush2.bf16.msra.mxu1 %v10541_v24  ;;  %v10657_v24 = vld [vmem:[%s14726_s13 + $0x4c4] ss:$8 sps:$4 sm:$0xff]  }
 0x546   :  { %7945 = vmatprep.subr.bf16.mxu1 %v10549_v7  ;;  %v10652_v7 = vld [vmem:[%s14726_s13 + $0x320] ss:$8 sps:$4 sm:$0xff]  }
 0x549   :  { %7946 = vmatpush2.bf16.msra.mxu1 %v10547_v1  ;;  %v10655_v1 = vld [vmem:[%s14726_s13 + $0x4c0] ss:$8 sps:$4 sm:$0xff]  }
 0x54a   :  { %7947 = vmatprep.subr.bf16.mxu1 %v10555_v60  ;;  %v10660_v60 = vld [vmem:[%s14726_s13 + $0x314] ss:$8 sps:$4 sm:$0xff]  }
 0x54d   :  { %7948 = vmatpush2.bf16.msra.mxu1 %v10553_v13  ;;  %v10663_v13 = vld [vmem:[%s14726_s13 + $0x4b4] ss:$8 sps:$4 sm:$0xff]  }
 0x54e   :  { %7949 = vmatprep.subr.bf16.mxu1 %v10561_v0  ;;  %v10658_v0 = vld [vmem:[%s14726_s13 + $0x310] ss:$8 sps:$4 sm:$0xff]  }
 0x551   :  { %7950 = vmatpush2.bf16.msra.mxu1 %v10559_v25  ;;  %v10661_v25 = vld [vmem:[%s14726_s13 + $0x4b0] ss:$8 sps:$4 sm:$0xff]  }
 0x552   :  { %7951 = vmatprep.subr.bf16.mxu1 %v10567_v30  ;;  %v10666_v30 = vld [vmem:[%s14726_s13 + $0x304] ss:$8 sps:$4 sm:$0xff]  }
 0x555   :  { %7952 = vmatpush2.bf16.msra.mxu1 %v10565_v43  ;;  %v10669_v43 = vld [vmem:[%s14726_s13 + $0x4a4] ss:$8 sps:$4 sm:$0xff]  }
 0x556   :  { %7953 = vmatprep.subr.bf16.mxu1 %v10573_v57  ;;  %v10664_v57 = vld [vmem:[%s14726_s13 + $0x300] ss:$8 sps:$4 sm:$0xff]  }
 0x559   :  { %7954 = vmatpush2.bf16.msra.mxu1 %v10571_v48  ;;  %v10667_v48 = vld [vmem:[%s14726_s13 + $0x4a0] ss:$8 sps:$4 sm:$0xff]  }
 0x55a   :  { %7955 = vmatprep.subr.bf16.mxu1 %v10579_v32  ;;  %v10672_v32 = vld [vmem:[%s14726_s13 + $0x3f4] ss:$8 sps:$4 sm:$0xff]  }
 0x55d   :  { %7956 = vmatpush2.bf16.msra.mxu1 %v10577_v49  ;;  %v10675_v49 = vld [vmem:[%s14726_s13 + $0x494] ss:$8 sps:$4 sm:$0xff]  }
 0x55e   :  { %7957 = vmatprep.subr.bf16.mxu1 %v10585_v3  ;;  %v10670_v3 = vld [vmem:[%s14726_s13 + $0x3f0] ss:$8 sps:$4 sm:$0xff]  }
 0x561   :  { %7958 = vmatpush2.bf16.msra.mxu1 %v10583_v21  ;;  %v10673_v21 = vld [vmem:[%s14726_s13 + $0x490] ss:$8 sps:$4 sm:$0xff]  }
 0x562   :  { %8009 = vmatprep.subr.bf16.mxu1 %v10591_v15  ;;  %v10678_v15 = vld [vmem:[%s14726_s13 + $0x3e4] ss:$8 sps:$4 sm:$0xff]  }
 0x564   :  { %7960 = vmatmul.mubr.bf16.vlgmr.msra.gmra.mxu1 %v5509_v45  ;;  %v13846_v45 = vpop.f32.mrf.mxu1 }
 0x565   :  { %8010 = vmatpush1.bf16.msra.mxu1 %v10589_v12  ;;  %8041 = vmatprep.mubr.bf16.mxu1 %v5514_v2  ;;  %v10676_v12 = vld [vmem:[%s14726_s13 + $0x3e0] ss:$8 sps:$4 sm:$0xff]  }
 0x566   :  { %8011 = vmatprep.subr.bf16.mxu1 %v10597_v14  ;;  %v10679_v2 = vld [vmem:[%s14726_s13 + $0x480] ss:$8 sps:$4 sm:$0xff]   ;;  %v10684_v14 = vld [vmem:[%s14726_s13 + $0x3d4] ss:$8 sps:$4 sm:$0xff]  }
 0x569   :  { %8012 = vmatpush1.bf16.msra.mxu1 %v10595_v22  ;;  %v10687_v22 = vld [vmem:[%s14726_s13 + $0x674] ss:$8 sps:$4 sm:$0xff]  }
 0x56a   :  { %8013 = vmatprep.subr.bf16.mxu1 %v10603_v10  ;;  %v5341_v10 = vpop.f32.mrf.mxu1 }
 0x56d   :  { %8014 = vmatpush1.bf16.msra.mxu1 %v10601_v27  ;;  %v5513_v27 = vpack.c.bf16 %v13690_v29, %v13690_v29  ;;  %v10693_v29 = vld [vmem:[%s14726_s13 + $0x664] ss:$8 sps:$4 sm:$0xff]  }
 0x56e   :  { %8015 = vmatprep.subr.bf16.mxu1 %v10609_v8  ;;  %v10682_v8 = vld [vmem:[%s14726_s13 + $0x3d0] ss:$8 sps:$4 sm:$0xff]  }
 0x571   :  { %8016 = vmatpush1.bf16.msra.mxu1 %v10607_v5  ;;  %v10685_v5 = vld [vmem:[%s14726_s13 + $0x670] ss:$8 sps:$4 sm:$0xff]  }
 0x572   :  { %8017 = vmatprep.subr.bf16.mxu1 %v10615_v35  ;;  %v10690_v35 = vld [vmem:[%s14726_s13 + $0x3c4] ss:$8 sps:$4 sm:$0xff]  }
 0x575   :  { %8018 = vmatpush1.bf16.msra.mxu1 %v10613_v54  ;;  %v5422_v55 = vpop.f32.mrf.mxu0  ;;  %v5518_v54 = vpack.c.bf16 %v5341_v10, %v5341_v10  ;;  %v10762_v10 = vld [vmem:[%s14726_s13 + $0x504] ss:$8 sps:$4 sm:$0xff]  }
 0x576   :  { %8019 = vmatprep.subr.bf16.mxu1 %v10621_v37  ;;  %v5507_v26 = vpack.c.bf16 %v5422_v55, %v5422_v55  ;;  %v10688_v37 = vld [vmem:[%s14726_s13 + $0x3c0] ss:$8 sps:$4 sm:$0xff]  }
 0x577   :  { %v5424_v63 = vpop.f32.mrf.mxu0  ;;  %v10691_v55 = vld [vmem:[%s14726_s13 + $0x660] ss:$8 sps:$4 sm:$0xff]  }
 0x578   :  { %v5508_v59 = vpack.c.bf16 %v5424_v63, %v5424_v63  ;;  %v10694_v63 = vld [vmem:[%s14726_s13 + $0x3b0] ss:$8 sps:$4 sm:$0xff]  }
 0x579   :  { %8020 = vmatpush1.bf16.msra.mxu1 %v10619_v6  ;;  %v13745_v34 = vpop.f32.mrf.mxu0  ;;  %v10696_v6 = vld [vmem:[%s14726_s13 + $0x3b4] ss:$8 sps:$4 sm:$0xff]  }
 0x57a   :  { %7918 = vmatprep.mubr.bf16.mxu0 %v5508_v59  ;;  %8021 = vmatprep.subr.bf16.mxu1 %v10627_v40  ;;  %v10699_v40 = vld [vmem:[%s14726_s13 + $0x654] ss:$8 sps:$4 sm:$0xff]   ;;  %v10697_v59 = vld [vmem:[%s14726_s13 + $0x650] ss:$8 sps:$4 sm:$0xff]  }
 0x57b   :  { %7919 = vmatmul.mubr.bf16.vlgmr.msra.gmra.mxu0 %v5507_v26  ;;  %v5430_v41 = vpop.f32.mrf.mxu0  ;;  %v10705_v26 = vld [vmem:[%s14726_s13 + $0x644] ss:$8 sps:$4 sm:$0xff]  }
 0x57c   :  { %7969 = vmatpush1.bf16.msra.mxu0 %v10622_v23  ;;  %v5512_v52 = vpack.c.bf16 %v5430_v41, %v5430_v41  ;;  %v10702_v23 = vld [vmem:[%s14726_s13 + $0x3a4] ss:$8 sps:$4 sm:$0xff]   ;;  %v10711_v41 = vld [vmem:[%s14726_s13 + $0x634] ss:$8 sps:$4 sm:$0xff]  }
 0x57d   :  { %8022 = vmatpush1.bf16.msra.mxu1 %v10625_v20  ;;  %7970 = vmatprep.subr.bf16.mxu0 %v10630_v19  ;;  %v10700_v20 = vld [vmem:[%s14726_s13 + $0x3a0] ss:$8 sps:$4 sm:$0xff]  }
 0x57e   :  { %8023 = vmatprep.subr.bf16.mxu1 %v10633_v4  ;;  %8000 = vmatprep.mubr.bf16.mxu0 %v5512_v52  ;;  %v10703_v19 = vld [vmem:[%s14726_s13 + $0x640] ss:$8 sps:$4 sm:$0xff]   ;;  %v10708_v4 = vld [vmem:[%s14726_s13 + $0x394] ss:$8 sps:$4 sm:$0xff]   ;;  %v10709_v52 = vld [vmem:[%s14726_s13 + $0x630] ss:$8 sps:$4 sm:$0xff]  }
 0x580   :  { %7971 = vmatpush1.bf16.msra.mxu0 %v10628_v9  ;;  %v10706_v9 = vld [vmem:[%s14726_s13 + $0x390] ss:$8 sps:$4 sm:$0xff]  }
 0x581   :  { %8024 = vmatpush1.bf16.msra.mxu1 %v10631_v51  ;;  %7972 = vmatprep.subr.bf16.mxu0 %v10636_v46  ;;  %v10714_v51 = vld [vmem:[%s14726_s13 + $0x384] ss:$8 sps:$4 sm:$0xff]   ;;  %v13919_v46 = vpop.f32.mrf.mxu0 }
 0x582   :  { %8025 = vmatprep.subr.bf16.mxu1 %v10639_v11  ;;  %v10717_v11 = vld [vmem:[%s14726_s13 + $0x624] ss:$8 sps:$4 sm:$0xff]  }
 0x584   :  { %7973 = vmatpush1.bf16.msra.mxu0 %v10634_v33  ;;  %v10712_v33 = vld [vmem:[%s14726_s13 + $0x380] ss:$8 sps:$4 sm:$0xff]  }
 0x585   :  { %8026 = vmatpush2.bf16.msra.mxu1 %v10637_v42  ;;  %7974 = vmatprep.subr.bf16.mxu0 %v10642_v61  ;;  %v10715_v42 = vld [vmem:[%s14726_s13 + $0x620] ss:$8 sps:$4 sm:$0xff]   ;;  %v10720_v61 = vld [vmem:[%s14726_s13 + $0x574] ss:$8 sps:$4 sm:$0xff]  }
 0x586   :  { %8027 = vmatprep.subr.bf16.mxu1 %v10645_v16  ;;  %v5436_v16 = vpop.f32.mrf.mxu0 }
 0x588   :  { %7975 = vmatpush1.bf16.msra.mxu0 %v10640_v50  ;;  %v10723_v50 = vld [vmem:[%s14726_s13 + $0x614] ss:$8 sps:$4 sm:$0xff]  }
 0x589   :  { %8028 = vmatpush2.bf16.msra.mxu1 %v10643_v17  ;;  %7976 = vmatprep.subr.bf16.mxu0 %v10648_v44  ;;  %v10718_v17 = vld [vmem:[%s14726_s13 + $0x570] ss:$8 sps:$4 sm:$0xff]   ;;  %v5516_v44 = vpack.c.bf16 %v5436_v16, %v5436_v16  ;;  %v10792_v16 = vld [vmem:[%s14726_s13 + $0x5b4] ss:$8 sps:$4 sm:$0xff]  }
 0x58a   :  { %8029 = vmatprep.subr.bf16.mxu1 %v10651_v62  ;;  %v5511_v62 = vpack.c.bf16 %v13745_v34, %v13745_v34  ;;  %v10724_v34 = vld [vmem:[%s14726_s13 + $0x560] ss:$8 sps:$4 sm:$0xff]  }
 0x58c   :  { %7977 = vmatpush1.bf16.msra.mxu0 %v10646_v36  ;;  %v10721_v36 = vld [vmem:[%s14726_s13 + $0x610] ss:$8 sps:$4 sm:$0xff]  }
 0x58d   :  { %8030 = vmatpush2.bf16.msra.mxu1 %v10649_v56  ;;  %7978 = vmatprep.subr.bf16.mxu0 %v10654_v18  ;;  %v10726_v56 = vld [vmem:[%s14726_s13 + $0x564] ss:$8 sps:$4 sm:$0xff]  }
 0x58e   :  { %8031 = vmatprep.subr.bf16.mxu1 %v10657_v24  ;;  %v10729_v18 = vld [vmem:[%s14726_s13 + $0x604] ss:$8 sps:$4 sm:$0xff]   ;;  %v10727_v24 = vld [vmem:[%s14726_s13 + $0x600] ss:$8 sps:$4 sm:$0xff]  }
 0x590   :  { %7979 = vmatpush1.bf16.msra.mxu0 %v10652_v7  ;;  %v10732_v7 = vld [vmem:[%s14726_s13 + $0x554] ss:$8 sps:$4 sm:$0xff]  }
 0x591   :  { %8032 = vmatpush2.bf16.msra.mxu1 %v10655_v1  ;;  %7980 = vmatprep.subr.bf16.mxu0 %v10660_v60  ;;  %v10735_v1 = vld [vmem:[%s14726_s13 + $0x6f4] ss:$8 sps:$4 sm:$0xff]   ;;  %v10730_v60 = vld [vmem:[%s14726_s13 + $0x550] ss:$8 sps:$4 sm:$0xff]  }
 0x592   :  { %8033 = vmatprep.subr.bf16.mxu1 %v10663_v13  ;;  %v10733_v13 = vld [vmem:[%s14726_s13 + $0x6f0] ss:$8 sps:$4 sm:$0xff]  }
 0x594   :  { %7981 = vmatpush1.bf16.msra.mxu0 %v10658_v0  ;;  %v10738_v0 = vld [vmem:[%s14726_s13 + $0x544] ss:$8 sps:$4 sm:$0xff]  }
 0x595   :  { %8034 = vmatpush2.bf16.msra.mxu1 %v10661_v25  ;;  %7982 = vmatprep.subr.bf16.mxu0 %v10666_v30  ;;  %v10741_v25 = vld [vmem:[%s14726_s13 + $0x6e4] ss:$8 sps:$4 sm:$0xff]   ;;  %v10736_v30 = vld [vmem:[%s14726_s13 + $0x540] ss:$8 sps:$4 sm:$0xff]  }
 0x596   :  { %8035 = vmatprep.subr.bf16.mxu1 %v10669_v43  ;;  %v10739_v43 = vld [vmem:[%s14726_s13 + $0x6e0] ss:$8 sps:$4 sm:$0xff]  }
 0x598   :  { %7983 = vmatpush1.bf16.msra.mxu0 %v10664_v57  ;;  %v10744_v57 = vld [vmem:[%s14726_s13 + $0x534] ss:$8 sps:$4 sm:$0xff]  }
 0x599   :  { %8036 = vmatpush2.bf16.msra.mxu1 %v10667_v48  ;;  %7984 = vmatprep.subr.bf16.mxu0 %v10672_v32  ;;  %v10747_v48 = vld [vmem:[%s14726_s13 + $0x6d4] ss:$8 sps:$4 sm:$0xff]   ;;  %v10742_v32 = vld [vmem:[%s14726_s13 + $0x530] ss:$8 sps:$4 sm:$0xff]  }
 0x59a   :  { %8037 = vmatprep.subr.bf16.mxu1 %v10675_v49  ;;  %v10745_v49 = vld [vmem:[%s14726_s13 + $0x6d0] ss:$8 sps:$4 sm:$0xff]  }
 0x59c   :  { %7985 = vmatpush2.bf16.msra.mxu0 %v10670_v3  ;;  %v10750_v3 = vld [vmem:[%s14726_s13 + $0x524] ss:$8 sps:$4 sm:$0xff]  }
 0x59d   :  { %8038 = vmatpush2.bf16.msra.mxu1 %v10673_v21  ;;  %7986 = vmatprep.subr.bf16.mxu0 %v10678_v15  ;;  %v10753_v21 = vld [vmem:[%s14726_s13 + $0x6c4] ss:$8 sps:$4 sm:$0xff]   ;;  %v10748_v15 = vld [vmem:[%s14726_s13 + $0x520] ss:$8 sps:$4 sm:$0xff]  }
 0x59e   :  { %8039 = vmatprep.subr.bf16.mxu1 %v10681_v31  ;;  %v10751_v31 = vld [vmem:[%s14726_s13 + $0x6c0] ss:$8 sps:$4 sm:$0xff]  }
 0x5a0   :  { %7987 = vmatpush2.bf16.msra.mxu0 %v10676_v12  ;;  %v10756_v12 = vld [vmem:[%s14726_s13 + $0x514] ss:$8 sps:$4 sm:$0xff]  }
 0x5a1   :  { %8040 = vmatpush2.bf16.msra.mxu1 %v10679_v2  ;;  %7988 = vmatprep.subr.bf16.mxu0 %v10684_v14  ;;  %v10759_v2 = vld [vmem:[%s14726_s13 + $0x6b4] ss:$8 sps:$4 sm:$0xff]   ;;  %v10754_v14 = vld [vmem:[%s14726_s13 + $0x510] ss:$8 sps:$4 sm:$0xff]  }
 0x5a2   :  { %8091 = vmatprep.subr.bf16.mxu1 %v10687_v22  ;;  %v10757_v22 = vld [vmem:[%s14726_s13 + $0x6b0] ss:$8 sps:$4 sm:$0xff]  }
 0x5a4   :  { %7989 = vmatpush2.bf16.msra.mxu0 %v10682_v8  ;;  %8042 = vmatmul.mubr.bf16.vlgmr.msra.gmra.mxu1 %v5513_v27  ;;  %v10765_v27 = vld [vmem:[%s14726_s13 + $0x6a4] ss:$8 sps:$4 sm:$0xff]   ;;  %v10760_v8 = vld [vmem:[%s14726_s13 + $0x500] ss:$8 sps:$4 sm:$0xff]  }
 0x5a5   :  { %8092 = vmatpush1.bf16.msra.mxu1 %v10685_v5  ;;  %7990 = vmatprep.subr.bf16.mxu0 %v10690_v35  ;;  %v10763_v5 = vld [vmem:[%s14726_s13 + $0x6a0] ss:$8 sps:$4 sm:$0xff]   ;;  %v10768_v35 = vld [vmem:[%s14726_s13 + $0x5f4] ss:$8 sps:$4 sm:$0xff]  }
 0x5a6   :  { %8093 = vmatprep.subr.bf16.mxu1 %v10693_v29  ;;  %8123 = vmatprep.mubr.bf16.mxu1 %v5518_v54  ;;  %v10771_v29 = vld [vmem:[%s14726_s13 + $0x694] ss:$8 sps:$4 sm:$0xff]   ;;  %v14034_v54 = vpop.f32.mrf.mxu1 }
 0x5a8   :  { %7991 = vmatpush2.bf16.msra.mxu0 %v10688_v37  ;;  %v10766_v37 = vld [vmem:[%s14726_s13 + $0x5f0] ss:$8 sps:$4 sm:$0xff]  }
 0x5a9   :  { %8094 = vmatpush1.bf16.msra.mxu1 %v10691_v55  ;;  %7992 = vmatprep.subr.bf16.mxu0 %v10696_v6  ;;  %v10769_v55 = vld [vmem:[%s14726_s13 + $0x690] ss:$8 sps:$4 sm:$0xff]   ;;  %v10774_v6 = vld [vmem:[%s14726_s13 + $0x5e4] ss:$8 sps:$4 sm:$0xff]  }
 0x5aa   :  { %8095 = vmatprep.subr.bf16.mxu1 %v10699_v40  ;;  %v10777_v40 = vld [vmem:[%s14726_s13 + $0x684] ss:$8 sps:$4 sm:$0xff]  }
 0x5ac   :  { %7993 = vmatpush2.bf16.msra.mxu0 %v10694_v63  ;;  %v5347_v63 = vpop.f32.mrf.mxu1 }
 0x5ad   :  { %8096 = vmatpush1.bf16.msra.mxu1 %v10697_v59  ;;  %7994 = vmatprep.subr.bf16.mxu0 %v10702_v23  ;;  %v10772_v59 = vld [vmem:[%s14726_s13 + $0x5e0] ss:$8 sps:$4 sm:$0xff]  }
 0x5ae   :  { %8097 = vmatprep.subr.bf16.mxu1 %v10705_v26  ;;  %v14051_v23 = vpop.f32.mrf.mxu1  ;;  %v10775_v26 = vld [vmem:[%s14726_s13 + $0x680] ss:$8 sps:$4 sm:$0xff]  }
 0x5b0   :  { %7995 = vmatpush2.bf16.msra.mxu0 %v10700_v20  ;;  %v10780_v20 = vld [vmem:[%s14726_s13 + $0x5d4] ss:$8 sps:$4 sm:$0xff]  }
 0x5b1   :  { %8098 = vmatpush1.bf16.msra.mxu1 %v10703_v19  ;;  %7996 = vmatprep.subr.bf16.mxu0 %v10708_v4  ;;  %v10783_v19 = vld [vmem:[%s14726_s13 + $0x874] ss:$8 sps:$4 sm:$0xff]   ;;  %v5517_v4 = vpack.c.bf16 %v13846_v45, %v13846_v45  ;;  %v10789_v45 = vld [vmem:[%s14726_s13 + $0x864] ss:$8 sps:$4 sm:$0xff]  }
 0x5b2   :  { %8099 = vmatprep.subr.bf16.mxu1 %v10711_v41  ;;  %v10778_v41 = vld [vmem:[%s14726_s13 + $0x5d0] ss:$8 sps:$4 sm:$0xff]  }
 0x5b4   :  { %7997 = vmatpush2.bf16.msra.mxu0 %v10706_v9  ;;  %v14067_v9 = vpop.f32.mrf.mxu1 }
 0x5b5   :  { %8100 = vmatpush1.bf16.msra.mxu1 %v10709_v52  ;;  %7998 = vmatprep.subr.bf16.mxu0 %v10714_v51  ;;  %v10781_v52 = vld [vmem:[%s14726_s13 + $0x870] ss:$8 sps:$4 sm:$0xff]   ;;  %v10786_v51 = vld [vmem:[%s14726_s13 + $0x5c4] ss:$8 sps:$4 sm:$0xff]  }
 0x5b6   :  { %8101 = vmatprep.subr.bf16.mxu1 %v10717_v11  ;;  %v5522_v11 = vpack.c.bf16 %v5347_v63, %v5347_v63  ;;  %v10838_v63 = vld [vmem:[%s14726_s13 + $0x730] ss:$8 sps:$4 sm:$0xff]  }
 0x5b8   :  { %7999 = vmatpush2.bf16.msra.mxu0 %v10712_v33  ;;  %v10784_v33 = vld [vmem:[%s14726_s13 + $0x5c0] ss:$8 sps:$4 sm:$0xff]  }
 0x5b9   :  { %8102 = vmatpush1.bf16.msra.mxu1 %v10715_v42  ;;  %8050 = vmatprep.subr.bf16.mxu0 %v10720_v61  ;;  %v10787_v61 = vld [vmem:[%s14726_s13 + $0x860] ss:$8 sps:$4 sm:$0xff]  }
 0x5ba   :  { %8103 = vmatprep.subr.bf16.mxu1 %v10723_v50  ;;  %v10795_v50 = vld [vmem:[%s14726_s13 + $0x854] ss:$8 sps:$4 sm:$0xff]  }
 0x5bb   :  { %8001 = vmatmul.mubr.bf16.vlgmr.msra.gmra.mxu0 %v5511_v62 }
 0x5bc   :  { %8051 = vmatpush1.bf16.msra.mxu0 %v10718_v17  ;;  %8082 = vmatprep.mubr.bf16.mxu0 %v5516_v44  ;;  %v10790_v44 = vld [vmem:[%s14726_s13 + $0x5b0] ss:$8 sps:$4 sm:$0xff]  }
 0x5bd   :  { %8104 = vmatpush1.bf16.msra.mxu1 %v10721_v36  ;;  %8052 = vmatprep.subr.bf16.mxu0 %v10726_v56  ;;  %v10793_v36 = vld [vmem:[%s14726_s13 + $0x850] ss:$8 sps:$4 sm:$0xff]   ;;  %v10798_v56 = vld [vmem:[%s14726_s13 + $0x5a4] ss:$8 sps:$4 sm:$0xff]  }
 0x5be   :  { %8105 = vmatprep.subr.bf16.mxu1 %v10729_v18  ;;  %v10801_v18 = vld [vmem:[%s14726_s13 + $0x844] ss:$8 sps:$4 sm:$0xff]  }
 0x5c0   :  { %8053 = vmatpush1.bf16.msra.mxu0 %v10724_v34 }
 0x5c1   :  { %8106 = vmatpush1.bf16.msra.mxu1 %v10727_v24  ;;  %8054 = vmatprep.subr.bf16.mxu0 %v10732_v7  ;;  %v10796_v24 = vld [vmem:[%s14726_s13 + $0x5a0] ss:$8 sps:$4 sm:$0xff]  }
 0x5c2   :  { %8107 = vmatprep.subr.bf16.mxu1 %v10735_v1  ;;  %v10799_v7 = vld [vmem:[%s14726_s13 + $0x840] ss:$8 sps:$4 sm:$0xff]   ;;  %v10804_v1 = vld [vmem:[%s14726_s13 + $0x594] ss:$8 sps:$4 sm:$0xff]  }
 0x5c4   :  { %8055 = vmatpush1.bf16.msra.mxu0 %v10730_v60  ;;  %v10807_v60 = vld [vmem:[%s14726_s13 + $0x834] ss:$8 sps:$4 sm:$0xff]  }
 0x5c5   :  { %8108 = vmatpush2.bf16.msra.mxu1 %v10733_v13  ;;  %8056 = vmatprep.subr.bf16.mxu0 %v10738_v0  ;;  %v10802_v13 = vld [vmem:[%s14726_s13 + $0x590] ss:$8 sps:$4 sm:$0xff]  }
 0x5c6   :  { %8109 = vmatprep.subr.bf16.mxu1 %v10741_v25  ;;  %v10805_v0 = vld [vmem:[%s14726_s13 + $0x830] ss:$8 sps:$4 sm:$0xff]   ;;  %v10810_v25 = vld [vmem:[%s14726_s13 + $0x584] ss:$8 sps:$4 sm:$0xff]  }
 0x5c8   :  { %8057 = vmatpush1.bf16.msra.mxu0 %v10736_v30  ;;  %v14127_v30 = vpop.f32.mrf.mxu0 }
 0x5c9   :  { %8110 = vmatpush2.bf16.msra.mxu1 %v10739_v43  ;;  %8058 = vmatprep.subr.bf16.mxu0 %v10744_v57  ;;  %v10813_v43 = vld [vmem:[%s14726_s13 + $0x824] ss:$8 sps:$4 sm:$0xff]   ;;  %v10808_v57 = vld [vmem:[%s14726_s13 + $0x580] ss:$8 sps:$4 sm:$0xff]  }
 0x5ca   :  { %8111 = vmatprep.subr.bf16.mxu1 %v10747_v48  ;;  %v10811_v48 = vld [vmem:[%s14726_s13 + $0x820] ss:$8 sps:$4 sm:$0xff]  }
 0x5cc   :  { %8059 = vmatpush1.bf16.msra.mxu0 %v10742_v32  ;;  %v10816_v32 = vld [vmem:[%s14726_s13 + $0x774] ss:$8 sps:$4 sm:$0xff]  }
 0x5cd   :  { %8112 = vmatpush2.bf16.msra.mxu1 %v10745_v49  ;;  %8060 = vmatprep.subr.bf16.mxu0 %v10750_v3  ;;  %v5442_v49 = vpop.f32.mrf.mxu0  ;;  %v10819_v3 = vld [vmem:[%s14726_s13 + $0x814] ss:$8 sps:$4 sm:$0xff]  }
 0x5ce   :  { %8113 = vmatprep.subr.bf16.mxu1 %v10753_v21  ;;  %v10814_v21 = vld [vmem:[%s14726_s13 + $0x770] ss:$8 sps:$4 sm:$0xff]  }
 0x5d0   :  { %8061 = vmatpush1.bf16.msra.mxu0 %v10748_v15  ;;  %v5520_v15 = vpack.c.bf16 %v5442_v49, %v5442_v49  ;;  %v10888_v49 = vld [vmem:[%s14726_s13 + $0x7b4] ss:$8 sps:$4 sm:$0xff]  }
 0x5d1   :  { %8114 = vmatpush2.bf16.msra.mxu1 %v10751_v31  ;;  %8062 = vmatprep.subr.bf16.mxu0 %v10756_v12  ;;  %v5515_v31 = vpack.c.bf16 %v13919_v46, %v13919_v46  ;;  %v10817_v12 = vld [vmem:[%s14726_s13 + $0x810] ss:$8 sps:$4 sm:$0xff]   ;;  %v10820_v46 = vld [vmem:[%s14726_s13 + $0x760] ss:$8 sps:$4 sm:$0xff]  }
 0x5d2   :  { %8115 = vmatprep.subr.bf16.mxu1 %v10759_v2  ;;  %v10822_v2 = vld [vmem:[%s14726_s13 + $0x764] ss:$8 sps:$4 sm:$0xff]  }
 0x5d4   :  { %8063 = vmatpush1.bf16.msra.mxu0 %v10754_v14  ;;  %v10825_v14 = vld [vmem:[%s14726_s13 + $0x804] ss:$8 sps:$4 sm:$0xff]  }
 0x5d5   :  { %8116 = vmatpush2.bf16.msra.mxu1 %v10757_v22  ;;  %8064 = vmatprep.subr.bf16.mxu0 %v10762_v10  ;;  %v10823_v22 = vld [vmem:[%s14726_s13 + $0x800] ss:$8 sps:$4 sm:$0xff]   ;;  %v10828_v10 = vld [vmem:[%s14726_s13 + $0x754] ss:$8 sps:$4 sm:$0xff]  }
 0x5d6   :  { %8117 = vmatprep.subr.bf16.mxu1 %v10765_v27  ;;  %v10831_v27 = vld [vmem:[%s14726_s13 + $0x8f4] ss:$8 sps:$4 sm:$0xff]  }
 0x5d8   :  { %8065 = vmatpush1.bf16.msra.mxu0 %v10760_v8  ;;  %v10826_v8 = vld [vmem:[%s14726_s13 + $0x750] ss:$8 sps:$4 sm:$0xff]  }
 0x5d9   :  { %8118 = vmatpush2.bf16.msra.mxu1 %v10763_v5  ;;  %8066 = vmatprep.subr.bf16.mxu0 %v10768_v35  ;;  %v10829_v5 = vld [vmem:[%s14726_s13 + $0x8f0] ss:$8 sps:$4 sm:$0xff]   ;;  %v10834_v35 = vld [vmem:[%s14726_s13 + $0x744] ss:$8 sps:$4 sm:$0xff]  }
 0x5da   :  { %8119 = vmatprep.subr.bf16.mxu1 %v10771_v29  ;;  %v10837_v29 = vld [vmem:[%s14726_s13 + $0x8e4] ss:$8 sps:$4 sm:$0xff]  }
 0x5dc   :  { %8067 = vmatpush2.bf16.msra.mxu0 %v10766_v37  ;;  %v10832_v37 = vld [vmem:[%s14726_s13 + $0x740] ss:$8 sps:$4 sm:$0xff]  }
 0x5dd   :  { %8120 = vmatpush2.bf16.msra.mxu1 %v10769_v55  ;;  %8068 = vmatprep.subr.bf16.mxu0 %v10774_v6  ;;  %v10835_v55 = vld [vmem:[%s14726_s13 + $0x8e0] ss:$8 sps:$4 sm:$0xff]   ;;  %v10840_v6 = vld [vmem:[%s14726_s13 + $0x734] ss:$8 sps:$4 sm:$0xff]  }
 0x5de   :  { %8121 = vmatprep.subr.bf16.mxu1 %v10777_v40  ;;  %v10843_v40 = vld [vmem:[%s14726_s13 + $0x8d4] ss:$8 sps:$4 sm:$0xff]  }
 0x5e0   :  { %8069 = vmatpush2.bf16.msra.mxu0 %v10772_v59  ;;  %v10841_v59 = vld [vmem:[%s14726_s13 + $0x8d0] ss:$8 sps:$4 sm:$0xff]  }
 0x5e1   :  { %8122 = vmatpush2.bf16.msra.mxu1 %v10775_v26  ;;  %8070 = vmatprep.subr.bf16.mxu0 %v10780_v20  ;;  %v10846_v26 = vld [vmem:[%s14726_s13 + $0x724] ss:$8 sps:$4 sm:$0xff]  }
 0x5e2   :  { %8173 = vmatprep.subr.bf16.mxu1 %v10783_v19  ;;  %v10849_v20 = vld [vmem:[%s14726_s13 + $0x8c4] ss:$8 sps:$4 sm:$0xff]   ;;  %v10844_v19 = vld [vmem:[%s14726_s13 + $0x720] ss:$8 sps:$4 sm:$0xff]  }
 0x5e4   :  { %8071 = vmatpush2.bf16.msra.mxu0 %v10778_v41  ;;  %8124 = vmatmul.mubr.bf16.vlgmr.msra.gmra.mxu1 %v5517_v4  ;;  %v14081_v42 = vpop.f32.mrf.mxu1  ;;  %v10847_v4 = vld [vmem:[%s14726_s13 + $0x8c0] ss:$8 sps:$4 sm:$0xff]   ;;  %v10852_v41 = vld [vmem:[%s14726_s13 + $0x714] ss:$8 sps:$4 sm:$0xff]  }
 0x5e5   :  { %8174 = vmatpush1.bf16.msra.mxu1 %v10781_v52  ;;  %8072 = vmatprep.subr.bf16.mxu0 %v10786_v51  ;;  %v10855_v52 = vld [vmem:[%s14726_s13 + $0x8b4] ss:$8 sps:$4 sm:$0xff]   ;;  %v10850_v51 = vld [vmem:[%s14726_s13 + $0x710] ss:$8 sps:$4 sm:$0xff]  }
 0x5e6   :  { %8175 = vmatprep.subr.bf16.mxu1 %v10789_v45  ;;  %8205 = vmatprep.mubr.bf16.mxu1 %v5522_v11  ;;  %v14092_v17 = vpop.f32.mrf.mxu1  ;;  %v10853_v45 = vld [vmem:[%s14726_s13 + $0x8b0] ss:$8 sps:$4 sm:$0xff]   ;;  %v10858_v11 = vld [vmem:[%s14726_s13 + $0x704] ss:$8 sps:$4 sm:$0xff]  }
 0x5e8   :  { %8073 = vmatpush2.bf16.msra.mxu0 %v10784_v33  ;;  %v7883_v62 = vpop.f32.mrf.mxu1  ;;  %v10861_v33 = vld [vmem:[%s14726_s13 + $0x8a4] ss:$8 sps:$4 sm:$0xff]  }
 0x5e9   :  { %8176 = vmatpush1.bf16.msra.mxu1 %v10787_v61  ;;  %8074 = vmatprep.subr.bf16.mxu0 %v10792_v16  ;;  %v10856_v61 = vld [vmem:[%s14726_s13 + $0x700] ss:$8 sps:$4 sm:$0xff]   ;;  %v10862_v62 = vld [vmem:[%s14726_s13 + $0x7f0] ss:$8 sps:$4 sm:$0xff]  }
 0x5ea   :  { %8177 = vmatprep.subr.bf16.mxu1 %v10795_v50  ;;  %v7884_v34 = vpop.f32.mrf.mxu1  ;;  %v10859_v16 = vld [vmem:[%s14726_s13 + $0x8a0] ss:$8 sps:$4 sm:$0xff]   ;;  %v10864_v50 = vld [vmem:[%s14726_s13 + $0x7f4] ss:$8 sps:$4 sm:$0xff]  }
 0x5eb   :  { %v10868_v34 = vld [vmem:[%s14726_s13 + $0x7e0] ss:$8 sps:$4 sm:$0xff]  }
 0x5ec   :  { %8075 = vmatpush2.bf16.msra.mxu0 %v10790_v44  ;;  %v10867_v44 = vld [vmem:[%s14726_s13 + $0x894] ss:$8 sps:$4 sm:$0xff]  }
 0x5ed   :  { %8178 = vmatpush1.bf16.msra.mxu1 %v10793_v36  ;;  %8076 = vmatprep.subr.bf16.mxu0 %v10798_v56  ;;  %v10865_v36 = vld [vmem:[%s14726_s13 + $0x890] ss:$8 sps:$4 sm:$0xff]   ;;  %v10870_v56 = vld [vmem:[%s14726_s13 + $0x7e4] ss:$8 sps:$4 sm:$0xff]  }
 0x5ee   :  { %8179 = vmatprep.subr.bf16.mxu1 %v10801_v18  ;;  %v10873_v18 = vld [vmem:[%s14726_s13 + $0x884] ss:$8 sps:$4 sm:$0xff]  }
 0x5f0   :  { %8077 = vmatpush2.bf16.msra.mxu0 %v10796_v24  ;;  %v10871_v24 = vld [vmem:[%s14726_s13 + $0x880] ss:$8 sps:$4 sm:$0xff]  }
 0x5f1   :  { %8180 = vmatpush1.bf16.msra.mxu1 %v10799_v7  ;;  %8078 = vmatprep.subr.bf16.mxu0 %v10804_v1  ;;  %v10876_v7 = vld [vmem:[%s14726_s13 + $0x7d4] ss:$8 sps:$4 sm:$0xff]  }
 0x5f2   :  { %8181 = vmatprep.subr.bf16.mxu1 %v10807_v60  ;;  %v10879_v1 = vld [vmem:[%s14726_s13 + $0xa74] ss:$8 sps:$4 sm:$0xff]   ;;  %v5521_v60 = vpack.c.bf16 %v14034_v54, %v14034_v54  ;;  %v10885_v54 = vld [vmem:[%s14726_s13 + $0xa64] ss:$8 sps:$4 sm:$0xff]  }
 0x5f4   :  { %8079 = vmatpush2.bf16.msra.mxu0 %v10802_v13  ;;  %v10874_v13 = vld [vmem:[%s14726_s13 + $0x7d0] ss:$8 sps:$4 sm:$0xff]  }
 0x5f5   :  { %8182 = vmatpush1.bf16.msra.mxu1 %v10805_v0  ;;  %8080 = vmatprep.subr.bf16.mxu0 %v10810_v25  ;;  %v10877_v0 = vld [vmem:[%s14726_s13 + $0xa70] ss:$8 sps:$4 sm:$0xff]   ;;  %v10882_v25 = vld [vmem:[%s14726_s13 + $0x7c4] ss:$8 sps:$4 sm:$0xff]  }
 0x5f6   :  { %8183 = vmatprep.subr.bf16.mxu1 %v10813_v43  ;;  %v5526_v43 = vpack.c.bf16 %v14067_v9, %v14067_v9  ;;  %v10891_v9 = vld [vmem:[%s14726_s13 + $0xa54] ss:$8 sps:$4 sm:$0xff]  }
 0x5f8   :  { %8081 = vmatpush2.bf16.msra.mxu0 %v10808_v57  ;;  %v10880_v57 = vld [vmem:[%s14726_s13 + $0x7c0] ss:$8 sps:$4 sm:$0xff]  }
 0x5f9   :  { %8184 = vmatpush1.bf16.msra.mxu1 %v10811_v48  ;;  %8132 = vmatprep.subr.bf16.mxu0 %v10816_v32  ;;  %v10883_v32 = vld [vmem:[%s14726_s13 + $0xa60] ss:$8 sps:$4 sm:$0xff]  }
 0x5fa   :  { %8185 = vmatprep.subr.bf16.mxu1 %v10819_v3 }
 0x5fb   :  { %8083 = vmatmul.mubr.bf16.vlgmr.msra.gmra.mxu0 %v5515_v31  ;;  %v10889_v31 = vld [vmem:[%s14726_s13 + $0xa50] ss:$8 sps:$4 sm:$0xff]  }
 0x5fc   :  { %8133 = vmatpush1.bf16.msra.mxu0 %v10814_v21  ;;  %8164 = vmatprep.mubr.bf16.mxu0 %v5520_v15  ;;  %v10886_v21 = vld [vmem:[%s14726_s13 + $0x7b0] ss:$8 sps:$4 sm:$0xff]  }
 0x5fd   :  { %8186 = vmatpush1.bf16.msra.mxu1 %v10817_v12  ;;  %8134 = vmatprep.subr.bf16.mxu0 %v10822_v2  ;;  %v10894_v12 = vld [vmem:[%s14726_s13 + $0x7a4] ss:$8 sps:$4 sm:$0xff]  }
 0x5fe   :  { %8187 = vmatprep.subr.bf16.mxu1 %v10825_v14  ;;  %v10897_v2 = vld [vmem:[%s14726_s13 + $0xa44] ss:$8 sps:$4 sm:$0xff]  }
 0x600   :  { %8135 = vmatpush1.bf16.msra.mxu0 %v10820_v46  ;;  %v10892_v46 = vld [vmem:[%s14726_s13 + $0x7a0] ss:$8 sps:$4 sm:$0xff]  }
 0x601   :  { %8188 = vmatpush1.bf16.msra.mxu1 %v10823_v22  ;;  %8136 = vmatprep.subr.bf16.mxu0 %v10828_v10  ;;  %v10895_v22 = vld [vmem:[%s14726_s13 + $0xa40] ss:$8 sps:$4 sm:$0xff]   ;;  %v10900_v10 = vld [vmem:[%s14726_s13 + $0x794] ss:$8 sps:$4 sm:$0xff]  }
 0x602   :  { %8189 = vmatprep.subr.bf16.mxu1 %v10831_v27  ;;  %v14319_v27 = vpop.f32.mrf.mxu0 }
 0x604   :  { %8137 = vmatpush1.bf16.msra.mxu0 %v10826_v8  ;;  %v10903_v8 = vld [vmem:[%s14726_s13 + $0xa34] ss:$8 sps:$4 sm:$0xff]  }
 0x605   :  { %8190 = vmatpush2.bf16.msra.mxu1 %v10829_v5  ;;  %8138 = vmatprep.subr.bf16.mxu0 %v10834_v35  ;;  %v10898_v5 = vld [vmem:[%s14726_s13 + $0x790] ss:$8 sps:$4 sm:$0xff]  }
 0x606   :  { %8191 = vmatprep.subr.bf16.mxu1 %v10837_v29  ;;  %v10901_v35 = vld [vmem:[%s14726_s13 + $0xa30] ss:$8 sps:$4 sm:$0xff]   ;;  %v10906_v29 = vld [vmem:[%s14726_s13 + $0x784] ss:$8 sps:$4 sm:$0xff]  }
 0x608   :  { %8139 = vmatpush1.bf16.msra.mxu0 %v10832_v37  ;;  %v5448_v37 = vpop.f32.mrf.mxu0 }
 0x609   :  { %8192 = vmatpush2.bf16.msra.mxu1 %v10835_v55  ;;  %8140 = vmatprep.subr.bf16.mxu0 %v10840_v6  ;;  %v10909_v55 = vld [vmem:[%s14726_s13 + $0xa24] ss:$8 sps:$4 sm:$0xff]   ;;  %v5913_v6 = vld [vmem:[%s14727_s14] sm:$0x3] }
 0x60a   :  { %8193 = vmatprep.subr.bf16.mxu1 %v10843_v40  ;;  %v10904_v40 = vld [vmem:[%s14726_s13 + $0x780] ss:$8 sps:$4 sm:$0xff]  }
 0x60c   :  { %8141 = vmatpush1.bf16.msra.mxu0 %v10838_v63  ;;  %v10907_v63 = vld [vmem:[%s14726_s13 + $0xa20] ss:$8 sps:$4 sm:$0xff]  }
 0x60d   :  { %8194 = vmatpush2.bf16.msra.mxu1 %v10841_v59  ;;  %8142 = vmatprep.subr.bf16.mxu0 %v10846_v26  ;;  %v14345_v59 = vpop.f32.mrf.mxu0  ;;  %v10912_v26 = vld [vmem:[%s14726_s13 + $0x974] ss:$8 sps:$4 sm:$0xff]  }
 0x60e   :  { %8195 = vmatprep.subr.bf16.mxu1 %v10849_v20  ;;  %v5918_v20 = vrot.slane %v5913_v6, %v11906_v38 }
 0x610   :  { %8143 = vmatpush1.bf16.msra.mxu0 %v10844_v19  ;;  %v10915_v19 = vld [vmem:[%s14726_s13 + $0xa14] ss:$8 sps:$4 sm:$0xff]  }
 0x611   :  { %8196 = vmatpush2.bf16.msra.mxu1 %v10847_v4  ;;  %8144 = vmatprep.subr.bf16.mxu0 %v10852_v41  ;;  %v10910_v4 = vld [vmem:[%s14726_s13 + $0x970] ss:$8 sps:$4 sm:$0xff]   ;;  %v5922_v41 = vrot.slane %v5913_v6, %v12018_v47  ;;  %v10969_v6 = vld [vmem:[%s14726_s13 + $0xa84] ss:$8 sps:$4 sm:$0xff]  }
 0x612   :  { %8197 = vmatprep.subr.bf16.mxu1 %v10855_v52  ;;  %v5519_v52 = vpack.c.bf16 %v14127_v30, %v14127_v30  ;;  %v10921_v30 = vld [vmem:[%s14726_s13 + $0xa04] ss:$8 sps:$4 sm:$0xff]  }
 0x614   :  { %8145 = vmatpush1.bf16.msra.mxu0 %v10850_v51  ;;  %v14360_v51 = vpop.f32.mrf.mxu0 }
 0x615   :  { %8198 = vmatpush2.bf16.msra.mxu1 %v10853_v45  ;;  %8146 = vmatprep.subr.bf16.mxu0 %v10858_v11  ;;  %v10913_v45 = vld [vmem:[%s14726_s13 + $0xa10] ss:$8 sps:$4 sm:$0xff]   ;;  %v10918_v11 = vld [vmem:[%s14726_s13 + $0x964] ss:$8 sps:$4 sm:$0xff]  }
 0x616   :  { %8199 = vmatprep.subr.bf16.mxu1 %v10861_v33  ;;  %v5524_v33 = vpack.c.bf16 %v5448_v37, %v5448_v37  ;;  %v10961_v37 = vld [vmem:[%s14726_s13 + $0xa90] ss:$8 sps:$4 sm:$0xff]  }
 0x618   :  { %8147 = vmatpush1.bf16.msra.mxu0 %v10856_v61  ;;  %v7880_v61 = vadd.f32 %v14081_v42, %v5918_v20  ;;  %v10919_v42 = vld [vmem:[%s14726_s13 + $0xa00] ss:$8 sps:$4 sm:$0xff]   ;;  %v10970_v20 = vld [vmem:[%s14726_s13 + $0x9d0] ss:$8 sps:$4 sm:$0xff]  }
 0x619   :  { %8200 = vmatpush2.bf16.msra.mxu1 %v10859_v16  ;;  %8148 = vmatprep.subr.bf16.mxu0 %v10864_v50  ;;  %v7882_v50 = vadd.f32 %v14092_v17, %v5922_v41  ;;  %v10973_v41 = vld [vmem:[%s14726_s13 + $0x9c0] ss:$8 sps:$4 sm:$0xff]  }
 0x61a   :  { %8201 = vmatprep.subr.bf16.mxu1 %v10867_v44 }
 0x61c   :  { %8149 = vmatpush2.bf16.msra.mxu0 %v10862_v62  ;;  %v10916_v62 = vld [vmem:[%s14726_s13 + $0x960] ss:$8 sps:$4 sm:$0xff]  }
 0x61d   :  { %8202 = vmatpush2.bf16.msra.mxu1 %v10865_v36  ;;  %8150 = vmatprep.subr.bf16.mxu0 %v10870_v56  ;;  %v10924_v56 = vld [vmem:[%s14726_s13 + $0x954] ss:$8 sps:$4 sm:$0xff]  }
 0x61e   :  { %8203 = vmatprep.subr.bf16.mxu1 %v10873_v18 }
 0x620   :  { %8151 = vmatpush2.bf16.msra.mxu0 %v10868_v34  ;;  %v10927_v34 = vld [vmem:[%s14726_s13 + $0xaf4] ss:$8 sps:$4 sm:$0xff]  }
 0x621   :  { %8204 = vmatpush2.bf16.msra.mxu1 %v10871_v24  ;;  %8152 = vmatprep.subr.bf16.mxu0 %v10876_v7  ;;  %v10922_v7 = vld [vmem:[%s14726_s13 + $0x950] ss:$8 sps:$4 sm:$0xff]  }
 0x622   :  { %8255 = vmatprep.subr.bf16.mxu1 %v10879_v1 }
 0x624   :  { %8153 = vmatpush2.bf16.msra.mxu0 %v10874_v13  ;;  %8206 = vmatmul.mubr.bf16.vlgmr.msra.gmra.mxu1 %v5521_v60  ;;  %v14285_v48 = vpop.f32.mrf.mxu1  ;;  %v10925_v13 = vld [vmem:[%s14726_s13 + $0xaf0] ss:$8 sps:$4 sm:$0xff]  }
 0x625   :  { %8256 = vmatpush1.bf16.msra.mxu1 %v10877_v0  ;;  %8154 = vmatprep.subr.bf16.mxu0 %v10882_v25  ;;  %v10930_v0 = vld [vmem:[%s14726_s13 + $0x944] ss:$8 sps:$4 sm:$0xff]  }
 0x626   :  { %8257 = vmatprep.subr.bf16.mxu1 %v10885_v54  ;;  %8287 = vmatprep.mubr.bf16.mxu1 %v5526_v43  ;;  %v14296_v3 = vpop.f32.mrf.mxu1  ;;  %v10933_v25 = vld [vmem:[%s14726_s13 + $0xae4] ss:$8 sps:$4 sm:$0xff]   ;;  %v10928_v54 = vld [vmem:[%s14726_s13 + $0x940] ss:$8 sps:$4 sm:$0xff]  }
 0x627   :  { %v10931_v43 = vld [vmem:[%s14726_s13 + $0xae0] ss:$8 sps:$4 sm:$0xff]  }
 0x628   :  { %8155 = vmatpush2.bf16.msra.mxu0 %v10880_v57  ;;  %v7965_v15 = vpop.f32.mrf.mxu1  ;;  %v10936_v57 = vld [vmem:[%s14726_s13 + $0x934] ss:$8 sps:$4 sm:$0xff]  }
 0x629   :  { %8258 = vmatpush1.bf16.msra.mxu1 %v10883_v32  ;;  %8156 = vmatprep.subr.bf16.mxu0 %v10888_v49  ;;  %v10934_v32 = vld [vmem:[%s14726_s13 + $0x930] ss:$8 sps:$4 sm:$0xff]   ;;  %v10943_v15 = vld [vmem:[%s14726_s13 + $0xac0] ss:$8 sps:$4 sm:$0xff]  }
 0x62a   :  { %8259 = vmatprep.subr.bf16.mxu1 %v10891_v9  ;;  %v7966_v14 = vpop.f32.mrf.mxu1  ;;  %v10937_v49 = vld [vmem:[%s14726_s13 + $0xad0] ss:$8 sps:$4 sm:$0xff]   ;;  %v10942_v9 = vld [vmem:[%s14726_s13 + $0x924] ss:$8 sps:$4 sm:$0xff]  }
 0x62b   :  { %v10949_v14 = vld [vmem:[%s14726_s13 + $0xab0] ss:$8 sps:$4 sm:$0xff]  }
 0x62c   :  { %8157 = vmatpush2.bf16.msra.mxu0 %v10886_v21  ;;  %v10940_v21 = vld [vmem:[%s14726_s13 + $0x920] ss:$8 sps:$4 sm:$0xff]  }
 0x62d   :  { %8260 = vmatpush1.bf16.msra.mxu1 %v10889_v31  ;;  %8158 = vmatprep.subr.bf16.mxu0 %v10894_v12  ;;  %v10948_v31 = vld [vmem:[%s14726_s13 + $0x914] ss:$8 sps:$4 sm:$0xff]  }
 0x62e   :  { %8261 = vmatprep.subr.bf16.mxu1 %v10897_v2  ;;  %v10951_v12 = vld [vmem:[%s14726_s13 + $0xab4] ss:$8 sps:$4 sm:$0xff]   ;;  %v10946_v2 = vld [vmem:[%s14726_s13 + $0x910] ss:$8 sps:$4 sm:$0xff]  }
 0x630   :  { %8159 = vmatpush2.bf16.msra.mxu0 %v10892_v46  ;;  %v10954_v46 = vld [vmem:[%s14726_s13 + $0x904] ss:$8 sps:$4 sm:$0xff]  }
 0x631   :  { %8262 = vmatpush1.bf16.msra.mxu1 %v10895_v22  ;;  %8160 = vmatprep.subr.bf16.mxu0 %v10900_v10  ;;  %v10957_v22 = vld [vmem:[%s14726_s13 + $0xaa4] ss:$8 sps:$4 sm:$0xff]   ;;  %v10952_v10 = vld [vmem:[%s14726_s13 + $0x900] ss:$8 sps:$4 sm:$0xff]  }
 0x632   :  { %8263 = vmatprep.subr.bf16.mxu1 %v10903_v8  ;;  %v10955_v8 = vld [vmem:[%s14726_s13 + $0xaa0] ss:$8 sps:$4 sm:$0xff]  }
 0x634   :  { %8161 = vmatpush2.bf16.msra.mxu0 %v10898_v5  ;;  %v10960_v5 = vld [vmem:[%s14726_s13 + $0x9f4] ss:$8 sps:$4 sm:$0xff]  }
 0x635   :  { %8264 = vmatpush1.bf16.msra.mxu1 %v10901_v35  ;;  %8162 = vmatprep.subr.bf16.mxu0 %v10906_v29  ;;  %v10963_v35 = vld [vmem:[%s14726_s13 + $0xa94] ss:$8 sps:$4 sm:$0xff]   ;;  %v10958_v29 = vld [vmem:[%s14726_s13 + $0x9f0] ss:$8 sps:$4 sm:$0xff]  }
 0x636   :  { %8265 = vmatprep.subr.bf16.mxu1 %v10909_v55  ;;  %v10966_v55 = vld [vmem:[%s14726_s13 + $0x9e4] ss:$8 sps:$4 sm:$0xff]  }
 0x638   :  { %8163 = vmatpush2.bf16.msra.mxu0 %v10904_v40  ;;  %v10964_v40 = vld [vmem:[%s14726_s13 + $0x9e0] ss:$8 sps:$4 sm:$0xff]  }
 0x639   :  { %8266 = vmatpush1.bf16.msra.mxu1 %v10907_v63  ;;  %8214 = vmatprep.subr.bf16.mxu0 %v10912_v26  ;;  %v10967_v63 = vld [vmem:[%s14726_s13 + $0xa80] ss:$8 sps:$4 sm:$0xff]   ;;  %v10972_v26 = vld [vmem:[%s14726_s13 + $0x9d4] ss:$8 sps:$4 sm:$0xff]  }
 0x63a   :  { %8267 = vmatprep.subr.bf16.mxu1 %v10915_v19  ;;  %v10975_v19 = vld [vmem:[%s14726_s13 + $0x9c4] ss:$8 sps:$4 sm:$0xff]  }
 0x63b   :  { %8165 = vmatmul.mubr.bf16.vlgmr.msra.gmra.mxu0 %v5519_v52  ;;  %v7920_v16 = vpop.f32.mrf.mxu0 }
 0x63c   :  { %8215 = vmatpush1.bf16.msra.mxu0 %v10910_v4  ;;  %v7921_v44 = vadd.f32 %v7920_v16, %v7880_v61  ;;  %8246 = vmatprep.mubr.bf16.mxu0 %v5524_v33  ;;  %v5525_v4 = vpack.c.bf16 %v14051_v23, %v14051_v23  ;;  %v10976_v23 = vld [vmem:[%s14726_s13 + $0x9b0] ss:$8 sps:$4 sm:$0xff]   ;;  %v10981_v61 = vld [vmem:[%s14726_s13 + $0x9a4] ss:$8 sps:$4 sm:$0xff]   ;;  %v10979_v16 = vld [vmem:[%s14726_s13 + $0x9a0] ss:$8 sps:$4 sm:$0xff]  }
 0x63d   :  { %8268 = vmatpush1.bf16.msra.mxu1 %v10913_v45  ;;  %8216 = vmatprep.subr.bf16.mxu0 %v10918_v11  ;;  %v7922_v36 = vpop.f32.mrf.mxu0  ;;  %v10978_v45 = vld [vmem:[%s14726_s13 + $0x9b4] ss:$8 sps:$4 sm:$0xff]  }
 0x63e   :  { %v7923_v18 = vadd.f32 %v7922_v36, %v7882_v50  ;;  %8269 = vmatprep.subr.bf16.mxu1 %v10921_v30  ;;  %v14383_v17 = vadd.f32 %v14285_v48, %v7921_v44  ;;  %v10939_v48 = vld [vmem:[%s14726_s13 + $0xad4] ss:$8 sps:$4 sm:$0xff]   ;;  %v10982_v44 = vld [vmem:[%s14726_s13 + $0x990] ss:$8 sps:$4 sm:$0xff]   ;;  %v10985_v36 = vld [vmem:[%s14726_s13 + $0x980] ss:$8 sps:$4 sm:$0xff]  }
 0x63f   :  { %v7924_v24 = vpop.f32.mrf.mxu0  ;;  %v10984_v50 = vld [vmem:[%s14726_s13 + $0x994] ss:$8 sps:$4 sm:$0xff]  }
 0x640   :  { %8217 = vmatpush1.bf16.msra.mxu0 %v10916_v62  ;;  %v14392_v1 = vadd.f32 %v14296_v3, %v7923_v18  ;;  %v10945_v3 = vld [vmem:[%s14726_s13 + $0xac4] ss:$8 sps:$4 sm:$0xff]   ;;  %v5523_v18 = vpack.c.bf16 %v14319_v27, %v14319_v27  ;;  %v5528_v24 = vpack.c.bf16 %v14360_v51, %v14360_v51  ;;  %v10996_v27 = vld [vmem:[%s14726_s13 + $0xb54] ss:$8 sps:$4 sm:$0xff]  }
 0x641   :  { %8270 = vmatpush1.bf16.msra.mxu1 %v10919_v42  ;;  %8218 = vmatprep.subr.bf16.mxu0 %v10924_v56  ;;  %v7925_v60 = vpop.f32.mrf.mxu0  ;;  %v10987_v62 = vld [vmem:[%s14726_s13 + $0x984] ss:$8 sps:$4 sm:$0xff]   ;;  %v10990_v42 = vld [vmem:[%s14726_s13 + $0xb74] ss:$8 sps:$4 sm:$0xff]   ;;  %v10988_v56 = vld [vmem:[%s14726_s13 + $0xb70] ss:$8 sps:$4 sm:$0xff]  }
 0x642   :  { %8271 = vmatprep.subr.bf16.mxu1 %v10927_v34  ;;  %v10993_v34 = vld [vmem:[%s14726_s13 + $0xb64] ss:$8 sps:$4 sm:$0xff]  }
 0x644   :  { %8219 = vmatpush1.bf16.msra.mxu0 %v10922_v7 }
 0x645   :  { %8272 = vmatpush2.bf16.msra.mxu1 %v10925_v13  ;;  %8220 = vmatprep.subr.bf16.mxu0 %v10930_v0  ;;  %v10991_v13 = vld [vmem:[%s14726_s13 + $0xb60] ss:$8 sps:$4 sm:$0xff]  }
 0x646   :  { %8273 = vmatprep.subr.bf16.mxu1 %v10933_v25 }
 0x648   :  { %8221 = vmatpush1.bf16.msra.mxu0 %v10928_v54 }
 0x649   :  { %8274 = vmatpush2.bf16.msra.mxu1 %v10931_v43  ;;  %8222 = vmatprep.subr.bf16.mxu0 %v10936_v57 }
 0x64a   :  { %8275 = vmatprep.subr.bf16.mxu1 %v10939_v48  ;;  %v10999_v48 = vld [vmem:[%s14726_s13 + $0xb44] ss:$8 sps:$4 sm:$0xff]  }
 0x64c   :  { %8223 = vmatpush1.bf16.msra.mxu0 %v10934_v32  ;;  %v11002_v32 = vld [vmem:[%s14726_s13 + $0xb34] ss:$8 sps:$4 sm:$0xff]  }
 0x64d   :  { %8276 = vmatpush2.bf16.msra.mxu1 %v10937_v49  ;;  %8224 = vmatprep.subr.bf16.mxu0 %v10942_v9  ;;  %v11000_v49 = vld [vmem:[%s14726_s13 + $0xb30] ss:$8 sps:$4 sm:$0xff]   ;;  %v11005_v9 = vld [vmem:[%s14726_s13 + $0xb24] ss:$8 sps:$4 sm:$0xff]  }
 0x64e   :  { %8277 = vmatprep.subr.bf16.mxu1 %v10945_v3  ;;  %v11003_v3 = vld [vmem:[%s14726_s13 + $0xb20] ss:$8 sps:$4 sm:$0xff]  }
 0x650   :  { %8225 = vmatpush1.bf16.msra.mxu0 %v10940_v21  ;;  %v11008_v21 = vld [vmem:[%s14726_s13 + $0xb14] ss:$8 sps:$4 sm:$0xff]  }
 0x651   :  { %8278 = vmatpush2.bf16.msra.mxu1 %v10943_v15  ;;  %8226 = vmatprep.subr.bf16.mxu0 %v10948_v31  ;;  %v11006_v15 = vld [vmem:[%s14726_s13 + $0xb10] ss:$8 sps:$4 sm:$0xff]   ;;  %v11011_v31 = vld [vmem:[%s14726_s13 + $0xb04] ss:$8 sps:$4 sm:$0xff]  }
 0x652   :  { %8279 = vmatprep.subr.bf16.mxu1 %v10951_v12  ;;  %v11009_v12 = vld [vmem:[%s14726_s13 + $0xb00] ss:$8 sps:$4 sm:$0xff]  }
 0x654   :  { %8227 = vmatpush1.bf16.msra.mxu0 %v10946_v2  ;;  %v11014_v2 = vld [vmem:[%s14726_s13 + $0xbf4] ss:$8 sps:$4 sm:$0xff]  }
 0x655   :  { %8280 = vmatpush2.bf16.msra.mxu1 %v10949_v14  ;;  %8228 = vmatprep.subr.bf16.mxu0 %v10954_v46  ;;  %v11012_v14 = vld [vmem:[%s14726_s13 + $0xbf0] ss:$8 sps:$4 sm:$0xff]   ;;  %v11017_v46 = vld [vmem:[%s14726_s13 + $0xbe4] ss:$8 sps:$4 sm:$0xff]  }
 0x656   :  { %8281 = vmatprep.subr.bf16.mxu1 %v10957_v22  ;;  %v11015_v22 = vld [vmem:[%s14726_s13 + $0xbe0] ss:$8 sps:$4 sm:$0xff]  }
 0x658   :  { %8229 = vmatpush1.bf16.msra.mxu0 %v10952_v10  ;;  %v11020_v10 = vld [vmem:[%s14726_s13 + $0xbd4] ss:$8 sps:$4 sm:$0xff]  }
 0x659   :  { %8282 = vmatpush2.bf16.msra.mxu1 %v10955_v8  ;;  %8230 = vmatprep.subr.bf16.mxu0 %v10960_v5  ;;  %v11018_v8 = vld [vmem:[%s14726_s13 + $0xbd0] ss:$8 sps:$4 sm:$0xff]   ;;  %v11023_v5 = vld [vmem:[%s14726_s13 + $0xbc4] ss:$8 sps:$4 sm:$0xff]  }
 0x65a   :  { %8283 = vmatprep.subr.bf16.mxu1 %v10963_v35  ;;  %v11021_v35 = vld [vmem:[%s14726_s13 + $0xbc0] ss:$8 sps:$4 sm:$0xff]  }
 0x65c   :  { %8231 = vmatpush2.bf16.msra.mxu0 %v10958_v29 }
 0x65d   :  { %8284 = vmatpush2.bf16.msra.mxu1 %v10961_v37  ;;  %8232 = vmatprep.subr.bf16.mxu0 %v10966_v55  ;;  %v11026_v37 = vld [vmem:[%s14726_s13 + $0xbb4] ss:$8 sps:$4 sm:$0xff]  }
 0x65e   :  { %8285 = vmatprep.subr.bf16.mxu1 %v10969_v6  ;;  %v11024_v6 = vld [vmem:[%s14726_s13 + $0xbb0] ss:$8 sps:$4 sm:$0xff]  }
 0x660   :  { %8233 = vmatpush2.bf16.msra.mxu0 %v10964_v40 }
 0x661   :  { %8286 = vmatpush2.bf16.msra.mxu1 %v10967_v63  ;;  %8234 = vmatprep.subr.bf16.mxu0 %v10972_v26  ;;  %v11029_v63 = vld [vmem:[%s14726_s13 + $0xba4] ss:$8 sps:$4 sm:$0xff]  }
 0x664   :  { %8235 = vmatpush2.bf16.msra.mxu0 %v10970_v20  ;;  %8288 = vmatmul.mubr.bf16.vlgmr.msra.gmra.mxu1 %v5525_v4  ;;  %v8043_v52 = vpop.f32.mrf.mxu1  ;;  %v11027_v20 = vld [vmem:[%s14726_s13 + $0xba0] ss:$8 sps:$4 sm:$0xff]   ;;  %v11030_v4 = vld [vmem:[%s14726_s13 + $0xb90] ss:$8 sps:$4 sm:$0xff]  }
 0x665   :  { %8236 = vmatprep.subr.bf16.mxu0 %v10975_v19  ;;  %8490 = vmatprep.mubr.bf16.mxu1 %v11091_v28  ;;  %v11032_v19 = vld [vmem:[%s14726_s13 + $0xb94] ss:$8 sps:$4 sm:$0xff]  }
 0x666   :  { %v8045_v11 = vpop.f32.mrf.mxu1 }
 0x668   :  { %8237 = vmatpush2.bf16.msra.mxu0 %v10973_v41  ;;  %v8047_v33 = vpop.f32.mrf.mxu1  ;;  %v11035_v41 = vld [vmem:[%s14726_s13 + $0xb84] ss:$8 sps:$4 sm:$0xff]  }
 0x669   :  { %8238 = vmatprep.subr.bf16.mxu0 %v10978_v45  ;;  %v5527_v45 = vpack.c.bf16 %v14345_v59, %v14345_v59 }
 0x66a   :  { %v8048_v30 = vpop.f32.mrf.mxu1 }
 0x66c   :  { %8239 = vmatpush2.bf16.msra.mxu0 %v10976_v23 }
 0x66d   :  { %8240 = vmatprep.subr.bf16.mxu0 %v10981_v61 }
 0x670   :  { %8241 = vmatpush2.bf16.msra.mxu0 %v10979_v16 }
 0x671   :  { %8242 = vmatprep.subr.bf16.mxu0 %v10984_v50 }
 0x674   :  { %8243 = vmatpush2.bf16.msra.mxu0 %v10982_v44 }
 0x675   :  { %8244 = vmatprep.subr.bf16.mxu0 %v10987_v62 }
 0x678   :  { %8245 = vmatpush2.bf16.msra.mxu0 %v10985_v36 }
 0x679   :  { %8296 = vmatprep.subr.bf16.mxu0 %v10990_v42 }
 0x67b   :  { %v8002_v7 = vpop.f32.mrf.mxu0  ;;  %8247 = vmatmul.mubr.bf16.vlgmr.msra.gmra.mxu0 %v5523_v18 }
 0x67c   :  { %v8003_v60 = vadd.f32 %v8002_v7, %v14383_v17  ;;  %8297 = vmatpush1.bf16.msra.mxu0 %v10988_v56  ;;  %8328 = vmatprep.mubr.bf16.mxu0 %v5528_v24  ;;  %v10994_v17 = vld [vmem:[%s14726_s13 + $0xb50] ss:$8 sps:$4 sm:$0xff]  }
 0x67d   :  { %v8004_v0 = vpop.f32.mrf.mxu0  ;;  %8298 = vmatprep.subr.bf16.mxu0 %v10993_v34 }
 0x67e   :  { %v8005_v25 = vadd.f32 %v8004_v0, %v14392_v1  ;;  %v14541_v54 = vadd.f32 %v8043_v52, %v8003_v60  ;;  %v10997_v1 = vld [vmem:[%s14726_s13 + $0xb40] ss:$8 sps:$4 sm:$0xff]  }
 0x67f   :  { %v8006_v51 = vpop.f32.mrf.mxu0  ;;  %v11033_v52 = vld [vmem:[%s14726_s13 + $0xb80] ss:$8 sps:$4 sm:$0xff]  }
 0x680   :  { %v14543_v43 = vadd.f32 %v8045_v11, %v8005_v25  ;;  %8299 = vmatpush1.bf16.msra.mxu0 %v10991_v13 }
 0x681   :  { %8300 = vmatprep.subr.bf16.mxu0 %v10996_v27  ;;  %v8007_v57 = vpop.f32.mrf.mxu0 }
 0x684   :  { %8301 = vmatpush1.bf16.msra.mxu0 %v10994_v17 }
 0x685   :  { %8302 = vmatprep.subr.bf16.mxu0 %v10999_v48 }
 0x688   :  { %8303 = vmatpush1.bf16.msra.mxu0 %v10997_v1 }
 0x689   :  { %8304 = vmatprep.subr.bf16.mxu0 %v11002_v32 }
 0x68c   :  { %8305 = vmatpush1.bf16.msra.mxu0 %v11000_v49 }
 0x68d   :  { %8306 = vmatprep.subr.bf16.mxu0 %v11005_v9  ;;  %v11038_v9 = vld [vmem:[%s14728_s15 + $0x44] ss:$16 sps:$4 sm:$0xff]  }
 0x68e   :  { %8468 = vmatprep.subr.bf16.mxu1 %v11038_v9 }
 0x690   :  { %8307 = vmatpush1.bf16.msra.mxu0 %v11003_v3  ;;  %v11041_v3 = vld [vmem:[%s14728_s15 + $0x4c] ss:$16 sps:$4 sm:$0xff]  }
 0x691   :  { %8308 = vmatprep.subr.bf16.mxu0 %v11008_v21  ;;  %v11036_v21 = vld [vmem:[%s14728_s15 + $0x40] ss:$16 sps:$4 sm:$0xff]  }
 0x692   :  { %8469 = vmatpush1.bf16.msra.mxu1 %v11036_v21 }
 0x694   :  { %8309 = vmatpush1.bf16.msra.mxu0 %v11006_v15  ;;  %v11039_v15 = vld [vmem:[%s14728_s15 + $0x48] ss:$16 sps:$4 sm:$0xff]  }
 0x695   :  { %8310 = vmatprep.subr.bf16.mxu0 %v11011_v31  ;;  %v11044_v31 = vld [vmem:[%s14728_s15 + $0x24] ss:$16 sps:$4 sm:$0xff]  }
 0x696   :  { %8470 = vmatprep.subr.bf16.mxu1 %v11044_v31 }
 0x698   :  { %8311 = vmatpush1.bf16.msra.mxu0 %v11009_v12  ;;  %v11047_v12 = vld [vmem:[%s14728_s15 + $0x2c] ss:$16 sps:$4 sm:$0xff]  }
 0x699   :  { %8312 = vmatprep.subr.bf16.mxu0 %v11014_v2  ;;  %v11042_v2 = vld [vmem:[%s14728_s15 + $0x20] ss:$16 sps:$4 sm:$0xff]  }
 0x69a   :  { %8471 = vmatpush1.bf16.msra.mxu1 %v11042_v2 }
 0x69c   :  { %8313 = vmatpush2.bf16.msra.mxu0 %v11012_v14  ;;  %v11045_v14 = vld [vmem:[%s14728_s15 + $0x28] ss:$16 sps:$4 sm:$0xff]  }
 0x69d   :  { %8314 = vmatprep.subr.bf16.mxu0 %v11017_v46 }
 0x6a0   :  { %8315 = vmatpush2.bf16.msra.mxu0 %v11015_v22 }
 0x6a1   :  { %8316 = vmatprep.subr.bf16.mxu0 %v11020_v10  ;;  %v11050_v10 = vld [vmem:[%s14728_s15 + $0x4] ss:$16 sps:$4 sm:$0xff]  }
 0x6a2   :  { %8472 = vmatprep.subr.bf16.mxu1 %v11050_v10 }
 0x6a4   :  { %8317 = vmatpush2.bf16.msra.mxu0 %v11018_v8  ;;  %v8125_v29 = vpop.f32.mrf.mxu1  ;;  %v11053_v8 = vld [vmem:[%s14728_s15 + $0xc] ss:$16 sps:$4 sm:$0xff]  }
 0x6a5   :  { %8318 = vmatprep.subr.bf16.mxu0 %v11023_v5 }
 0x6a6   :  { %v8127_v55 = vpop.f32.mrf.mxu1 }
 0x6a8   :  { %8319 = vmatpush2.bf16.msra.mxu0 %v11021_v35  ;;  %v8129_v40 = vpop.f32.mrf.mxu1  ;;  %v11048_v35 = vld [vmem:[%s14728_s15] ss:$16 sps:$4 sm:$0xff]  }
 0x6a9   :  { %8320 = vmatprep.subr.bf16.mxu0 %v11026_v37  ;;  %8473 = vmatpush1.bf16.msra.mxu1 %v11048_v35 }
 0x6aa   :  { %v8130_v26 = vpop.f32.mrf.mxu1  ;;  %9779 = vmatprep.subr.bf16.mxu1 %v13163_v53 }
 0x6ac   :  { %8321 = vmatpush2.bf16.msra.mxu0 %v11024_v6 }
 0x6ad   :  { %8322 = vmatprep.subr.bf16.mxu0 %v11029_v63 }
 0x6b0   :  { %8323 = vmatpush2.bf16.msra.mxu0 %v11027_v20 }
 0x6b1   :  { %8324 = vmatprep.subr.bf16.mxu0 %v11032_v19 }
 0x6b4   :  { %8325 = vmatpush2.bf16.msra.mxu0 %v11030_v4 }
 0x6b5   :  { %8326 = vmatprep.subr.bf16.mxu0 %v11035_v41 }
 0x6b8   :  { %8327 = vmatpush2.bf16.msra.mxu0 %v11033_v52 }
 0x6b9   :  { %8509 = vmatprep.subr.bf16.mxu0 %v11041_v3 }
 0x6bb   :  { %v8084_v11 = vpop.f32.mrf.mxu0  ;;  %8329 = vmatmul.mubr.bf16.vlgmr.msra.gmra.mxu0 %v5527_v45 }
 0x6bc   :  { %v8085_v23 = vadd.f32 %v8084_v11, %v14541_v54  ;;  %8531 = vmatprep.mubr.bf16.mxu0 %v11091_v28  ;;  %8510 = vmatpush1.bf16.msra.mxu0 %v11039_v15 }
 0x6bd   :  { %v8086_v33 = vpop.f32.mrf.mxu0  ;;  %8511 = vmatprep.subr.bf16.mxu0 %v11047_v12 }
 0x6be   :  { %v8087_v61 = vadd.f32 %v8086_v33, %v14543_v43  ;;  %v8126_v30 = vadd.f32 %v8125_v29, %v8085_v23  ;;  %v11051_v29 = vld [vmem:[%s14728_s15 + $0x8] ss:$16 sps:$4 sm:$0xff]  }
 0x6bf   :  { %v8088_v16 = vpop.f32.mrf.mxu0 }
 0x6c0   :  { %v8128_v50 = vadd.f32 %v8127_v55, %v8087_v61  ;;  %8512 = vmatpush1.bf16.msra.mxu0 %v11045_v14  ;;  %v11054_v16 = vld [vmem:[%s14730_s17 + $0x28] sm:$0xff]  }
 0x6c1   :  { %v8089_v44 = vpop.f32.mrf.mxu0  ;;  %8513 = vmatprep.subr.bf16.mxu0 %v11053_v8 }
 0x6c2   :  { %v11056_v44 = vld [vmem:[%s14730_s17 + $0x18] sm:$0xff]  }
 0x6c4   :  { %8514 = vmatpush1.bf16.msra.mxu0 %v11051_v29 }
 0x6e4   :  { %v8207_v62 = vpop.f32.mrf.mxu1 }
 0x6e6   :  { %v8209_v36 = vpop.f32.mrf.mxu1 }
 0x6e8   :  { %v8211_v42 = vpop.f32.mrf.mxu1 }
 0x6ea   :  { %v8212_v56 = vpop.f32.mrf.mxu1 }
 0x6fb   :  { %v8166_v18 = vpop.f32.mrf.mxu0 }
 0x6fc   :  { %v8167_v34 = vadd.f32 %v8166_v18, %v8126_v30 }
 0x6fd   :  { %v8168_v59 = vpop.f32.mrf.mxu0 }
 0x6fe   :  { %v8169_v24 = vadd.f32 %v8168_v59, %v8128_v50  ;;  %v8208_v7 = vadd.f32 %v8207_v62, %v8167_v34  ;;  %v11055_v50 = vld [vmem:[%s14730_s17 + $0x20] sm:$0xff]  }
 0x6ff   :  { %v8170_v60 = vpop.f32.mrf.mxu0  ;;  %v8372_v62 = vld [vmem:[%s14729_s16] sm:$0xf] }
 0x700   :  { %v8210_v13 = vadd.f32 %v8209_v36, %v8169_v24  ;;  %v11057_v36 = vld [vmem:[%s14730_s17 + $0x10] sm:$0xff]   ;;  %v8377_v42 = vrot.slane %v8372_v62, %v11906_v38  ;;  %v8385_v56 = vrot.slane %v8372_v62, %v11909_v39  ;;  %v8381_v18 = vrot.slane %v8372_v62, %v12018_v47  ;;  %v11058_v24 = vld [vmem:[%s14730_s17 + $0x8] sm:$0xff]   ;;  %v11059_v47 = vld [vmem:[%s14730_s17] sm:$0xff]  }
 0x701   :  { %v8171_v0 = vpop.f32.mrf.mxu0  ;;  %v8389_v9 = vrot.slane %v8372_v62, %v11938_v58 }
 0x724   :  { %v8289_v28 = vpop.f32.mrf.mxu1 }
 0x726   :  { %v8291_v27 = vpop.f32.mrf.mxu1 }
 0x728   :  { %v8293_v25 = vpop.f32.mrf.mxu1 }
 0x72a   :  { %v8294_v54 = vpop.f32.mrf.mxu1 }
 0x73b   :  { %v8248_v51 = vpop.f32.mrf.mxu0 }
 0x73c   :  { %v8249_v43 = vadd.f32 %v8248_v51, %v8208_v7 }
 0x73d   :  { %v8250_v17 = vpop.f32.mrf.mxu0 }
 0x73e   :  { %v8251_v57 = vadd.f32 %v8250_v17, %v8210_v13  ;;  %v8290_v48 = vadd.f32 %v8289_v28, %v8249_v43 }
 0x73f   :  { %v8252_v1 = vpop.f32.mrf.mxu0 }
 0x740   :  { %v8292_v32 = vadd.f32 %v8291_v27, %v8251_v57 }
 0x741   :  { %v8253_v49 = vpop.f32.mrf.mxu0 }
 0x77b   :  { %v8330_v46 = vpop.f32.mrf.mxu0 }
 0x77c   :  { %v8331_v22 = vadd.f32 %v8330_v46, %v8290_v48 }
 0x77d   :  { %v8332_v5 = vpop.f32.mrf.mxu0 }
 0x77e   :  { %v8333_v37 = vadd.f32 %v8332_v5, %v8292_v32  ;;  %8338 = vrot.lane.b32.xlu0 %v8331_v22, %s11101_s29 }
 0x77f   :  { %v8334_v55 = vpop.f32.mrf.mxu0 }
 0x780   :  { %v9820_v6 = vpack.i.bf16 %v8333_v37, %v8331_v22 }
 0x781   :  { %v8335_v40 = vpop.f32.mrf.mxu0 }
 0x782   :  { %9821 = vrot.lane.b32.xlu1 %v9820_v6, %s11102_s0  ;;  %8350 = vrot.lane.b32.xlu0 %v8333_v37, %s11095_s23 }
 0x786   :  { %8354 = vrot.lane.b32.xlu1 %v8333_v37, %s11105_s11 }
 0x7f0   :  { %v8339_v63 = vpop.permute.xlu0 %8338 }
 0x7f1   :  { %v8341_v4 = vmax.f32 %v8331_v22, %v8339_v63  ;;  %v9592_v22 = vld [vmem:[%s14731_s18] ss:$0 sm:$0xff]  ;;  %s11068_s18 = scalar_lea.vmem %s8685_s5, 32 }
 0x7f2   :  { %p11069_p0 = scmp.ne.s32.totalorder %s8685_s5, %s11068_s18  ;;  %p11074_p2 = scmp.lt.s32.totalorder %s11068_s18, %s11068_s18 }
 0x7f4   :  { %v9822_v26 = vpop.permute.xlu1 %9821  ;;  %v8351_v45 = vpop.permute.xlu0 %8350  ;;  %p11075_p3 = por %p11074_p2, %p11073_p1 }
 0x7f5   :  { %v9824_v20 = vunpack.i.h.bf16 %v9822_v26  ;;  %v9823_v19 = vunpack.i.l.bf16 %v9822_v26 }
 0x7f6   :  { %p11076_p4 = pnand %p11075_p3, %p11069_p0 }
 0x7f7   :  { %v8347_v41 = vsel %vm1400_vm0, %v9823_v19, %v9824_v20 }
 0x7f8   :  { %v8349_v52 = vmax.f32 %v8341_v4, %v8347_v41  ;;  %v8355_v23 = vpop.permute.xlu1 %8354 }
 0x7fa   :  { %v8353_v11 = vmax.f32 %v8349_v52, %v8351_v45 }
 0x7fc   :  { %v8357_v33 = vmax.f32 %v8353_v11, %v8355_v23 }
 0x7fe   :  { %v8358_v61 = vmax.f32 %v8357_v33, 0.0 }
 0x800   :  { %v8359_v30 = vpack.c.bf16 %v8358_v61, %v8358_v61 }
 0x802   :  { %9590 = vmatmul.mubr.msk.bf16.vlgmr.msra.gmra.mxu1 %vm8454_vm7, %v8359_v30  ;;  %9591 = vmatmul.mubr.msk.bf16.vlgmr.msra.gmra.mxu0 %vm8454_vm7, %v8359_v30 }
 0x803   :  { %9780 = vmatpush3.bf16.msra.mxu1 %v11054_v16  ;;  %9791 = vmatprep.mubr.msk.bf16.mxu1 %vm11106_vm8, %v13163_v53 }
 0x804   :  { %9781 = vmatprep.subr.bf16.mxu1 %v13163_v53 }
 0x807   :  { %9782 = vmatpush3.bf16.msra.mxu1 %v11055_v50 }
 0x808   :  { %9783 = vmatprep.subr.bf16.mxu1 %v13163_v53 }
 0x80b   :  { %9784 = vmatpush3.bf16.msra.mxu1 %v11056_v44 }
 0x80c   :  { %9785 = vmatprep.subr.bf16.mxu1 %v13163_v53 }
 0x80f   :  { %9786 = vmatpush3.bf16.msra.mxu1 %v11057_v36 }
 0x810   :  { %9787 = vmatprep.subr.bf16.mxu1 %v13163_v53 }
 0x813   :  { %9788 = vmatpush3.bf16.msra.mxu1 %v11058_v24 }
 0x814   :  { %9789 = vmatprep.subr.bf16.mxu1 %v13163_v53 }
 0x817   :  { %9790 = vmatpush3.bf16.msra.mxu1 %v11059_v47 }
 0x8c2   :  { %v8492_v34 = vpop.f32.mrf.mxu1  ;;  %v8533_v59 = vpop.f32.mrf.mxu0 }
 0x8c3   :  { %v8493_v13 = vadd.f32 %v8492_v34, %v8377_v42  ;;  %v8534_v0 = vadd.f32 %v8533_v59, %v8385_v56 }
 0x8c4   :  { %v8494_v7 = vpop.f32.mrf.mxu1  ;;  %v8535_v60 = vpop.f32.mrf.mxu0 }
 0x8c5   :  { %v8495_v28 = vadd.f32 %v8494_v7, %v8381_v18  ;;  %v8536_v12 = vadd.f32 %v8535_v60, %v8389_v9 }
 0x8c6   :  { %v8496_v38 = vpop.f32.mrf.mxu1  ;;  %v8537_v39 = vpop.f32.mrf.mxu0 }
 0x8c7   :  { %v9830_v27 = vpack.i.bf16 %v8534_v0, %v8495_v28  ;;  %v9825_v25 = vpack.i.bf16 %v8495_v28, %v8493_v13 }
 0x8c8   :  { %v8497_v54 = vpop.f32.mrf.mxu1  ;;  %v8538_v51 = vpop.f32.mrf.mxu0 }
 0x8c9   :  { %9831 = vrot.lane.b32.xlu1 %v9830_v27, %s11105_s11  ;;  %9826 = vrot.lane.b32.xlu0 %v9825_v25, %s11102_s0 }
 0x8cd   :  { %8558 = vrot.lane.b32.xlu0 %v8534_v0, %s11107_s3 }
 0x93b   :  { %v9832_v43 = vpop.permute.xlu1 %9831  ;;  %v9827_v17 = vpop.permute.xlu0 %9826 }
 0x93c   :  { %v9834_v57 = vunpack.i.h.bf16 %v9832_v43  ;;  %v9833_v48 = vunpack.i.l.bf16 %v9832_v43  ;;  %v9829_v1 = vunpack.i.h.bf16 %v9827_v17  ;;  %v9828_v32 = vunpack.i.l.bf16 %v9827_v17 }
 0x93e   :  { %v8546_v49 = vsel %vm1400_vm0, %v9828_v32, %v9829_v1  ;;  %v8555_v21 = vsel %vm8554_vm9, %v9833_v48, %v9834_v57 }
 0x93f   :  { %v8548_v3 = vmax.f32 %v8493_v13, %v8546_v49  ;;  %v8559_v31 = vpop.permute.xlu0 %8558 }
 0x941   :  { %v8557_v15 = vmax.f32 %v8548_v3, %v8555_v21 }
 0x943   :  { %v8561_v2 = vmax.f32 %v8557_v15, %v8559_v31 }
 0x945   :  { %v8562_v53 = vmax.f32 %v8561_v2, %v8536_v12 }
 0x947   :  { %v8563_v14 = vmax.f32 %v8562_v53, 0.0 }
 0x949   :  { %v8564_v46 = vpack.c.bf16 %v8563_v14, %v8563_v14 }
 0x94b   :  { %9792 = vmatmul.mubr.msk.bf16.vlgmr.msra.gmra.mxu1 %vm8620_vm10, %v8564_v46 }
 0xa0b   :  { %v8658_v10 = vpop.f32.mrf.mxu1 }
 0xa0c   :  { %v8659_v8 = vadd.f32 %v9592_v22, %v8658_v10 }
 0xa0d   :  { %v9793_v5 = vpop.f32.mrf.mxu1 }
 0xa0e   :  { %v8665_v58 = vsel %vm8664_vm11, %v8659_v8, -inf }
 0xa0f   :  { %8666 = vmax.xlane.f32.xlu1 %v8665_v58  ;;  %v8661_v35 = vpop.f32.mrf.mxu1 }
 0xa11   :  { %v9794_v29 = vpop.f32.mrf.mxu1 }
 0xa98   :  { %v8667_v37 = vpop.xlane.xlu1 %8666 }
 0xa99   :  { %v8668_v55 = vsub.f32 %v8659_v8, %v8667_v37 }
 0xa9b   :  { %v8669_v6 = vmul.f32 1.442695, %v8668_v55 }
 0xa9d   :  { %11060 = vpow2.f32 %v8669_v6 }
 0xaaa   :  { %v11061_v40 = vpop.eup %11060 }
 0xaab   :  { %v8671_v63 = vsel %vm8664_vm11, %v11061_v40, 0.0 }
 0xaac   :  { %8672 = vadd.xlane.f32.xlu0 %v8671_v63 }
 0xb35   :  { %v8673_v26 = vpop.xlane.xlu0 %8672 }
 0xb36   :  { %11062 = vrcp.f32 %v8673_v26 }
 0xb43   :  { %v11063_v20 = vpop.eup %11062 }
 0xb44   :  { %v8675_v19 = vmul.f32 %v11063_v20, %v11061_v40 }
 0xb46   :  { %8677 = vst.msk [vmem:[#allocation4] sm:$0x3] %vm8676_vm12, %v8675_v19 }
 0xb47   :  { %11079 = shalt.err (!%p11076_p4)
}
 0xb48   :  { %8687 = dma.vmem_to_hbm [thread:$0]  %s8685_s5, 32, %s14732_s19, [#allocation5]  }
 0xb49   :  { %11088 = dma.done.wait [#allocation5], 32  }
 0xb4a   :  { %11089 = vsyncadd [#allocation5], 4294967264 }
 0xb4b   :  { %8691 = vsyncpa [#allocation5], 1 }

</bundles_post_ra>
